<compile_context>
chip_gen: v5e
topology: v5e:2x2
jax: 0.10.0
libtpu: 0.0.40
codegen_flags: <defaults>
</compile_context>

<pallas_src>
import math

import jax
import jax.numpy as jnp
from jax import lax
from jax.experimental import pallas as pl
from jax.experimental.pallas import tpu as pltpu

# ---------------- configuration (small, consistent with the module) ----------------
D_MODEL = 32                  # d_model
NHEAD = 4                     # nhead
DH = D_MODEL // NHEAD         # head dim
DIM_FFN = 64                  # dim_feedforward
NUM_LAYERS = 2
SEQ_LEN = 64                  # e.g. an 8x8 DETR feature map, flattened
BATCH = 2
LN_EPS = 1e-5
NEG_INF = -1e9                # finite "minus infinity": robust even if a row is fully masked

# dot_general dimension-number shorthands (both forms are used by the official TPU
# flash-attention Pallas kernels, so they are known-good for Mosaic lowering).
_NT = (((1,), (1,)), ((), ()))   # contract last-with-last  : A @ B^T
_TN = (((0,), (0,)), ((), ()))   # contract first-with-first: A^T @ B


# ==================================== helpers =====================================

def _ln(x, g, b):
    """LayerNorm over the last dim (biased variance, like torch.nn.LayerNorm)."""
    mean = jnp.mean(x, axis=-1, keepdims=True)
    var = jnp.mean((x - mean) ** 2, axis=-1, keepdims=True)
    return (x - mean) * lax.rsqrt(var + LN_EPS) * g + b


# ==================================== kernel ======================================

def _encoder_stack_kernel(
    src_ref, pos_ref, bias_ref,
    wqk_ref, bqk_ref, wv_ref, bv_ref, wo_ref, bo_ref,
    w1_ref, b1_ref, w2_ref, b2_ref,
    ln1_g_ref, ln1_b_ref, ln2_g_ref, ln2_b_ref,
    out_ref, x_ref,
):
    """One encoder layer per grid step; activation carried in VMEM scratch x_ref."""
    layer = pl.program_id(0)

    @pl.when(layer == 0)
    def _():
        x_ref[...] = src_ref[...]                      # load the input only at layer 0

    x = x_ref[...]                                     # [NL, E] f32 activation carry
    xpos = (x + pos_ref[...]).astype(jnp.bfloat16)     # [NL, E]

    # ---- Q/K (fused) and V projections, TRANSPOSED outputs [feat, NL] so that the
    #      per-head slices below are sublane-aligned (no 8-wide lane slices) ----------
    qkT = lax.dot_general(wqk_ref[0], xpos, _NT,
                          preferred_element_type=jnp.float32) + bqk_ref[0]     # [2E, NL]
    vT = lax.dot_general(wv_ref[0], x.astype(jnp.bfloat16), _NT,
                         preferred_element_type=jnp.float32) + bv_ref[0]       # [E, NL]

    bias_all = bias_ref[...]                           # [N, L] additive key-padding bias

    attn_rows = []
    for b in range(BATCH):                             # static unroll (tiny N)
        c0 = b * SEQ_LEN
        qkT_b = qkT[:, c0:c0 + SEQ_LEN]                # [2E, L]  (per-batch lane slice)
        vT_b = vT[:, c0:c0 + SEQ_LEN]                  # [E, L]
        # hoist the key-padding bias broadcast out of the head loop (no CSE in JAX)
        bias_mat = jnp.broadcast_to(bias_all[b:b + 1, :], (SEQ_LEN, SEQ_LEN))  # [L, L]

        head_rows = []
        for h in range(NHEAD):                         # static unroll; sublane head slices
            r = h * DH
            qhT = qkT_b[r:r + DH, :].astype(jnp.bfloat16)                      # [Dh, L]
            khT = qkT_b[D_MODEL + r:D_MODEL + r + DH, :].astype(jnp.bfloat16)  # [Dh, L]
            vhT = vT_b[r:r + DH, :].astype(jnp.bfloat16)                       # [Dh, L]

            # scores = q @ k^T  (softmax scale pre-folded into Wq/bq at pack time)
            s = lax.dot_general(qhT, khT, _TN,
                                preferred_element_type=jnp.float32)            # [L, L]
            s = s + bias_mat
            m = jnp.max(s, axis=-1, keepdims=True)
            p = jnp.exp(s - m)
            p = p * pl.reciprocal(jnp.sum(p, axis=-1, keepdims=True), approx=True)

            # o_h^T[d, i] = sum_j v^T[d, j] * p[i, j]
            head_rows.append(
                lax.dot_general(vhT, p.astype(jnp.bfloat16), _NT,
                                preferred_element_type=jnp.float32))           # [Dh, L]

        oT_b = jnp.concatenate(head_rows, axis=0).astype(jnp.bfloat16)         # [E, L]
        # output projection with full K = E contraction (not 4 folded K = Dh dots)
        attn_rows.append(
            lax.dot_general(oT_b, wo_ref[0], _TN,
                            preferred_element_type=jnp.float32))               # [L, E]

    attn = jnp.concatenate(attn_rows, axis=0) + bo_ref[0]                      # [NL, E]

    # ---- residual + LayerNorm1 (dropout1 == identity in eval mode) ----
    x1 = _ln(x + attn, ln1_g_ref[0], ln1_b_ref[0])

    # ---- FFN: linear2(relu(linear1(x))), residual + LayerNorm2 ----
    hdn = jnp.dot(x1.astype(jnp.bfloat16), w1_ref[0],
                  preferred_element_type=jnp.float32) + b1_ref[0]              # [NL, F]
    hdn = jnp.maximum(hdn, 0.0)
    y = jnp.dot(hdn.astype(jnp.bfloat16), w2_ref[0],
                preferred_element_type=jnp.float32) + b2_ref[0]                # [NL, E]
    x2 = _ln(x1 + y, ln2_g_ref[0], ln2_b_ref[0])

    x_ref[...] = x2                                   # carry to the next layer

    @pl.when(layer == NUM_LAYERS - 1)
    def _():
        out_ref[...] = x2                             # write HBM only once, at the end


# ================================= kernel wrapper =================================

def transformer_encoder_forward(stacked, src, pos, key_padding_mask):
    """Full fused encoder stack.

    src / pos:         [L, N, E] (torch seq-first MultiheadAttention layout)
    key_padding_mask:  [N, L] bool, True = padded position (ignored as key)
    stacked:           tuple of layer-stacked kernel-layout weights (leading NUM_LAYERS axis)
    """
    L, N, E = src.shape
    NL = N * L
    x = jnp.transpose(src, (1, 0, 2)).reshape(NL, E)        # rows ordered as b*L + l
    pos_b = jnp.transpose(pos, (1, 0, 2)).reshape(NL, E)
    bias = jnp.where(key_padding_mask, NEG_INF, 0.0).astype(jnp.float32)       # [N, L]

    def act(shape):       # resident blocks (constant index map): DMA'd once, stay in VMEM
        return pl.BlockSpec(shape, lambda l: (0,) * len(shape))

    def per_layer(arr):   # per-layer weight slab, streamed (double-buffered) over layers
        return pl.BlockSpec((1,) + arr.shape[1:], lambda l: (l, 0, 0))

    in_specs = [act((NL, E)), act((NL, E)), act((N, L))] + [per_layer(w) for w in stacked]

    out = pl.pallas_call(
        _encoder_stack_kernel,
        out_shape=jax.ShapeDtypeStruct((NL, E), jnp.float32),
        grid=(NUM_LAYERS,),
        in_specs=in_specs,
        out_specs=pl.BlockSpec((NL, E), lambda l: (0, 0)),
        scratch_shapes=[pltpu.VMEM((NL, E), jnp.float32)],   # activation carry
        compiler_params=pltpu.CompilerParams(dimension_semantics=("arbitrary",)),
    )(x, pos_b, bias, *stacked)
    return jnp.transpose(out.reshape(N, L, E), (1, 0, 2))    # back to [L, N, E]


# ================================= parameter init =================================

def _xavier_bf16(key, shape):
    fan_in, fan_out = shape
    limit = math.sqrt(6.0 / (fan_in + fan_out))
    w = jax.random.uniform(key, shape, jnp.float32, -limit, limit)
    # pre-round to bf16 so the fused kernel (bf16 MXU operands) and the f32 reference
    # see numerically (near-)identical weight values
    return w.astype(jnp.bfloat16).astype(jnp.float32)


def init_layer_params(key):
    E, F = D_MODEL, DIM_FFN
    kw = jax.random.split(key, 12)
    u = lambda k, s: jax.random.uniform(k, s, jnp.float32, -0.1, 0.1)
    return {
        "wq": _xavier_bf16(kw[0], (E, E)), "bq": u(kw[1], (E,)),
        "wk": _xavier_bf16(kw[2], (E, E)), "bk": u(kw[3], (E,)),
        "wv": _xavier_bf16(kw[4], (E, E)), "bv": u(kw[5], (E,)),
        "wo": _xavier_bf16(kw[6], (E, E)), "bo": u(kw[7], (E,)),
        "w1": _xavier_bf16(kw[8], (E, F)), "b1": u(kw[9], (F,)),
        "w2": _xavier_bf16(kw[10], (F, E)), "b2": u(kw[11], (E,)),
        "ln1_g": jnp.ones((E,), jnp.float32), "ln1_b": jnp.zeros((E,), jnp.float32),
        "ln2_g": jnp.ones((E,), jnp.float32), "ln2_b": jnp.zeros((E,), jnp.float32),
    }


def pack_layer_params(p):
    """Torch-layout f32 params -> fused-kernel layout for ONE layer.

    Q/K/V weights are pre-transposed (projection outputs come out as [feat, N*L] so head
    slices are sublane-aligned); the softmax scale is folded into Wq/bq; matmul weights
    are bf16; biases are 2-D.
    """
    E, F = D_MODEL, DIM_FFN
    scale = DH ** -0.5
    return (
        jnp.concatenate([(p["wq"] * scale).T, p["wk"].T], axis=0).astype(jnp.bfloat16),  # [2E, E]
        jnp.concatenate([p["bq"] * scale, p["bk"]]).reshape(2 * E, 1),                   # [2E, 1]
        p["wv"].T.astype(jnp.bfloat16),                                                  # [E, E]
        p["bv"].reshape(E, 1),                                                           # [E, 1]
        p["wo"].astype(jnp.bfloat16),                                                    # [E, E]
        p["bo"].reshape(1, E),
        p["w1"].astype(jnp.bfloat16),                                                    # [E, F]
        p["b1"].reshape(1, F),
        p["w2"].astype(jnp.bfloat16),                                                    # [F, E]
        p["b2"].reshape(1, E),
        p["ln1_g"].reshape(1, E), p["ln1_b"].reshape(1, E),
        p["ln2_g"].reshape(1, E), p["ln2_b"].reshape(1, E),
    )


def stack_layer_params(params_layers):
    """Stack per-layer packed params along a leading layer axis for the fused stack kernel."""
    packed = [pack_layer_params(p) for p in params_layers]
    return tuple(jnp.stack([pk[i] for pk in packed], axis=0) for i in range(len(packed[0])))


# ============================== pure-JAX f32 reference =============================

def _reference_layer(x, pos, key_padding_mask, p):
    N, L, E = x.shape
    qk_in = x + pos
    q = qk_in @ p["wq"] + p["bq"]
    k = qk_in @ p["wk"] + p["bk"]
    v = x @ p["wv"] + p["bv"]

    def heads(t):
        return t.reshape(N, L, NHEAD, DH).transpose(0, 2, 1, 3)   # [N, H, L, Dh]

    q, k, v = heads(q) * (DH ** -0.5), heads(k), heads(v)
    s = jnp.einsum("nhqd,nhkd->nhqk", q, k)
    s = s + jnp.where(key_padding_mask, NEG_INF, 0.0)[:, None, None, :]
    a = jax.nn.softmax(s, axis=-1)
    o = jnp.einsum("nhqk,nhkd->nhqd", a, v).transpose(0, 2, 1, 3).reshape(N, L, E)
    o = o @ p["wo"] + p["bo"]
    x = _ln(x + o, p["ln1_g"], p["ln1_b"])
    y = jax.nn.relu(x @ p["w1"] + p["b1"]) @ p["w2"] + p["b2"]
    return _ln(x + y, p["ln2_g"], p["ln2_b"])


def reference_forward(params_layers, src, pos, key_padding_mask):
    x = jnp.transpose(src, (1, 0, 2))
    pos_b = jnp.transpose(pos, (1, 0, 2))
    for p in params_layers:
        x = _reference_layer(x, pos_b, key_padding_mask, p)
    return jnp.transpose(x, (1, 0, 2))


# ====================================== main ======================================

if __name__ == "__main__":
    key = jax.random.PRNGKey(0)
    k_src, k_pos, k_par = jax.random.split(key, 3)

    src = jax.random.normal(k_src, (SEQ_LEN, BATCH, D_MODEL), jnp.float32)   # [L, N, E]
    pos = jax.random.normal(k_pos, (SEQ_LEN, BATCH, D_MODEL), jnp.float32)   # [L, N, E]
    # key-padding mask: last 16 positions (last 2 columns of an 8x8 map) are padded
    mask = jnp.zeros((BATCH, SEQ_LEN), dtype=bool).at[:, -16:].set(True)

    params = [init_layer_params(k) for k in jax.random.split(k_par, NUM_LAYERS)]
    stacked = stack_layer_params(params)

    fwd = jax.jit(transformer_encoder_forward)
    out = fwd(stacked, src, pos, mask)
    jax.block_until_ready(out)

    ref = reference_forward(params, src, pos, mask)
    assert out.shape == (SEQ_LEN, BATCH, D_MODEL), out.shape
    assert bool(jnp.all(jnp.isfinite(out)))
    max_err = float(jnp.max(jnp.abs(out - ref)))
    # bf16 MXU operands + approx reciprocal vs f32 reference: expected error O(1e-2)
    assert max_err < 1e-1, f"max abs err vs f32 reference: {max_err}"
    print("KERNEL_OK")
</pallas_src>

<mosaic_0001>
module attributes {stable_mosaic.version = 11 : i64} {
  func.func @_encoder_stack_kernel(%arg0: i32, %arg1: memref<128x32xf32, #tpu.memory_space<vmem>>, %arg2: memref<128x32xf32, #tpu.memory_space<vmem>>, %arg3: memref<2x64xf32, #tpu.memory_space<vmem>>, %arg4: memref<1x64x32xbf16, #tpu.memory_space<vmem>>, %arg5: memref<1x64x1xf32, #tpu.memory_space<vmem>>, %arg6: memref<1x32x32xbf16, #tpu.memory_space<vmem>>, %arg7: memref<1x32x1xf32, #tpu.memory_space<vmem>>, %arg8: memref<1x32x32xbf16, #tpu.memory_space<vmem>>, %arg9: memref<1x1x32xf32, #tpu.memory_space<vmem>>, %arg10: memref<1x32x64xbf16, #tpu.memory_space<vmem>>, %arg11: memref<1x1x64xf32, #tpu.memory_space<vmem>>, %arg12: memref<1x64x32xbf16, #tpu.memory_space<vmem>>, %arg13: memref<1x1x32xf32, #tpu.memory_space<vmem>>, %arg14: memref<1x1x32xf32, #tpu.memory_space<vmem>>, %arg15: memref<1x1x32xf32, #tpu.memory_space<vmem>>, %arg16: memref<1x1x32xf32, #tpu.memory_space<vmem>>, %arg17: memref<1x1x32xf32, #tpu.memory_space<vmem>>, %arg18: memref<128x32xf32, #tpu.memory_space<vmem>>, %arg19: memref<128x32xf32, #tpu.memory_space<vmem>>) attributes {dimension_semantics = [#tpu.dimension_semantics<arbitrary>], iteration_bounds = array<i64: 2>, scalar_prefetch = 0 : i64, scratch_operands = 1 : i64, tpu.core_type = #tpu.core_type<tc>, window_params = [{pipeline_mode = #tpu.pipeline_mode<synchronous>, transform_indices = @transform_0, window_bounds = array<i64: 128, 32>}, {pipeline_mode = #tpu.pipeline_mode<synchronous>, transform_indices = @transform_1, window_bounds = array<i64: 128, 32>}, {pipeline_mode = #tpu.pipeline_mode<synchronous>, transform_indices = @transform_2, window_bounds = array<i64: 2, 64>}, {transform_indices = @transform_3, window_bounds = array<i64: 1, 64, 32>}, {transform_indices = @transform_4, window_bounds = array<i64: 1, 64, 1>}, {transform_indices = @transform_5, window_bounds = array<i64: 1, 32, 32>}, {transform_indices = @transform_6, window_bounds = array<i64: 1, 32, 1>}, {transform_indices = @transform_7, window_bounds = array<i64: 1, 32, 32>}, {transform_indices = @transform_8, window_bounds = array<i64: 1, 1, 32>}, {transform_indices = @transform_9, window_bounds = array<i64: 1, 32, 64>}, {transform_indices = @transform_10, window_bounds = array<i64: 1, 1, 64>}, {transform_indices = @transform_11, window_bounds = array<i64: 1, 64, 32>}, {transform_indices = @transform_12, window_bounds = array<i64: 1, 1, 32>}, {transform_indices = @transform_13, window_bounds = array<i64: 1, 1, 32>}, {transform_indices = @transform_14, window_bounds = array<i64: 1, 1, 32>}, {transform_indices = @transform_15, window_bounds = array<i64: 1, 1, 32>}, {transform_indices = @transform_16, window_bounds = array<i64: 1, 1, 32>}, {pipeline_mode = #tpu.pipeline_mode<synchronous>, transform_indices = @transform_17, window_bounds = array<i64: 128, 32>}]} {
    %c0_i32 = arith.constant 0 : i32
    %0 = arith.cmpi eq, %arg0, %c0_i32 : i32
    %1 = arith.extui %0 : i1 to i32
    %c0_i32_0 = arith.constant 0 : i32
    %2 = arith.cmpi ne, %1, %c0_i32_0 : i32
    scf.if %2 {
      %c0_102 = arith.constant 0 : index
      %c0_103 = arith.constant 0 : index
      %284 = vector.load %arg1[%c0_102, %c0_103] : memref<128x32xf32, #tpu.memory_space<vmem>>, vector<128x32xf32>
      %c0_104 = arith.constant 0 : index
      %c0_105 = arith.constant 0 : index
      %285 = vector.load %arg19[%c0_104, %c0_105] : memref<128x32xf32, #tpu.memory_space<vmem>>, vector<128x32xf32>
      tpu.vector_store %arg19[%c0_104, %c0_105], %284 {strides = array<i32>} : memref<128x32xf32, #tpu.memory_space<vmem>>, vector<128x32xf32>,
    } else {
    }
    %c0 = arith.constant 0 : index
    %c0_1 = arith.constant 0 : index
    %3 = vector.load %arg19[%c0, %c0_1] : memref<128x32xf32, #tpu.memory_space<vmem>>, vector<128x32xf32>
    %c0_2 = arith.constant 0 : index
    %c0_3 = arith.constant 0 : index
    %4 = vector.load %arg2[%c0_2, %c0_3] : memref<128x32xf32, #tpu.memory_space<vmem>>, vector<128x32xf32>
    %5 = arith.addf %3, %4 : vector<128x32xf32>
    %6 = arith.truncf %5 : vector<128x32xf32> to vector<128x32xbf16>
    %c0_4 = arith.constant 0 : index
    %c0_5 = arith.constant 0 : index
    %c0_6 = arith.constant 0 : index
    %7 = vector.load %arg4[%c0_4, %c0_5, %c0_6] : memref<1x64x32xbf16, #tpu.memory_space<vmem>>, vector<1x64x32xbf16>
    %8 = vector.shape_cast %7 : vector<1x64x32xbf16> to vector<64x32xbf16>
    %cst = arith.constant dense<0.000000e+00> : vector<64x128xf32>
    %9 = tpu.matmul %8, %6, %cst {dimension_numbers = #tpu.dot_dimension_numbers<[1], [1], [0], [0], [0, 0, 1, 0], [], []>} : vector<64x32xbf16>, vector<128x32xbf16>, vector<64x128xf32> -> vector<64x128xf32>
    %c0_7 = arith.constant 0 : index
    %c0_8 = arith.constant 0 : index
    %c0_9 = arith.constant 0 : index
    %10 = vector.load %arg5[%c0_7, %c0_8, %c0_9] : memref<1x64x1xf32, #tpu.memory_space<vmem>>, vector<1x64x1xf32>
    %11 = vector.shape_cast %10 : vector<1x64x1xf32> to vector<64x1xf32>
    %12 = vector.broadcast %11 : vector<64x1xf32> to vector<64x128xf32>
    %13 = arith.addf %9, %12 : vector<64x128xf32>
    %c0_10 = arith.constant 0 : index
    %c0_11 = arith.constant 0 : index
    %c0_12 = arith.constant 0 : index
    %14 = vector.load %arg6[%c0_10, %c0_11, %c0_12] : memref<1x32x32xbf16, #tpu.memory_space<vmem>>, vector<1x32x32xbf16>
    %15 = vector.shape_cast %14 : vector<1x32x32xbf16> to vector<32x32xbf16>
    %16 = arith.truncf %3 : vector<128x32xf32> to vector<128x32xbf16>
    %cst_13 = arith.constant dense<0.000000e+00> : vector<32x128xf32>
    %17 = tpu.matmul %15, %16, %cst_13 {dimension_numbers = #tpu.dot_dimension_numbers<[1], [1], [0], [0], [0, 0, 1, 0], [], []>} : vector<32x32xbf16>, vector<128x32xbf16>, vector<32x128xf32> -> vector<32x128xf32>
    %c0_14 = arith.constant 0 : index
    %c0_15 = arith.constant 0 : index
    %c0_16 = arith.constant 0 : index
    %18 = vector.load %arg7[%c0_14, %c0_15, %c0_16] : memref<1x32x1xf32, #tpu.memory_space<vmem>>, vector<1x32x1xf32>
    %19 = vector.shape_cast %18 : vector<1x32x1xf32> to vector<32x1xf32>
    %20 = vector.broadcast %19 : vector<32x1xf32> to vector<32x128xf32>
    %21 = arith.addf %17, %20 : vector<32x128xf32>
    %c0_17 = arith.constant 0 : index
    %c0_18 = arith.constant 0 : index
    %22 = vector.load %arg3[%c0_17, %c0_18] : memref<2x64xf32, #tpu.memory_space<vmem>>, vector<2x64xf32>
    %23 = vector.extract_strided_slice %13 {offsets = [0, 0], sizes = [64, 64], strides = [1, 1]} : vector<64x128xf32> to vector<64x64xf32>
    %24 = vector.extract_strided_slice %21 {offsets = [0, 0], sizes = [32, 64], strides = [1, 1]} : vector<32x128xf32> to vector<32x64xf32>
    %25 = vector.extract_strided_slice %22 {offsets = [0, 0], sizes = [1, 64], strides = [1, 1]} : vector<2x64xf32> to vector<1x64xf32>
    %26 = vector.shape_cast %25 : vector<1x64xf32> to vector<1x64xf32>
    %27 = vector.broadcast %26 : vector<1x64xf32> to vector<64x64xf32>
    %28 = vector.extract_strided_slice %23 {offsets = [0, 0], sizes = [8, 64], strides = [1, 1]} : vector<64x64xf32> to vector<8x64xf32>
    %29 = arith.truncf %28 : vector<8x64xf32> to vector<8x64xbf16>
    %30 = vector.extract_strided_slice %23 {offsets = [32, 0], sizes = [8, 64], strides = [1, 1]} : vector<64x64xf32> to vector<8x64xf32>
    %31 = arith.truncf %30 : vector<8x64xf32> to vector<8x64xbf16>
    %32 = vector.extract_strided_slice %24 {offsets = [0, 0], sizes = [8, 64], strides = [1, 1]} : vector<32x64xf32> to vector<8x64xf32>
    %33 = arith.truncf %32 : vector<8x64xf32> to vector<8x64xbf16>
    %cst_19 = arith.constant dense<0.000000e+00> : vector<64x64xf32>
    %34 = tpu.matmul %29, %31, %cst_19 {dimension_numbers = #tpu.dot_dimension_numbers<[0], [0], [1], [1], [0, 1, 1, 1], [], []>} : vector<8x64xbf16>, vector<8x64xbf16>, vector<64x64xf32> -> vector<64x64xf32>
    %35 = arith.addf %34, %27 : vector<64x64xf32>
    %cst_20 = arith.constant dense<0xFF800000> : vector<64xf32>
    %36 = vector.multi_reduction <maximumf>, %35, %cst_20 [1] : vector<64x64xf32> to vector<64xf32>
    %37 = vector.shape_cast %36 : vector<64xf32> to vector<64x1xf32>
    %38 = vector.broadcast %37 : vector<64x1xf32> to vector<64x64xf32>
    %39 = arith.subf %35, %38 : vector<64x64xf32>
    %40 = math.exp %39 : vector<64x64xf32>
    %cst_21 = arith.constant dense<0.000000e+00> : vector<64xf32>
    %41 = vector.multi_reduction <add>, %40, %cst_21 [1] : vector<64x64xf32> to vector<64xf32>
    %42 = vector.shape_cast %41 : vector<64xf32> to vector<64x1xf32>
    %43 = tpu.reciprocal %42 {approx = true} : vector<64x1xf32> -> vector<64x1xf32>
    %44 = vector.broadcast %43 : vector<64x1xf32> to vector<64x64xf32>
    %45 = arith.mulf %40, %44 : vector<64x64xf32>
    %46 = arith.truncf %45 : vector<64x64xf32> to vector<64x64xbf16>
    %cst_22 = arith.constant dense<0.000000e+00> : vector<8x64xf32>
    %47 = tpu.matmul %33, %46, %cst_22 {dimension_numbers = #tpu.dot_dimension_numbers<[1], [1], [0], [0], [0, 0, 1, 0], [], []>} : vector<8x64xbf16>, vector<64x64xbf16>, vector<8x64xf32> -> vector<8x64xf32>
    %48 = vector.extract_strided_slice %23 {offsets = [8, 0], sizes = [8, 64], strides = [1, 1]} : vector<64x64xf32> to vector<8x64xf32>
    %49 = arith.truncf %48 : vector<8x64xf32> to vector<8x64xbf16>
    %50 = vector.extract_strided_slice %23 {offsets = [40, 0], sizes = [8, 64], strides = [1, 1]} : vector<64x64xf32> to vector<8x64xf32>
    %51 = arith.truncf %50 : vector<8x64xf32> to vector<8x64xbf16>
    %52 = vector.extract_strided_slice %24 {offsets = [8, 0], sizes = [8, 64], strides = [1, 1]} : vector<32x64xf32> to vector<8x64xf32>
    %53 = arith.truncf %52 : vector<8x64xf32> to vector<8x64xbf16>
    %cst_23 = arith.constant dense<0.000000e+00> : vector<64x64xf32>
    %54 = tpu.matmul %49, %51, %cst_23 {dimension_numbers = #tpu.dot_dimension_numbers<[0], [0], [1], [1], [0, 1, 1, 1], [], []>} : vector<8x64xbf16>, vector<8x64xbf16>, vector<64x64xf32> -> vector<64x64xf32>
    %55 = arith.addf %54, %27 : vector<64x64xf32>
    %cst_24 = arith.constant dense<0xFF800000> : vector<64xf32>
    %56 = vector.multi_reduction <maximumf>, %55, %cst_24 [1] : vector<64x64xf32> to vector<64xf32>
    %57 = vector.shape_cast %56 : vector<64xf32> to vector<64x1xf32>
    %58 = vector.broadcast %57 : vector<64x1xf32> to vector<64x64xf32>
    %59 = arith.subf %55, %58 : vector<64x64xf32>
    %60 = math.exp %59 : vector<64x64xf32>
    %cst_25 = arith.constant dense<0.000000e+00> : vector<64xf32>
    %61 = vector.multi_reduction <add>, %60, %cst_25 [1] : vector<64x64xf32> to vector<64xf32>
    %62 = vector.shape_cast %61 : vector<64xf32> to vector<64x1xf32>
    %63 = tpu.reciprocal %62 {approx = true} : vector<64x1xf32> -> vector<64x1xf32>
    %64 = vector.broadcast %63 : vector<64x1xf32> to vector<64x64xf32>
    %65 = arith.mulf %60, %64 : vector<64x64xf32>
    %66 = arith.truncf %65 : vector<64x64xf32> to vector<64x64xbf16>
    %cst_26 = arith.constant dense<0.000000e+00> : vector<8x64xf32>
    %67 = tpu.matmul %53, %66, %cst_26 {dimension_numbers = #tpu.dot_dimension_numbers<[1], [1], [0], [0], [0, 0, 1, 0], [], []>} : vector<8x64xbf16>, vector<64x64xbf16>, vector<8x64xf32> -> vector<8x64xf32>
    %68 = vector.extract_strided_slice %23 {offsets = [16, 0], sizes = [8, 64], strides = [1, 1]} : vector<64x64xf32> to vector<8x64xf32>
    %69 = arith.truncf %68 : vector<8x64xf32> to vector<8x64xbf16>
    %70 = vector.extract_strided_slice %23 {offsets = [48, 0], sizes = [8, 64], strides = [1, 1]} : vector<64x64xf32> to vector<8x64xf32>
    %71 = arith.truncf %70 : vector<8x64xf32> to vector<8x64xbf16>
    %72 = vector.extract_strided_slice %24 {offsets = [16, 0], sizes = [8, 64], strides = [1, 1]} : vector<32x64xf32> to vector<8x64xf32>
    %73 = arith.truncf %72 : vector<8x64xf32> to vector<8x64xbf16>
    %cst_27 = arith.constant dense<0.000000e+00> : vector<64x64xf32>
    %74 = tpu.matmul %69, %71, %cst_27 {dimension_numbers = #tpu.dot_dimension_numbers<[0], [0], [1], [1], [0, 1, 1, 1], [], []>} : vector<8x64xbf16>, vector<8x64xbf16>, vector<64x64xf32> -> vector<64x64xf32>
    %75 = arith.addf %74, %27 : vector<64x64xf32>
    %cst_28 = arith.constant dense<0xFF800000> : vector<64xf32>
    %76 = vector.multi_reduction <maximumf>, %75, %cst_28 [1] : vector<64x64xf32> to vector<64xf32>
    %77 = vector.shape_cast %76 : vector<64xf32> to vector<64x1xf32>
    %78 = vector.broadcast %77 : vector<64x1xf32> to vector<64x64xf32>
    %79 = arith.subf %75, %78 : vector<64x64xf32>
    %80 = math.exp %79 : vector<64x64xf32>
    %cst_29 = arith.constant dense<0.000000e+00> : vector<64xf32>
    %81 = vector.multi_reduction <add>, %80, %cst_29 [1] : vector<64x64xf32> to vector<64xf32>
    %82 = vector.shape_cast %81 : vector<64xf32> to vector<64x1xf32>
    %83 = tpu.reciprocal %82 {approx = true} : vector<64x1xf32> -> vector<64x1xf32>
    %84 = vector.broadcast %83 : vector<64x1xf32> to vector<64x64xf32>
    %85 = arith.mulf %80, %84 : vector<64x64xf32>
    %86 = arith.truncf %85 : vector<64x64xf32> to vector<64x64xbf16>
    %cst_30 = arith.constant dense<0.000000e+00> : vector<8x64xf32>
    %87 = tpu.matmul %73, %86, %cst_30 {dimension_numbers = #tpu.dot_dimension_numbers<[1], [1], [0], [0], [0, 0, 1, 0], [], []>} : vector<8x64xbf16>, vector<64x64xbf16>, vector<8x64xf32> -> vector<8x64xf32>
    %88 = vector.extract_strided_slice %23 {offsets = [24, 0], sizes = [8, 64], strides = [1, 1]} : vector<64x64xf32> to vector<8x64xf32>
    %89 = arith.truncf %88 : vector<8x64xf32> to vector<8x64xbf16>
    %90 = vector.extract_strided_slice %23 {offsets = [56, 0], sizes = [8, 64], strides = [1, 1]} : vector<64x64xf32> to vector<8x64xf32>
    %91 = arith.truncf %90 : vector<8x64xf32> to vector<8x64xbf16>
    %92 = vector.extract_strided_slice %24 {offsets = [24, 0], sizes = [8, 64], strides = [1, 1]} : vector<32x64xf32> to vector<8x64xf32>
    %93 = arith.truncf %92 : vector<8x64xf32> to vector<8x64xbf16>
    %cst_31 = arith.constant dense<0.000000e+00> : vector<64x64xf32>
    %94 = tpu.matmul %89, %91, %cst_31 {dimension_numbers = #tpu.dot_dimension_numbers<[0], [0], [1], [1], [0, 1, 1, 1], [], []>} : vector<8x64xbf16>, vector<8x64xbf16>, vector<64x64xf32> -> vector<64x64xf32>
    %95 = arith.addf %94, %27 : vector<64x64xf32>
    %cst_32 = arith.constant dense<0xFF800000> : vector<64xf32>
    %96 = vector.multi_reduction <maximumf>, %95, %cst_32 [1] : vector<64x64xf32> to vector<64xf32>
    %97 = vector.shape_cast %96 : vector<64xf32> to vector<64x1xf32>
    %98 = vector.broadcast %97 : vector<64x1xf32> to vector<64x64xf32>
    %99 = arith.subf %95, %98 : vector<64x64xf32>
    %100 = math.exp %99 : vector<64x64xf32>
    %cst_33 = arith.constant dense<0.000000e+00> : vector<64xf32>
    %101 = vector.multi_reduction <add>, %100, %cst_33 [1] : vector<64x64xf32> to vector<64xf32>
    %102 = vector.shape_cast %101 : vector<64xf32> to vector<64x1xf32>
    %103 = tpu.reciprocal %102 {approx = true} : vector<64x1xf32> -> vector<64x1xf32>
    %104 = vector.broadcast %103 : vector<64x1xf32> to vector<64x64xf32>
    %105 = arith.mulf %100, %104 : vector<64x64xf32>
    %106 = arith.truncf %105 : vector<64x64xf32> to vector<64x64xbf16>
    %cst_34 = arith.constant dense<0.000000e+00> : vector<8x64xf32>
    %107 = tpu.matmul %93, %106, %cst_34 {dimension_numbers = #tpu.dot_dimension_numbers<[1], [1], [0], [0], [0, 0, 1, 0], [], []>} : vector<8x64xbf16>, vector<64x64xbf16>, vector<8x64xf32> -> vector<8x64xf32>
    %108 = tpu.concatenate %47, %67, %87, %107 in 0 : vector<8x64xf32>, vector<8x64xf32>, vector<8x64xf32>, vector<8x64xf32> -> vector<32x64xf32>
    %109 = arith.truncf %108 : vector<32x64xf32> to vector<32x64xbf16>
    %c0_35 = arith.constant 0 : index
    %c0_36 = arith.constant 0 : index
    %c0_37 = arith.constant 0 : index
    %110 = vector.load %arg8[%c0_35, %c0_36, %c0_37] : memref<1x32x32xbf16, #tpu.memory_space<vmem>>, vector<1x32x32xbf16>
    %111 = vector.shape_cast %110 : vector<1x32x32xbf16> to vector<32x32xbf16>
    %cst_38 = arith.constant dense<0.000000e+00> : vector<64x32xf32>
    %112 = tpu.matmul %109, %111, %cst_38 {dimension_numbers = #tpu.dot_dimension_numbers<[0], [0], [1], [1], [0, 1, 1, 1], [], []>} : vector<32x64xbf16>, vector<32x32xbf16>, vector<64x32xf32> -> vector<64x32xf32>
    %113 = vector.extract_strided_slice %13 {offsets = [0, 64], sizes = [64, 64], strides = [1, 1]} : vector<64x128xf32> to vector<64x64xf32>
    %114 = vector.extract_strided_slice %21 {offsets = [0, 64], sizes = [32, 64], strides = [1, 1]} : vector<32x128xf32> to vector<32x64xf32>
    %115 = vector.extract_strided_slice %22 {offsets = [1, 0], sizes = [1, 64], strides = [1, 1]} : vector<2x64xf32> to vector<1x64xf32>
    %116 = vector.shape_cast %115 : vector<1x64xf32> to vector<1x64xf32>
    %117 = vector.broadcast %116 : vector<1x64xf32> to vector<64x64xf32>
    %118 = vector.extract_strided_slice %113 {offsets = [0, 0], sizes = [8, 64], strides = [1, 1]} : vector<64x64xf32> to vector<8x64xf32>
    %119 = arith.truncf %118 : vector<8x64xf32> to vector<8x64xbf16>
    %120 = vector.extract_strided_slice %113 {offsets = [32, 0], sizes = [8, 64], strides = [1, 1]} : vector<64x64xf32> to vector<8x64xf32>
    %121 = arith.truncf %120 : vector<8x64xf32> to vector<8x64xbf16>
    %122 = vector.extract_strided_slice %114 {offsets = [0, 0], sizes = [8, 64], strides = [1, 1]} : vector<32x64xf32> to vector<8x64xf32>
    %123 = arith.truncf %122 : vector<8x64xf32> to vector<8x64xbf16>
    %cst_39 = arith.constant dense<0.000000e+00> : vector<64x64xf32>
    %124 = tpu.matmul %119, %121, %cst_39 {dimension_numbers = #tpu.dot_dimension_numbers<[0], [0], [1], [1], [0, 1, 1, 1], [], []>} : vector<8x64xbf16>, vector<8x64xbf16>, vector<64x64xf32> -> vector<64x64xf32>
    %125 = arith.addf %124, %117 : vector<64x64xf32>
    %cst_40 = arith.constant dense<0xFF800000> : vector<64xf32>
    %126 = vector.multi_reduction <maximumf>, %125, %cst_40 [1] : vector<64x64xf32> to vector<64xf32>
    %127 = vector.shape_cast %126 : vector<64xf32> to vector<64x1xf32>
    %128 = vector.broadcast %127 : vector<64x1xf32> to vector<64x64xf32>
    %129 = arith.subf %125, %128 : vector<64x64xf32>
    %130 = math.exp %129 : vector<64x64xf32>
    %cst_41 = arith.constant dense<0.000000e+00> : vector<64xf32>
    %131 = vector.multi_reduction <add>, %130, %cst_41 [1] : vector<64x64xf32> to vector<64xf32>
    %132 = vector.shape_cast %131 : vector<64xf32> to vector<64x1xf32>
    %133 = tpu.reciprocal %132 {approx = true} : vector<64x1xf32> -> vector<64x1xf32>
    %134 = vector.broadcast %133 : vector<64x1xf32> to vector<64x64xf32>
    %135 = arith.mulf %130, %134 : vector<64x64xf32>
    %136 = arith.truncf %135 : vector<64x64xf32> to vector<64x64xbf16>
    %cst_42 = arith.constant dense<0.000000e+00> : vector<8x64xf32>
    %137 = tpu.matmul %123, %136, %cst_42 {dimension_numbers = #tpu.dot_dimension_numbers<[1], [1], [0], [0], [0, 0, 1, 0], [], []>} : vector<8x64xbf16>, vector<64x64xbf16>, vector<8x64xf32> -> vector<8x64xf32>
    %138 = vector.extract_strided_slice %113 {offsets = [8, 0], sizes = [8, 64], strides = [1, 1]} : vector<64x64xf32> to vector<8x64xf32>
    %139 = arith.truncf %138 : vector<8x64xf32> to vector<8x64xbf16>
    %140 = vector.extract_strided_slice %113 {offsets = [40, 0], sizes = [8, 64], strides = [1, 1]} : vector<64x64xf32> to vector<8x64xf32>
    %141 = arith.truncf %140 : vector<8x64xf32> to vector<8x64xbf16>
    %142 = vector.extract_strided_slice %114 {offsets = [8, 0], sizes = [8, 64], strides = [1, 1]} : vector<32x64xf32> to vector<8x64xf32>
    %143 = arith.truncf %142 : vector<8x64xf32> to vector<8x64xbf16>
    %cst_43 = arith.constant dense<0.000000e+00> : vector<64x64xf32>
    %144 = tpu.matmul %139, %141, %cst_43 {dimension_numbers = #tpu.dot_dimension_numbers<[0], [0], [1], [1], [0, 1, 1, 1], [], []>} : vector<8x64xbf16>, vector<8x64xbf16>, vector<64x64xf32> -> vector<64x64xf32>
    %145 = arith.addf %144, %117 : vector<64x64xf32>
    %cst_44 = arith.constant dense<0xFF800000> : vector<64xf32>
    %146 = vector.multi_reduction <maximumf>, %145, %cst_44 [1] : vector<64x64xf32> to vector<64xf32>
    %147 = vector.shape_cast %146 : vector<64xf32> to vector<64x1xf32>
    %148 = vector.broadcast %147 : vector<64x1xf32> to vector<64x64xf32>
    %149 = arith.subf %145, %148 : vector<64x64xf32>
    %150 = math.exp %149 : vector<64x64xf32>
    %cst_45 = arith.constant dense<0.000000e+00> : vector<64xf32>
    %151 = vector.multi_reduction <add>, %150, %cst_45 [1] : vector<64x64xf32> to vector<64xf32>
    %152 = vector.shape_cast %151 : vector<64xf32> to vector<64x1xf32>
    %153 = tpu.reciprocal %152 {approx = true} : vector<64x1xf32> -> vector<64x1xf32>
    %154 = vector.broadcast %153 : vector<64x1xf32> to vector<64x64xf32>
    %155 = arith.mulf %150, %154 : vector<64x64xf32>
    %156 = arith.truncf %155 : vector<64x64xf32> to vector<64x64xbf16>
    %cst_46 = arith.constant dense<0.000000e+00> : vector<8x64xf32>
    %157 = tpu.matmul %143, %156, %cst_46 {dimension_numbers = #tpu.dot_dimension_numbers<[1], [1], [0], [0], [0, 0, 1, 0], [], []>} : vector<8x64xbf16>, vector<64x64xbf16>, vector<8x64xf32> -> vector<8x64xf32>
    %158 = vector.extract_strided_slice %113 {offsets = [16, 0], sizes = [8, 64], strides = [1, 1]} : vector<64x64xf32> to vector<8x64xf32>
    %159 = arith.truncf %158 : vector<8x64xf32> to vector<8x64xbf16>
    %160 = vector.extract_strided_slice %113 {offsets = [48, 0], sizes = [8, 64], strides = [1, 1]} : vector<64x64xf32> to vector<8x64xf32>
    %161 = arith.truncf %160 : vector<8x64xf32> to vector<8x64xbf16>
    %162 = vector.extract_strided_slice %114 {offsets = [16, 0], sizes = [8, 64], strides = [1, 1]} : vector<32x64xf32> to vector<8x64xf32>
    %163 = arith.truncf %162 : vector<8x64xf32> to vector<8x64xbf16>
    %cst_47 = arith.constant dense<0.000000e+00> : vector<64x64xf32>
    %164 = tpu.matmul %159, %161, %cst_47 {dimension_numbers = #tpu.dot_dimension_numbers<[0], [0], [1], [1], [0, 1, 1, 1], [], []>} : vector<8x64xbf16>, vector<8x64xbf16>, vector<64x64xf32> -> vector<64x64xf32>
    %165 = arith.addf %164, %117 : vector<64x64xf32>
    %cst_48 = arith.constant dense<0xFF800000> : vector<64xf32>
    %166 = vector.multi_reduction <maximumf>, %165, %cst_48 [1] : vector<64x64xf32> to vector<64xf32>
    %167 = vector.shape_cast %166 : vector<64xf32> to vector<64x1xf32>
    %168 = vector.broadcast %167 : vector<64x1xf32> to vector<64x64xf32>
    %169 = arith.subf %165, %168 : vector<64x64xf32>
    %170 = math.exp %169 : vector<64x64xf32>
    %cst_49 = arith.constant dense<0.000000e+00> : vector<64xf32>
    %171 = vector.multi_reduction <add>, %170, %cst_49 [1] : vector<64x64xf32> to vector<64xf32>
    %172 = vector.shape_cast %171 : vector<64xf32> to vector<64x1xf32>
    %173 = tpu.reciprocal %172 {approx = true} : vector<64x1xf32> -> vector<64x1xf32>
    %174 = vector.broadcast %173 : vector<64x1xf32> to vector<64x64xf32>
    %175 = arith.mulf %170, %174 : vector<64x64xf32>
    %176 = arith.truncf %175 : vector<64x64xf32> to vector<64x64xbf16>
    %cst_50 = arith.constant dense<0.000000e+00> : vector<8x64xf32>
    %177 = tpu.matmul %163, %176, %cst_50 {dimension_numbers = #tpu.dot_dimension_numbers<[1], [1], [0], [0], [0, 0, 1, 0], [], []>} : vector<8x64xbf16>, vector<64x64xbf16>, vector<8x64xf32> -> vector<8x64xf32>
    %178 = vector.extract_strided_slice %113 {offsets = [24, 0], sizes = [8, 64], strides = [1, 1]} : vector<64x64xf32> to vector<8x64xf32>
    %179 = arith.truncf %178 : vector<8x64xf32> to vector<8x64xbf16>
    %180 = vector.extract_strided_slice %113 {offsets = [56, 0], sizes = [8, 64], strides = [1, 1]} : vector<64x64xf32> to vector<8x64xf32>
    %181 = arith.truncf %180 : vector<8x64xf32> to vector<8x64xbf16>
    %182 = vector.extract_strided_slice %114 {offsets = [24, 0], sizes = [8, 64], strides = [1, 1]} : vector<32x64xf32> to vector<8x64xf32>
    %183 = arith.truncf %182 : vector<8x64xf32> to vector<8x64xbf16>
    %cst_51 = arith.constant dense<0.000000e+00> : vector<64x64xf32>
    %184 = tpu.matmul %179, %181, %cst_51 {dimension_numbers = #tpu.dot_dimension_numbers<[0], [0], [1], [1], [0, 1, 1, 1], [], []>} : vector<8x64xbf16>, vector<8x64xbf16>, vector<64x64xf32> -> vector<64x64xf32>
    %185 = arith.addf %184, %117 : vector<64x64xf32>
    %cst_52 = arith.constant dense<0xFF800000> : vector<64xf32>
    %186 = vector.multi_reduction <maximumf>, %185, %cst_52 [1] : vector<64x64xf32> to vector<64xf32>
    %187 = vector.shape_cast %186 : vector<64xf32> to vector<64x1xf32>
    %188 = vector.broadcast %187 : vector<64x1xf32> to vector<64x64xf32>
    %189 = arith.subf %185, %188 : vector<64x64xf32>
    %190 = math.exp %189 : vector<64x64xf32>
    %cst_53 = arith.constant dense<0.000000e+00> : vector<64xf32>
    %191 = vector.multi_reduction <add>, %190, %cst_53 [1] : vector<64x64xf32> to vector<64xf32>
    %192 = vector.shape_cast %191 : vector<64xf32> to vector<64x1xf32>
    %193 = tpu.reciprocal %192 {approx = true} : vector<64x1xf32> -> vector<64x1xf32>
    %194 = vector.broadcast %193 : vector<64x1xf32> to vector<64x64xf32>
    %195 = arith.mulf %190, %194 : vector<64x64xf32>
    %196 = arith.truncf %195 : vector<64x64xf32> to vector<64x64xbf16>
    %cst_54 = arith.constant dense<0.000000e+00> : vector<8x64xf32>
    %197 = tpu.matmul %183, %196, %cst_54 {dimension_numbers = #tpu.dot_dimension_numbers<[1], [1], [0], [0], [0, 0, 1, 0], [], []>} : vector<8x64xbf16>, vector<64x64xbf16>, vector<8x64xf32> -> vector<8x64xf32>
    %198 = tpu.concatenate %137, %157, %177, %197 in 0 : vector<8x64xf32>, vector<8x64xf32>, vector<8x64xf32>, vector<8x64xf32> -> vector<32x64xf32>
    %199 = arith.truncf %198 : vector<32x64xf32> to vector<32x64xbf16>
    %c0_55 = arith.constant 0 : index
    %c0_56 = arith.constant 0 : index
    %c0_57 = arith.constant 0 : index
    %200 = vector.load %arg8[%c0_55, %c0_56, %c0_57] : memref<1x32x32xbf16, #tpu.memory_space<vmem>>, vector<1x32x32xbf16>
    %201 = vector.shape_cast %200 : vector<1x32x32xbf16> to vector<32x32xbf16>
    %cst_58 = arith.constant dense<0.000000e+00> : vector<64x32xf32>
    %202 = tpu.matmul %199, %201, %cst_58 {dimension_numbers = #tpu.dot_dimension_numbers<[0], [0], [1], [1], [0, 1, 1, 1], [], []>} : vector<32x64xbf16>, vector<32x32xbf16>, vector<64x32xf32> -> vector<64x32xf32>
    %203 = tpu.concatenate %112, %202 in 0 : vector<64x32xf32>, vector<64x32xf32> -> vector<128x32xf32>
    %c0_59 = arith.constant 0 : index
    %c0_60 = arith.constant 0 : index
    %c0_61 = arith.constant 0 : index
    %204 = vector.load %arg9[%c0_59, %c0_60, %c0_61] : memref<1x1x32xf32, #tpu.memory_space<vmem>>, vector<1x1x32xf32>
    %205 = vector.shape_cast %204 : vector<1x1x32xf32> to vector<1x32xf32>
    %206 = vector.broadcast %205 : vector<1x32xf32> to vector<128x32xf32>
    %207 = arith.addf %203, %206 : vector<128x32xf32>
    %208 = arith.addf %3, %207 : vector<128x32xf32>
    %c0_62 = arith.constant 0 : index
    %c0_63 = arith.constant 0 : index
    %c0_64 = arith.constant 0 : index
    %209 = vector.load %arg14[%c0_62, %c0_63, %c0_64] : memref<1x1x32xf32, #tpu.memory_space<vmem>>, vector<1x1x32xf32>
    %210 = vector.shape_cast %209 : vector<1x1x32xf32> to vector<1x32xf32>
    %c0_65 = arith.constant 0 : index
    %c0_66 = arith.constant 0 : index
    %c0_67 = arith.constant 0 : index
    %211 = vector.load %arg15[%c0_65, %c0_66, %c0_67] : memref<1x1x32xf32, #tpu.memory_space<vmem>>, vector<1x1x32xf32>
    %212 = vector.shape_cast %211 : vector<1x1x32xf32> to vector<1x32xf32>
    %cst_68 = arith.constant dense<0.000000e+00> : vector<128xf32>
    %213 = vector.multi_reduction <add>, %208, %cst_68 [1] : vector<128x32xf32> to vector<128xf32>
    %214 = vector.shape_cast %213 : vector<128xf32> to vector<128x1xf32>
    %cst_69 = arith.constant 3.200000e+01 : f32
    %215 = vector.broadcast %cst_69 : f32 to vector<128x1xf32>
    %216 = arith.divf %214, %215 : vector<128x1xf32>
    %217 = vector.broadcast %216 : vector<128x1xf32> to vector<128x32xf32>
    %218 = arith.subf %208, %217 : vector<128x32xf32>
    %219 = arith.mulf %218, %218 : vector<128x32xf32>
    %cst_70 = arith.constant dense<0.000000e+00> : vector<128xf32>
    %220 = vector.multi_reduction <add>, %219, %cst_70 [1] : vector<128x32xf32> to vector<128xf32>
    %221 = vector.shape_cast %220 : vector<128xf32> to vector<128x1xf32>
    %cst_71 = arith.constant 3.200000e+01 : f32
    %222 = vector.broadcast %cst_71 : f32 to vector<128x1xf32>
    %223 = arith.divf %221, %222 : vector<128x1xf32>
    %224 = vector.broadcast %216 : vector<128x1xf32> to vector<128x32xf32>
    %225 = arith.subf %208, %224 : vector<128x32xf32>
    %cst_72 = arith.constant 9.99999974E-6 : f32
    %226 = vector.broadcast %cst_72 : f32 to vector<128x1xf32>
    %227 = arith.addf %223, %226 : vector<128x1xf32>
    %228 = math.rsqrt %227 : vector<128x1xf32>
    %229 = vector.broadcast %228 : vector<128x1xf32> to vector<128x32xf32>
    %230 = arith.mulf %225, %229 : vector<128x32xf32>
    %231 = vector.broadcast %210 : vector<1x32xf32> to vector<128x32xf32>
    %232 = arith.mulf %230, %231 : vector<128x32xf32>
    %233 = vector.broadcast %212 : vector<1x32xf32> to vector<128x32xf32>
    %234 = arith.addf %232, %233 : vector<128x32xf32>
    %235 = arith.truncf %234 : vector<128x32xf32> to vector<128x32xbf16>
    %c0_73 = arith.constant 0 : index
    %c0_74 = arith.constant 0 : index
    %c0_75 = arith.constant 0 : index
    %236 = vector.load %arg10[%c0_73, %c0_74, %c0_75] : memref<1x32x64xbf16, #tpu.memory_space<vmem>>, vector<1x32x64xbf16>
    %237 = vector.shape_cast %236 : vector<1x32x64xbf16> to vector<32x64xbf16>
    %cst_76 = arith.constant dense<0.000000e+00> : vector<128x64xf32>
    %238 = tpu.matmul %235, %237, %cst_76 {dimension_numbers = #tpu.dot_dimension_numbers<[1], [0], [0], [1], [0, 0, 1, 1], [], []>} : vector<128x32xbf16>, vector<32x64xbf16>, vector<128x64xf32> -> vector<128x64xf32>
    %c0_77 = arith.constant 0 : index
    %c0_78 = arith.constant 0 : index
    %c0_79 = arith.constant 0 : index
    %239 = vector.load %arg11[%c0_77, %c0_78, %c0_79] : memref<1x1x64xf32, #tpu.memory_space<vmem>>, vector<1x1x64xf32>
    %240 = vector.shape_cast %239 : vector<1x1x64xf32> to vector<1x64xf32>
    %241 = vector.broadcast %240 : vector<1x64xf32> to vector<128x64xf32>
    %242 = arith.addf %238, %241 : vector<128x64xf32>
    %cst_80 = arith.constant 0.000000e+00 : f32
    %243 = vector.broadcast %cst_80 : f32 to vector<128x64xf32>
    %244 = arith.maximumf %242, %243 : vector<128x64xf32>
    %245 = arith.truncf %244 : vector<128x64xf32> to vector<128x64xbf16>
    %c0_81 = arith.constant 0 : index
    %c0_82 = arith.constant 0 : index
    %c0_83 = arith.constant 0 : index
    %246 = vector.load %arg12[%c0_81, %c0_82, %c0_83] : memref<1x64x32xbf16, #tpu.memory_space<vmem>>, vector<1x64x32xbf16>
    %247 = vector.shape_cast %246 : vector<1x64x32xbf16> to vector<64x32xbf16>
    %cst_84 = arith.constant dense<0.000000e+00> : vector<128x32xf32>
    %248 = tpu.matmul %245, %247, %cst_84 {dimension_numbers = #tpu.dot_dimension_numbers<[1], [0], [0], [1], [0, 0, 1, 1], [], []>} : vector<128x64xbf16>, vector<64x32xbf16>, vector<128x32xf32> -> vector<128x32xf32>
    %c0_85 = arith.constant 0 : index
    %c0_86 = arith.constant 0 : index
    %c0_87 = arith.constant 0 : index
    %249 = vector.load %arg13[%c0_85, %c0_86, %c0_87] : memref<1x1x32xf32, #tpu.memory_space<vmem>>, vector<1x1x32xf32>
    %250 = vector.shape_cast %249 : vector<1x1x32xf32> to vector<1x32xf32>
    %251 = vector.broadcast %250 : vector<1x32xf32> to vector<128x32xf32>
    %252 = arith.addf %248, %251 : vector<128x32xf32>
    %253 = arith.addf %234, %252 : vector<128x32xf32>
    %c0_88 = arith.constant 0 : index
    %c0_89 = arith.constant 0 : index
    %c0_90 = arith.constant 0 : index
    %254 = vector.load %arg16[%c0_88, %c0_89, %c0_90] : memref<1x1x32xf32, #tpu.memory_space<vmem>>, vector<1x1x32xf32>
    %255 = vector.shape_cast %254 : vector<1x1x32xf32> to vector<1x32xf32>
    %c0_91 = arith.constant 0 : index
    %c0_92 = arith.constant 0 : index
    %c0_93 = arith.constant 0 : index
    %256 = vector.load %arg17[%c0_91, %c0_92, %c0_93] : memref<1x1x32xf32, #tpu.memory_space<vmem>>, vector<1x1x32xf32>
    %257 = vector.shape_cast %256 : vector<1x1x32xf32> to vector<1x32xf32>
    %cst_94 = arith.constant dense<0.000000e+00> : vector<128xf32>
    %258 = vector.multi_reduction <add>, %253, %cst_94 [1] : vector<128x32xf32> to vector<128xf32>
    %259 = vector.shape_cast %258 : vector<128xf32> to vector<128x1xf32>
    %cst_95 = arith.constant 3.200000e+01 : f32
    %260 = vector.broadcast %cst_95 : f32 to vector<128x1xf32>
    %261 = arith.divf %259, %260 : vector<128x1xf32>
    %262 = vector.broadcast %261 : vector<128x1xf32> to vector<128x32xf32>
    %263 = arith.subf %253, %262 : vector<128x32xf32>
    %264 = arith.mulf %263, %263 : vector<128x32xf32>
    %cst_96 = arith.constant dense<0.000000e+00> : vector<128xf32>
    %265 = vector.multi_reduction <add>, %264, %cst_96 [1] : vector<128x32xf32> to vector<128xf32>
    %266 = vector.shape_cast %265 : vector<128xf32> to vector<128x1xf32>
    %cst_97 = arith.constant 3.200000e+01 : f32
    %267 = vector.broadcast %cst_97 : f32 to vector<128x1xf32>
    %268 = arith.divf %266, %267 : vector<128x1xf32>
    %269 = vector.broadcast %261 : vector<128x1xf32> to vector<128x32xf32>
    %270 = arith.subf %253, %269 : vector<128x32xf32>
    %cst_98 = arith.constant 9.99999974E-6 : f32
    %271 = vector.broadcast %cst_98 : f32 to vector<128x1xf32>
    %272 = arith.addf %268, %271 : vector<128x1xf32>
    %273 = math.rsqrt %272 : vector<128x1xf32>
    %274 = vector.broadcast %273 : vector<128x1xf32> to vector<128x32xf32>
    %275 = arith.mulf %270, %274 : vector<128x32xf32>
    %276 = vector.broadcast %255 : vector<1x32xf32> to vector<128x32xf32>
    %277 = arith.mulf %275, %276 : vector<128x32xf32>
    %278 = vector.broadcast %257 : vector<1x32xf32> to vector<128x32xf32>
    %279 = arith.addf %277, %278 : vector<128x32xf32>
    %c0_99 = arith.constant 0 : index
    %c0_100 = arith.constant 0 : index
    %280 = vector.load %arg19[%c0_99, %c0_100] : memref<128x32xf32, #tpu.memory_space<vmem>>, vector<128x32xf32>
    tpu.vector_store %arg19[%c0_99, %c0_100], %279 {strides = array<i32>} : memref<128x32xf32, #tpu.memory_space<vmem>>, vector<128x32xf32>,
    %c1_i32 = arith.constant 1 : i32
    %281 = arith.cmpi eq, %arg0, %c1_i32 : i32
    %282 = arith.extui %281 : i1 to i32
    %c0_i32_101 = arith.constant 0 : i32
    %283 = arith.cmpi ne, %282, %c0_i32_101 : i32
    scf.if %283 {
      %c0_102 = arith.constant 0 : index
      %c0_103 = arith.constant 0 : index
      %284 = vector.load %arg18[%c0_102, %c0_103] : memref<128x32xf32, #tpu.memory_space<vmem>>, vector<128x32xf32>
      tpu.vector_store %arg18[%c0_102, %c0_103], %279 {strides = array<i32>} : memref<128x32xf32, #tpu.memory_space<vmem>>, vector<128x32xf32>,
    } else {
    }
    return
  }
  func.func @transform_0(%arg0: i32) -> (i32, i32) {
    %c0_i32 = arith.constant 0 : i32
    %c0_i32_0 = arith.constant 0 : i32
    %c0_i32_1 = arith.constant 0 : i32
    return %c0_i32, %c0_i32_0 : i32, i32
  }
  func.func @transform_1(%arg0: i32) -> (i32, i32) {
    %c0_i32 = arith.constant 0 : i32
    %c0_i32_0 = arith.constant 0 : i32
    %c0_i32_1 = arith.constant 0 : i32
    return %c0_i32, %c0_i32_0 : i32, i32
  }
  func.func @transform_2(%arg0: i32) -> (i32, i32) {
    %c0_i32 = arith.constant 0 : i32
    %c0_i32_0 = arith.constant 0 : i32
    %c0_i32_1 = arith.constant 0 : i32
    return %c0_i32, %c0_i32_0 : i32, i32
  }
  func.func @transform_3(%arg0: i32) -> (i32, i32, i32) {
    %c0_i32 = arith.constant 0 : i32
    %c0_i32_0 = arith.constant 0 : i32
    %c0_i32_1 = arith.constant 0 : i32
    return %arg0, %c0_i32, %c0_i32_0 : i32, i32, i32
  }
  func.func @transform_4(%arg0: i32) -> (i32, i32, i32) {
    %c0_i32 = arith.constant 0 : i32
    %c0_i32_0 = arith.constant 0 : i32
    %c0_i32_1 = arith.constant 0 : i32
    return %arg0, %c0_i32, %c0_i32_0 : i32, i32, i32
  }
  func.func @transform_5(%arg0: i32) -> (i32, i32, i32) {
    %c0_i32 = arith.constant 0 : i32
    %c0_i32_0 = arith.constant 0 : i32
    %c0_i32_1 = arith.constant 0 : i32
    return %arg0, %c0_i32, %c0_i32_0 : i32, i32, i32
  }
  func.func @transform_6(%arg0: i32) -> (i32, i32, i32) {
    %c0_i32 = arith.constant 0 : i32
    %c0_i32_0 = arith.constant 0 : i32
    %c0_i32_1 = arith.constant 0 : i32
    return %arg0, %c0_i32, %c0_i32_0 : i32, i32, i32
  }
  func.func @transform_7(%arg0: i32) -> (i32, i32, i32) {
    %c0_i32 = arith.constant 0 : i32
    %c0_i32_0 = arith.constant 0 : i32
    %c0_i32_1 = arith.constant 0 : i32
    return %arg0, %c0_i32, %c0_i32_0 : i32, i32, i32
  }
  func.func @transform_8(%arg0: i32) -> (i32, i32, i32) {
    %c0_i32 = arith.constant 0 : i32
    %c0_i32_0 = arith.constant 0 : i32
    %c0_i32_1 = arith.constant 0 : i32
    return %arg0, %c0_i32, %c0_i32_0 : i32, i32, i32
  }
  func.func @transform_9(%arg0: i32) -> (i32, i32, i32) {
    %c0_i32 = arith.constant 0 : i32
    %c0_i32_0 = arith.constant 0 : i32
    %c0_i32_1 = arith.constant 0 : i32
    return %arg0, %c0_i32, %c0_i32_0 : i32, i32, i32
  }
  func.func @transform_10(%arg0: i32) -> (i32, i32, i32) {
    %c0_i32 = arith.constant 0 : i32
    %c0_i32_0 = arith.constant 0 : i32
    %c0_i32_1 = arith.constant 0 : i32
    return %arg0, %c0_i32, %c0_i32_0 : i32, i32, i32
  }
  func.func @transform_11(%arg0: i32) -> (i32, i32, i32) {
    %c0_i32 = arith.constant 0 : i32
    %c0_i32_0 = arith.constant 0 : i32
    %c0_i32_1 = arith.constant 0 : i32
    return %arg0, %c0_i32, %c0_i32_0 : i32, i32, i32
  }
  func.func @transform_12(%arg0: i32) -> (i32, i32, i32) {
    %c0_i32 = arith.constant 0 : i32
    %c0_i32_0 = arith.constant 0 : i32
    %c0_i32_1 = arith.constant 0 : i32
    return %arg0, %c0_i32, %c0_i32_0 : i32, i32, i32
  }
  func.func @transform_13(%arg0: i32) -> (i32, i32, i32) {
    %c0_i32 = arith.constant 0 : i32
    %c0_i32_0 = arith.constant 0 : i32
    %c0_i32_1 = arith.constant 0 : i32
    return %arg0, %c0_i32, %c0_i32_0 : i32, i32, i32
  }
  func.func @transform_14(%arg0: i32) -> (i32, i32, i32) {
    %c0_i32 = arith.constant 0 : i32
    %c0_i32_0 = arith.constant 0 : i32
    %c0_i32_1 = arith.constant 0 : i32
    return %arg0, %c0_i32, %c0_i32_0 : i32, i32, i32
  }
  func.func @transform_15(%arg0: i32) -> (i32, i32, i32) {
    %c0_i32 = arith.constant 0 : i32
    %c0_i32_0 = arith.constant 0 : i32
    %c0_i32_1 = arith.constant 0 : i32
    return %arg0, %c0_i32, %c0_i32_0 : i32, i32, i32
  }
  func.func @transform_16(%arg0: i32) -> (i32, i32, i32) {
    %c0_i32 = arith.constant 0 : i32
    %c0_i32_0 = arith.constant 0 : i32
    %c0_i32_1 = arith.constant 0 : i32
    return %arg0, %c0_i32, %c0_i32_0 : i32, i32, i32
  }
  func.func @transform_17(%arg0: i32) -> (i32, i32) {
    %c0_i32 = arith.constant 0 : i32
    %c0_i32_0 = arith.constant 0 : i32
    %c0_i32_1 = arith.constant 0 : i32
    return %c0_i32, %c0_i32_0 : i32, i32
  }
}

</mosaic_0001>

<bundles_post_ra>
// kernel: transformer_encoder_forward.1
= control target key start
LH: loop header
LB: loop body
LE: loop exit
PB: predicated region body
PF: predicated region fallthrough
CT: control target
= control target key end

     0   :  { %s4634_s24 = smov 0   ;;  %s6506_s0 = inlined_call_operand.vmem [shape: f32[128,32], index: 0, kind: input, shape index: {}]   ;;  %s6507_s1 = inlined_call_operand.vmem [shape: f32[128,32], index: 1, kind: input, shape index: {}]   ;;  %s6508_s2 = inlined_call_operand.vmem [shape: f32[2,64], index: 2, kind: input, shape index: {}]   ;;  %s6509_s3 = inlined_call_operand.vmem [shape: bf16[2,64,32], index: 3, kind: input, shape index: {}]   ;;  %s6510_s4 = inlined_call_operand.vmem [shape: f32[2,64,1], index: 4, kind: input, shape index: {}]   ;;  %s6511_s5 = inlined_call_operand.vmem [shape: bf16[2,32,32], index: 5, kind: input, shape index: {}]   ;;  %s6512_s6 = inlined_call_operand.vmem [shape: f32[2,32,1], index: 6, kind: input, shape index: {}]   ;;  %s6513_s7 = inlined_call_operand.vmem [shape: bf16[2,32,32], index: 7, kind: input, shape index: {}]   ;;  %s6514_s8 = inlined_call_operand.vmem [shape: f32[2,1,32], index: 8, kind: input, shape index: {}]   ;;  %s6515_s9 = inlined_call_operand.vmem [shape: bf16[2,32,64], index: 9, kind: input, shape index: {}]   ;;  %s6516_s10 = inlined_call_operand.vmem [shape: f32[2,1,64], index: 10, kind: input, shape index: {}]   ;;  %s6517_s11 = inlined_call_operand.vmem [shape: bf16[2,64,32], index: 11, kind: input, shape index: {}]   ;;  %s6518_s12 = inlined_call_operand.vmem [shape: f32[2,1,32], index: 12, kind: input, shape index: {}]   ;;  %s6519_s13 = inlined_call_operand.vmem [shape: f32[2,1,32], index: 13, kind: input, shape index: {}]   ;;  %s6520_s14 = inlined_call_operand.vmem [shape: f32[2,1,32], index: 14, kind: input, shape index: {}]   ;;  %s6521_s15 = inlined_call_operand.vmem [shape: f32[2,1,32], index: 15, kind: input, shape index: {}]   ;;  %s6522_s16 = inlined_call_operand.vmem [shape: f32[2,1,32], index: 16, kind: input, shape index: {}]   ;;  %s6523_s17 = inlined_call_operand.vmem [shape: f32[128,32], index: 17, kind: output, shape index: {}]  }
   0x1   :  { %6531 = sst [smem:[#allocation6_spill]] %s6506_s0 }
   0x2   :  { %6532 = sst [smem:[#allocation7_spill]] %s6507_s1 }
   0x3   :  { %6533 = sst [smem:[#allocation8_spill]] %s6508_s2 }
   0x4   :  { %6534 = sst [smem:[#allocation9_spill]] %s6509_s3 }
   0x5   :  { %6535 = sst [smem:[#allocation10_spill]] %s6510_s4 }
   0x6   :  { %6536 = sst [smem:[#allocation11_spill]] %s6511_s5 }
   0x7   :  { %6537 = sst [smem:[#allocation12_spill]] %s6512_s6 }
   0x8   :  { %6538 = sst [smem:[#allocation13_spill]] %s6513_s7 }
   0x9   :  { %6539 = sst [smem:[#allocation14_spill]] %s6515_s9 }
   0xa   :  { %6540 = sst [smem:[#allocation15_spill]] %s6523_s17 }
   0xb LB: > { %6541 = sst [smem:[#allocation3_spill]] %s4539_s24  ;;  %s4640_s25 = sadd.s32 4294967295, %s4539_s24   ;;  %s4539_s24 = sphi %s4634_s24, %s27_s24  }
   0xc   : > { %6542 = sst [smem:[#allocation4_spill]] %s4640_s25  ;;  %p3994_p0 = scmp.ge.s32.totalorder %s4539_s24, 1 }
   0xd   : > { %p598_p1 = scmp.lt.s32.totalorder %s4539_s24, 3 }
   0xf   : > { %p599_p2 = pnand %p3994_p0, %p598_p1 }
  0x11   : > { %602 = sbr.rel (%p599_p2) target bundleno = 5706 (0x164a), region = 88 }
  0x16   : > { %p696_p3 = scmp.lt.s32.totalorder %s4640_s25, 1  ;;  %s6543_s3 = sld [smem:[#allocation9_spill]] }
  0x17   : > { %s6544_s4 = sld [smem:[#allocation10_spill]] }
  0x18   : > { %s4646_s26 = scalar_select %p696_p3, %s4640_s25, 1 }
  0x19   : > { %s6545_s6 = sld [smem:[#allocation12_spill]] }
  0x1a   : > { %s4139_s27 = sshll.u32 %s4646_s26, 5  ;;  %s4140_s28 = sshll.u32 %s4646_s26, 6 }
  0x1b   : > { %s4141_s20 = sshll.u32 %s4646_s26, 4  ;;  %s6547_s5 = sld [smem:[#allocation11_spill]] }
  0x1c   : > { %s4653_s30 = scalar_lea.vmem %s6543_s3, %s4139_s27  ;;  %s6548_s7 = sld [smem:[#allocation13_spill]] }
  0x1d   : > { %s4658_s1 = scalar_lea.vmem %s6544_s4, %s4140_s28  ;;  %s6549_s9 = sld [smem:[#allocation14_spill]] }
  0x1e   : > { %s742_s28 = scalar_lea.vmem %s6519_s13, %s4646_s26  ;;  %s745_s19 = scalar_lea.vmem %s6520_s14, %s4646_s26 }
  0x1f   : > { %s4664_s23 = scalar_lea.vmem %s6545_s6, %s4139_s27  ;;  %s748_s22 = scalar_lea.vmem %s6521_s15, %s4646_s26 }
  0x20   : > { %6546 = sst [smem:[#allocation5_spill]] %s4664_s23  ;;  %s4692_s23 = scalar_lea.vmem %s6517_s11, %s4139_s27 }
  0x21   : > { %s4669_s2 = scalar_lea.vmem %s6547_s5, %s4141_s20  ;;  %s751_s27 = scalar_lea.vmem %s6522_s16, %s4646_s26 }
  0x22   : > { %s4674_s0 = scalar_lea.vmem %s6548_s7, %s4141_s20  ;;  %s6550_s24 = sld [smem:[#allocation4_spill]] }
  0x23   : > { %s4683_s21 = scalar_lea.vmem %s6549_s9, %s4141_s20 }
  0x28   : > { %p4009_p4 = scmp.ne.s32.totalorder %s6550_s24, 0 }
  0x29   : > { %s6551_s7 = sld [smem:[#allocation6_spill]] (!%p4009_p4) }
  0x2a   : > { %756 = sbr.rel (%p4009_p4) target bundleno = 64 (0x40), region = 92 }
  0x2f   : > { %v757_v0 = vld [vmem:[%s6551_s7] sm:$0xff]  ;;  %vm773_vm0 = vcmask 261120   ;;  %v758_v1 = vld [vmem:[%s6551_s7 + $0x8] sm:$0xff]  ;;  %v759_v2 = vld [vmem:[%s6551_s7 + $0x10] sm:$0xff] }
  0x30   : > { %774 = vst.msk [vmem:[#allocation2] sm:$0xff] %vm773_vm0, %v757_v0  ;;  %v760_v3 = vld [vmem:[%s6551_s7 + $0x18] sm:$0xff]  ;;  %v761_v4 = vld [vmem:[%s6551_s7 + $0x20] sm:$0xff]  ;;  %v762_v5 = vld [vmem:[%s6551_s7 + $0x28] sm:$0xff] }
  0x31   : > { %775 = vst.msk [vmem:[#allocation2 + $0x8] sm:$0xff] %vm773_vm0, %v758_v1  ;;  %v763_v6 = vld [vmem:[%s6551_s7 + $0x30] sm:$0xff]  ;;  %v764_v7 = vld [vmem:[%s6551_s7 + $0x38] sm:$0xff]  ;;  %v765_v8 = vld [vmem:[%s6551_s7 + $0x40] sm:$0xff] }
  0x32   : > { %776 = vst.msk [vmem:[#allocation2 + $0x10] sm:$0xff] %vm773_vm0, %v759_v2  ;;  %v766_v9 = vld [vmem:[%s6551_s7 + $0x48] sm:$0xff]  ;;  %v767_v10 = vld [vmem:[%s6551_s7 + $0x50] sm:$0xff]  ;;  %v768_v11 = vld [vmem:[%s6551_s7 + $0x58] sm:$0xff] }
  0x33   : > { %777 = vst.msk [vmem:[#allocation2 + $0x18] sm:$0xff] %vm773_vm0, %v760_v3  ;;  %v769_v12 = vld [vmem:[%s6551_s7 + $0x60] sm:$0xff]  ;;  %v770_v13 = vld [vmem:[%s6551_s7 + $0x68] sm:$0xff]  ;;  %v771_v14 = vld [vmem:[%s6551_s7 + $0x70] sm:$0xff] }
  0x34   : > { %778 = vst.msk [vmem:[#allocation2 + $0x20] sm:$0xff] %vm773_vm0, %v761_v4  ;;  %v772_v15 = vld [vmem:[%s6551_s7 + $0x78] sm:$0xff] }
  0x35   : > { %779 = vst.msk [vmem:[#allocation2 + $0x28] sm:$0xff] %vm773_vm0, %v762_v5 }
  0x36   : > { %780 = vst.msk [vmem:[#allocation2 + $0x30] sm:$0xff] %vm773_vm0, %v763_v6 }
  0x37   : > { %781 = vst.msk [vmem:[#allocation2 + $0x38] sm:$0xff] %vm773_vm0, %v764_v7 }
  0x38   : > { %782 = vst.msk [vmem:[#allocation2 + $0x40] sm:$0xff] %vm773_vm0, %v765_v8 }
  0x39   : > { %783 = vst.msk [vmem:[#allocation2 + $0x48] sm:$0xff] %vm773_vm0, %v766_v9 }
  0x3a   : > { %784 = vst.msk [vmem:[#allocation2 + $0x50] sm:$0xff] %vm773_vm0, %v767_v10 }
  0x3b   : > { %785 = vst.msk [vmem:[#allocation2 + $0x58] sm:$0xff] %vm773_vm0, %v768_v11 }
  0x3c   : > { %786 = vst.msk [vmem:[#allocation2 + $0x60] sm:$0xff] %vm773_vm0, %v769_v12 }
  0x3d   : > { %787 = vst.msk [vmem:[#allocation2 + $0x68] sm:$0xff] %vm773_vm0, %v770_v13 }
  0x3e   : > { %788 = vst.msk [vmem:[#allocation2 + $0x70] sm:$0xff] %vm773_vm0, %v771_v14 }
  0x3f   : > { %789 = vst.msk [vmem:[#allocation2 + $0x78] sm:$0xff] %vm773_vm0, %v772_v15 }
  0x40 PF: > { %s6552_s29 = sld [smem:[#allocation7_spill]]  ;;  %vm922_vm1 = vcmask 261120   ;;  %v4817_v39 = vld [vmem:[#allocation2 + $0x40] sm:$0xff]  ;;  %v4819_v40 = vld [vmem:[#allocation2 + $0x48] sm:$0xff]  ;;  %v4830_v47 = vld [vmem:[#allocation2 + $0x30] sm:$0xff]  ;;  %v4541_v63 = vmov 0   ;;  %s6555_s6 = scalar_lea.vmem %s6514_s8, %s4646_s26 }
  0x41   : > { %v4804_v30 = vld [vmem:[#allocation2 + $0x50] sm:$0xff]  ;;  %v4832_v48 = vld [vmem:[#allocation2 + $0x38] sm:$0xff]  ;;  %v4843_v55 = vld [vmem:[#allocation2 + $0x20] sm:$0xff]  ;;  %4173 = vset.pattern.permute.xlu0 %v4541_v63  ;;  %4174 = vset.pattern.permute.xlu2 %v4541_v63  ;;  %vm1117_vm2 = vcmask 1043456   ;;  %vm1104_vm3 = vcmask 64512   ;;  %s6553_s4 = sld [smem:[#allocation8_spill]]  ;;  %s6557_s18 = scalar_lea.vmem %s6518_s12, %s4646_s26 }
  0x42   : > { %v4806_v31 = vld [vmem:[#allocation2 + $0x58] sm:$0xff]  ;;  %v4845_v56 = vld [vmem:[#allocation2 + $0x28] sm:$0xff]  ;;  %v854_v62 = vld [vmem:[%s4658_s1] sm:$0xff]  ;;  %vm1150_vm4 = vcmask 523264   ;;  %s6554_s20 = sld [smem:[#allocation5_spill]] }
  0x43   : > { %v4790_v21 = vld [vmem:[#allocation2 + $0x60] sm:$0xff]  ;;  %v4857_v1 = vld [vmem:[#allocation2 + $0x10] sm:$0xff]  ;;  %864 = vperm.xlu0 %4173, %v854_v62   ;;  %v4859_v2 = vld [vmem:[#allocation2 + $0x18] sm:$0xff] }
  0x44   : > { %v4792_v22 = vld [vmem:[#allocation2 + $0x68] sm:$0xff]  ;;  %v858_v8 = vld [vmem:[%s4658_s1 + $0x20] sm:$0xff] }
  0x45   : > { %v4779_v16 = vld [vmem:[#allocation2 + $0x70] sm:$0xff]  ;;  %v4871_v10 = vld [vmem:[#allocation2] sm:$0xff]  ;;  %v4873_v11 = vld [vmem:[#allocation2 + $0x8] sm:$0xff] }
  0x46   : > { %v4781_v17 = vld [vmem:[#allocation2 + $0x78] sm:$0xff]  ;;  %v820_v18 = vld [vmem:[%s6552_s29 + $0x70] sm:$0xff]  ;;  %v818_v24 = vld [vmem:[%s6552_s29 + $0x60] sm:$0xff] }
  0x47   : > { %v821_v19 = vld [vmem:[%s6552_s29 + $0x78] sm:$0xff]  ;;  %v836_v20 = vadd.f32 %v820_v18, %v4779_v16  ;;  %v819_v25 = vld [vmem:[%s6552_s29 + $0x68] sm:$0xff]  ;;  %v834_v27 = vadd.f32 %v818_v24, %v4790_v21  ;;  %v816_v32 = vld [vmem:[%s6552_s29 + $0x50] sm:$0xff] }
  0x48   : > { %v837_v23 = vadd.f32 %v821_v19, %v4781_v17  ;;  %v835_v28 = vadd.f32 %v819_v25, %v4792_v22  ;;  %v817_v34 = vld [vmem:[%s6552_s29 + $0x58] sm:$0xff]  ;;  %v832_v36 = vadd.f32 %v816_v32, %v4804_v30  ;;  %v814_v41 = vld [vmem:[%s6552_s29 + $0x40] sm:$0xff]  ;;  %v815_v42 = vld [vmem:[%s6552_s29 + $0x48] sm:$0xff] }
  0x49   : > { %v833_v37 = vadd.f32 %v817_v34, %v4806_v31  ;;  %v830_v44 = vadd.f32 %v814_v41, %v4817_v39  ;;  %v831_v45 = vadd.f32 %v815_v42, %v4819_v40  ;;  %v812_v49 = vld [vmem:[%s6552_s29 + $0x30] sm:$0xff]  ;;  %v813_v50 = vld [vmem:[%s6552_s29 + $0x38] sm:$0xff]  ;;  %v810_v57 = vld [vmem:[%s6552_s29 + $0x20] sm:$0xff] }
  0x4a   : > { %v845_v26 = vpack.c.bf16 %v837_v23, %v836_v20  ;;  %v844_v33 = vpack.c.bf16 %v835_v28, %v834_v27  ;;  %v828_v52 = vadd.f32 %v812_v49, %v4830_v47  ;;  %v829_v53 = vadd.f32 %v813_v50, %v4832_v48  ;;  %v811_v58 = vld [vmem:[%s6552_s29 + $0x28] sm:$0xff]  ;;  %v808_v3 = vld [vmem:[%s6552_s29 + $0x10] sm:$0xff]  ;;  %v809_v4 = vld [vmem:[%s6552_s29 + $0x18] sm:$0xff] }
  0x4b   : > { %v843_v38 = vpack.c.bf16 %v833_v37, %v832_v36  ;;  %v842_v46 = vpack.c.bf16 %v831_v45, %v830_v44  ;;  %v826_v60 = vadd.f32 %v810_v57, %v4843_v55  ;;  %v827_v61 = vadd.f32 %v811_v58, %v4845_v56  ;;  %884 = vperm.xlu0 %4173, %v858_v8   ;;  %v806_v12 = vld [vmem:[%s6552_s29] sm:$0xff]  ;;  %v807_v13 = vld [vmem:[%s6552_s29 + $0x8] sm:$0xff]  ;;  %v4148_v25 = vld [vmem:[%s4653_s30 + $0x10] sm:$0xff] }
  0x4c   : > { %v957_v29 = vsel %vm922_vm1, %v845_v26, 0  ;;  %v954_v35 = vsel %vm922_vm1, %v844_v33, 0  ;;  %v841_v54 = vpack.c.bf16 %v829_v53, %v828_v52  ;;  %v824_v6 = vadd.f32 %v808_v3, %v4857_v1  ;;  %v4146_v23 = vld [vmem:[%s4653_s30] sm:$0xff]  ;;  %v4147_v24 = vld [vmem:[%s4653_s30 + $0x8] sm:$0xff] }
  0x4d   : > { %959 = vmatpush.bf16.xpose.msra.mxu1 %v957_v29  ;;  %v951_v43 = vsel %vm922_vm1, %v843_v38, 0  ;;  %v948_v51 = vsel %vm922_vm1, %v842_v46, 0  ;;  %v840_v0 = vpack.c.bf16 %v827_v61, %v826_v60  ;;  %v825_v7 = vadd.f32 %v809_v4, %v4859_v2  ;;  %v1083_v52 = vld [vmem:[%s6553_s4] sm:$0x3] }
  0x4e   : > { %v945_v59 = vsel %vm922_vm1, %v841_v54, 0  ;;  %v822_v15 = vadd.f32 %v806_v12, %v4871_v10  ;;  %v823_v18 = vadd.f32 %v807_v13, %v4873_v11  ;;  %v4911_v53 = vperm.slane %v1083_v52, 0  ;;  %v855_v12 = vld [vmem:[%s4658_s1 + $0x8] sm:$0xff] }
  0x4f   : > { %v942_v5 = vsel %vm922_vm1, %v840_v0, 0  ;;  %v839_v9 = vpack.c.bf16 %v825_v7, %v824_v6 }
  0x50   : > { %v838_v19 = vpack.c.bf16 %v823_v18, %v822_v15 }
  0x51   : > { %v939_v14 = vsel %vm922_vm1, %v839_v9, 0 }
  0x52   : > { %v936_v20 = vsel %vm922_vm1, %v838_v19, 0 }
  0x55   : > { %960 = vmatpush.bf16.xpose.msra.mxu1 %v954_v35 }
  0x5d   : > { %961 = vmatpush.bf16.xpose.msra.mxu1 %v951_v43 }
  0x65   : > { %962 = vmatpush.bf16.xpose.msra.mxu1 %v948_v51 }
  0x6d   : > { %963 = vmatpush.bf16.xpose.msra.mxu1 %v945_v59 }
  0x75   : > { %964 = vmatpush.bf16.xpose.msra.mxu1 %v942_v5 }
  0x7d   : > { %965 = vmatpush.bf16.xpose.msra.mxu1 %v939_v14 }
  0x85   : > { %966 = vmatpush.bf16.xpose.msra.mxu1 %v936_v20 }
  0x8c   : > { %4026 = vmatmul.msk.bf16.vlgmr.msra.gmra.mxu1 %vm922_vm1, %v4146_v23 }
  0x9c   : > { %4027 = vmatmul.msk.bf16.gmra.mxu1 %vm922_vm1, %v4147_v24 }
  0xac   : > { %4028 = vmatmul.msk.bf16.gmra.mxu1 %vm922_vm1, %v4148_v25 }
  0xb5   : > { %v865_v26 = vpop.permute.xlu0 %864 }
  0xbd   : > { %v885_v35 = vpop.permute.xlu0 %884 }
 0x109   : > { %v968_v27 = vpop.f32.mrf.mxu1 }
 0x10a   : > { %v969_v28 = vadd.f32 %v968_v27, %v865_v26 }
 0x10c   : > { %v4891_v29 = vpack.c.bf16 %v969_v28, %v969_v28 }
 0x10e   : > { %1088 = vxpose.xlu1.c.b16.start.end [1/1] (short) (narrow) %v4891_v29, 64 }
 0x111   : > { %v4894_v32 = vpop.f32.mrf.mxu1 }
 0x119   : > { %v4896_v33 = vpop.f32.mrf.mxu1 }
 0x121   : > { %v4898_v34 = vpop.f32.mrf.mxu1 }
 0x129   : > { %v978_v36 = vpop.f32.mrf.mxu1 }
 0x12a   : > { %v979_v37 = vadd.f32 %v978_v36, %v885_v35  ;;  %v999_v35 = vpack.c.bf16 %v4781_v17, %v4779_v16  ;;  %v998_v16 = vpack.c.bf16 %v4792_v22, %v4790_v21  ;;  %v997_v22 = vpack.c.bf16 %v4806_v31, %v4804_v30 }
 0x12c   : > { %v4900_v38 = vpack.c.bf16 %v979_v37, %v979_v37  ;;  %v1062_v37 = vsel %vm922_vm1, %v999_v35, 0 }
 0x12d   : > { %1064 = vmatpush.bf16.xpose.msrb.mxu1 %v1062_v37 }
 0x12e   : > { %v1119_v41 = vsel %vm1117_vm2, %v4900_v38, 0 }
 0x12f   : > { %1128 = vmatpush.bf16.msra.mxu2 %v1119_v41 }
 0x161   : > { %4175 = vset.pattern.permute.xlu1 %v4541_v63 }
 0x1ba   : > { %v1096_v42 = vpop.trf.xlu1 }
 0x1bb   : > { %4040 = vmatmul.msk.bf16.vlgmr.msra.gmra.mxu2 %vm1104_vm3, %v1096_v42 }
 0x1ca   : > { %v1097_v43 = vpop.trf.xlu1 }
 0x1cb   : > { %4041 = vmatmul.msk.bf16.gmra.mxu2 %vm1104_vm3, %v1097_v43 }
 0x1da   : > { %v1098_v44 = vpop.trf.xlu1 }
 0x1db   : > { %4042 = vmatmul.msk.bf16.gmra.mxu2 %vm1104_vm3, %v1098_v44 }
 0x1ea   : > { %v1099_v45 = vpop.trf.xlu1 }
 0x1eb   : > { %4043 = vmatmul.msk.bf16.gmra.mxu2 %vm1104_vm3, %v1099_v45 }
 0x23e   : > { %v1130_v46 = vpop.f32.mrf.mxu2 }
 0x23f   : > { %v1131_v13 = vadd.f32 %v1130_v46, %v4911_v53 }
 0x241   : > { %v1151_v14 = vsel %vm1150_vm4, %v1131_v13, -inf }
 0x246   : > { %v1132_v49 = vpop.f32.mrf.mxu2 }
 0x247   : > { %v1133_v15 = vadd.f32 %v1132_v49, %v4911_v53 }
 0x249   : > { %v1154_v18 = vsel %vm1150_vm4, %v1133_v15, -inf }
 0x24e   : > { %v1135_v50 = vpop.f32.mrf.mxu2 }
 0x24f   : > { %v1136_v59 = vadd.f32 %v1135_v50, %v4911_v53 }
 0x251   : > { %v1157_v63 = vsel %vm1150_vm4, %v1136_v59, -inf }
 0x256   : > { %v1137_v51 = vpop.f32.mrf.mxu2 }
 0x257   : > { %v1138_v0 = vadd.f32 %v1137_v51, %v4911_v53  ;;  %v1059_v51 = vsel %vm922_vm1, %v998_v16, 0 }
 0x258   : > { %1065 = vmatpush.bf16.xpose.msrb.mxu1 %v1059_v51 }
 0x259   : > { %v1160_v5 = vsel %vm1150_vm4, %v1138_v0, -inf }
 0x25e   : > { %v1140_v54 = vpop.f32.mrf.mxu2 }
 0x25f   : > { %v1141_v57 = vadd.f32 %v1140_v54, %v4911_v53 }
 0x261   : > { %v1163_v58 = vsel %vm1150_vm4, %v1141_v57, -inf }
 0x262   : > { %1164 = vmax.xlane.f32.xlu2 %v1163_v58 }
 0x266   : > { %v1142_v60 = vpop.f32.mrf.mxu2 }
 0x267   : > { %v4917_v61 = vadd.f32 %v1142_v60, %v4911_v53 }
 0x269   : > { %v1166_v62 = vsel %vm1150_vm4, %v4917_v61, -inf }
 0x26a   : > { %1167 = vmax.xlane.f32.xlu0 %v1166_v62  ;;  %1158 = vmax.xlane.f32.xlu2 %v1157_v63  ;;  %v1056_v62 = vsel %vm922_vm1, %v997_v22, 0 }
 0x26b   : > { %1066 = vmatpush.bf16.xpose.msrb.mxu1 %v1056_v62 }
 0x26e   : > { %v1145_v3 = vpop.f32.mrf.mxu2 }
 0x26f   : > { %v4924_v4 = vadd.f32 %v1145_v3, %v4911_v53  ;;  %v996_v3 = vpack.c.bf16 %v4819_v40, %v4817_v39  ;;  %v995_v39 = vpack.c.bf16 %v4832_v48, %v4830_v47  ;;  %v859_v48 = vld [vmem:[%s4658_s1 + $0x28] sm:$0xff] }
 0x271   : > { %v1169_v6 = vsel %vm1150_vm4, %v4924_v4, -inf  ;;  %v1053_v31 = vsel %vm922_vm1, %v996_v3, 0 }
 0x272   : > { %1161 = vmax.xlane.f32.xlu2 %v1160_v5  ;;  %1170 = vmax.xlane.f32.xlu1 %v1169_v6 }
 0x273   : > { %1067 = vmatpush.bf16.xpose.msrb.mxu1 %v1053_v31 }
 0x276   : > { %v1147_v7 = vpop.f32.mrf.mxu2 }
 0x277   : > { %v4930_v8 = vadd.f32 %v1147_v7, %v4911_v53 }
 0x279   : > { %v1172_v9 = vsel %vm1150_vm4, %v4930_v8, -inf }
 0x27a   : > { %1173 = vmax.xlane.f32.xlu2 %v1172_v9 }
 0x27e   : > { %869 = vperm.xlu0 %4173, %v855_v12   ;;  %v1050_v12 = vsel %vm922_vm1, %v995_v39, 0 }
 0x27f   : > { %1068 = vmatpush.bf16.xpose.msrb.mxu1 %v1050_v12 }
 0x282   : > { %1152 = vmax.xlane.f32.xlu2 %v1151_v14 }
 0x28a   : > { %1155 = vmax.xlane.f32.xlu2 %v1154_v18 }
 0x2d5   : > { %v1165_v19 = vpop.xlane.xlu2 %1164 }
 0x2d6   : > { %v1179_v43 = vsub.f32 %v1141_v57, %v1165_v19  ;;  %v4149_v19 = vld [vmem:[%s4653_s30 + $0x18] sm:$0xff] }
 0x2d7   : > { %4029 = vmatmul.msk.bf16.gmra.mxu1 %vm922_vm1, %v4149_v19 }
 0x2d8   : > { %v1191_v17 = vmul.f32 1.442695, %v1179_v43 }
 0x2dd   : > { %v1159_v20 = vpop.xlane.xlu2 %1158  ;;  %v1168_v52 = vpop.xlane.xlu0 %1167 }
 0x2de   : > { %v1177_v27 = vsub.f32 %v1136_v59, %v1159_v20  ;;  %v1180_v58 = vsub.f32 %v4917_v61, %v1168_v52  ;;  %v993_v20 = vpack.c.bf16 %v4859_v2, %v4857_v1 }
 0x2e0   : > { %v1187_v36 = vmul.f32 1.442695, %v1177_v27  ;;  %v1193_v60 = vmul.f32 1.442695, %v1180_v58  ;;  %v1000_v27 = vld [vmem:[%s6554_s20] sm:$0xff] }
 0x2e5   : > { %v1162_v23 = vpop.xlane.xlu2 %1161 }
 0x2e6   : > { %v1178_v45 = vsub.f32 %v1138_v0, %v1162_v23  ;;  %v1171_v0 = vpop.xlane.xlu1 %1170 }
 0x2e7   : > { %v1181_v5 = vsub.f32 %v4924_v4, %v1171_v0 }
 0x2e8   : > { %v1189_v50 = vmul.f32 1.442695, %v1178_v45  ;;  %v980_v45 = vpop.f32.mrf.mxu1 }
 0x2e9   : > { %v1195_v7 = vmul.f32 1.442695, %v1181_v5 }
 0x2ed   : > { %v1174_v24 = vpop.xlane.xlu2 %1173 }
 0x2ee   : > { %v1182_v40 = vsub.f32 %v4930_v8, %v1174_v24 }
 0x2f5   : > { %v1153_v25 = vpop.xlane.xlu2 %1152 }
 0x2f6   : > { %v1175_v26 = vsub.f32 %v1131_v13, %v1153_v25  ;;  %v1197_v13 = vmul.f32 1.442695, %v1182_v40  ;;  %v4150_v25 = vld [vmem:[%s4669_s2] sm:$0xff] }
 0x2f8   : > { %v1183_v28 = vmul.f32 1.442695, %v1175_v26  ;;  %v870_v26 = vpop.permute.xlu0 %869 }
 0x2f9   : > { %v971_v1 = vadd.f32 %v4894_v32, %v870_v26 }
 0x2fa   : > { %4192 = vpow2.f32 %v1183_v28 }
 0x2fb   : > { %4194 = vpow2.f32 %v1187_v36  ;;  %v4995_v2 = vpack.c.bf16 %v971_v1, %v971_v1 }
 0x2fd   : > { %v1156_v41 = vpop.xlane.xlu2 %1155 }
 0x2fe   : > { %v1176_v42 = vsub.f32 %v1133_v15, %v1156_v41  ;;  %v994_v15 = vpack.c.bf16 %v4845_v56, %v4843_v55  ;;  %v1044_v55 = vsel %vm922_vm1, %v993_v20, 0  ;;  %v992_v56 = vpack.c.bf16 %v4873_v11, %v4871_v10 }
 0x300   : > { %v4942_v44 = vpop.eup %4192  ;;  %v1185_v46 = vmul.f32 1.442695, %v1176_v42  ;;  %v1047_v47 = vsel %vm922_vm1, %v994_v15, 0  ;;  %v1041_v24 = vsel %vm922_vm1, %v992_v56, 0 }
 0x301   : > { %v1199_v49 = vsel %vm1150_vm4, %v4942_v44, 0.0  ;;  %v4949_v54 = vpop.eup %4194  ;;  %1069 = vmatpush.bf16.xpose.msrb.mxu1 %v1047_v47 }
 0x302   : > { %4196 = vpow2.f32 %v1185_v46  ;;  %1200 = vadd.xlane.f32.xlu0 %v1199_v49  ;;  %v1205_v59 = vsel %vm1150_vm4, %v4949_v54, 0.0 }
 0x303   : > { %4198 = vpow2.f32 %v1191_v17 }
 0x304   : > { %4200 = vpow2.f32 %v1189_v50 }
 0x305   : > { %4202 = vpow2.f32 %v1193_v60 }
 0x306   : > { %4204 = vpow2.f32 %v1195_v7 }
 0x307   : > { %4206 = vpow2.f32 %v1197_v13 }
 0x308   : > { %v4951_v57 = vpop.eup %4196 }
 0x309   : > { %v1202_v21 = vsel %vm1150_vm4, %v4951_v57, 0.0  ;;  %v4961_v63 = vpop.eup %4198  ;;  %1070 = vmatpush.bf16.xpose.msrb.mxu1 %v1044_v55 }
 0x30a   : > { %1206 = vadd.xlane.f32.xlu0 %v1205_v59  ;;  %1203 = vadd.xlane.f32.xlu2 %v1202_v21  ;;  %v4963_v61 = vpop.eup %4200  ;;  %v1211_v6 = vsel %vm1150_vm4, %v4961_v63, 0.0 }
 0x30b   : > { %v1208_v30 = vsel %vm1150_vm4, %v4963_v61, 0.0  ;;  %v4203_v9 = vpop.eup %4202 }
 0x30c   : > { %v1214_v4 = vsel %vm1150_vm4, %v4203_v9, 0.0  ;;  %v4205_v14 = vpop.eup %4204 }
 0x30d   : > { %v1217_v18 = vsel %vm1150_vm4, %v4205_v14, 0.0  ;;  %v4207_v8 = vpop.eup %4206 }
 0x30e   : > { %v1220_v23 = vsel %vm1150_vm4, %v4207_v8, 0.0 }
 0x311   : > { %1071 = vmatpush.bf16.xpose.msrb.mxu1 %v1041_v24 }
 0x312   : > { %1212 = vadd.xlane.f32.xlu0 %v1211_v6  ;;  %1209 = vadd.xlane.f32.xlu2 %v1208_v30 }
 0x318   : > { %4038 = vmatmul.msk.bf16.vlgmr.msrb.gmra.mxu1 %vm922_vm1, %v4150_v25 }
 0x31a   : > { %1215 = vadd.xlane.f32.xlu2 %v1214_v4 }
 0x322   : > { %1218 = vadd.xlane.f32.xlu2 %v1217_v18 }
 0x326   : > { %889 = vperm.xlu0 %4173, %v859_v48  }
 0x32a   : > { %1221 = vadd.xlane.f32.xlu2 %v1220_v23 }
 0x342   : > { %1006 = vperm.xlu2 %4174, %v1000_v27  }
 0x348   : > { %1274 = vxpose.xlu0.c.b16.start.end [1/1] (short) (narrow) %v4995_v2, 64 }
 0x354   : > { %v5000_v58 = vpop.f32.mrf.mxu1 }
 0x35c   : > { %v5006_v5 = vpop.f32.mrf.mxu1 }
 0x375   : > { %v1201_v36 = vpop.xlane.xlu0 %1200 }
 0x37d   : > { %v1204_v28 = vpop.xlane.xlu2 %1203  ;;  %v1207_v10 = vpop.xlane.xlu0 %1206 }
 0x385   : > { %v1210_v35 = vpop.xlane.xlu2 %1209  ;;  %v1213_v42 = vpop.xlane.xlu0 %1212 }
 0x38d   : > { %v1216_v37 = vpop.xlane.xlu2 %1215 }
 0x395   : > { %v1219_v11 = vpop.xlane.xlu2 %1218  ;;  %v1073_v12 = vpop.f32.mrf.mxu1 }
 0x396   : > { %4208 = vrcp.f32 %v1219_v11 }
 0x398   : > { %v890_v31 = vpop.permute.xlu0 %889 }
 0x399   : > { %v981_v39 = vadd.f32 %v980_v45, %v890_v31 }
 0x39c   : > { %v4209_v43 = vpop.eup %4208 }
 0x39d   : > { %v1222_v41 = vpop.xlane.xlu2 %1221  ;;  %v1237_v46 = vmul.f32 %v4209_v43, %v4205_v14 }
 0x39e   : > { %4210 = vrcp.f32 %v1222_v41 }
 0x39f   : > { %4212 = vrcp.f32 %v1216_v37 }
 0x3a0   : > { %4214 = vrcp.f32 %v1213_v42 }
 0x3a1   : > { %4216 = vrcp.f32 %v1210_v35 }
 0x3a2   : > { %4218 = vrcp.f32 %v1207_v10 }
 0x3a3   : > { %4220 = vrcp.f32 %v1204_v28 }
 0x3a4   : > { %v4211_v32 = vpop.eup %4210  ;;  %4222 = vrcp.f32 %v1201_v36 }
 0x3a5   : > { %v1238_v49 = vmul.f32 %v4211_v32, %v4207_v8  ;;  %v4213_v16 = vpop.eup %4212  ;;  %v1007_v13 = vpop.permute.xlu2 %1006 }
 0x3a6   : > { %v4215_v50 = vpop.eup %4214  ;;  %v1236_v52 = vmul.f32 %v4213_v16, %v4203_v9  ;;  %v1074_v14 = vadd.f32 %v1073_v12, %v1007_v13 }
 0x3a7   : > { %v1242_v17 = vpack.c.bf16 %v1238_v49, %v1237_v46  ;;  %v1235_v59 = vmul.f32 %v4215_v50, %v4961_v63  ;;  %v4217_v22 = vpop.eup %4216 }
 0x3a8   : > { %v4219_v60 = vpop.eup %4218  ;;  %v1234_v0 = vmul.f32 %v4217_v22, %v4963_v61  ;;  %v5011_v61 = vpack.c.bf16 %v981_v39, %v981_v39  ;;  %v5016_v18 = vpack.c.bf16 %v1074_v14, %v1074_v14 }
 0x3a9   : > { %v1256_v51 = vsel %vm1150_vm4, %v1242_v17, 0  ;;  %v1241_v21 = vpack.c.bf16 %v1236_v52, %v1235_v59  ;;  %v1233_v3 = vmul.f32 %v4219_v60, %v4949_v54  ;;  %v4221_v30 = vpop.eup %4220 }
 0x3aa   : > { %1262 = vmatpush.bf16.xpose.msra.mxu3 %v1256_v51  ;;  %v4223_v7 = vpop.eup %4222  ;;  %v1232_v9 = vmul.f32 %v4221_v30, %v4951_v57  ;;  %v1303_v15 = vsel %vm1117_vm2, %v5011_v61, 0 }
 0x3ab   : > { %v1253_v62 = vsel %vm1150_vm4, %v1241_v21, 0  ;;  %v1240_v6 = vpack.c.bf16 %v1234_v0, %v1233_v3  ;;  %v1231_v40 = vmul.f32 %v4223_v7, %v4942_v44 }
 0x3ad   : > { %v1250_v63 = vsel %vm1150_vm4, %v1240_v6, 0  ;;  %v1239_v4 = vpack.c.bf16 %v1232_v9, %v1231_v40 }
 0x3af   : > { %v1247_v54 = vsel %vm1150_vm4, %v1239_v4, 0 }
 0x3b2   : > { %1263 = vmatpush.bf16.xpose.msra.mxu3 %v1253_v62 }
 0x3ba   : > { %1264 = vmatpush.bf16.xpose.msra.mxu3 %v1250_v63 }
 0x3c2   : > { %1265 = vmatpush.bf16.xpose.msra.mxu3 %v1247_v54 }
 0x3c9   : > { %4044 = vmatmul.msk.bf16.vlgmr.msra.gmra.mxu3 %vm1150_vm4, %v5016_v18 }
 0x3ca   : > { %1312 = vmatpush.bf16.msrb.mxu3 %v1303_v15 }
 0x3f4   : > { %v1282_v57 = vpop.trf.xlu0 }
 0x3f5   : > { %4045 = vmatmul.msk.bf16.vlgmr.msrb.gmra.mxu3 %vm1104_vm3, %v1282_v57 }
 0x404   : > { %v1283_v44 = vpop.trf.xlu0 }
 0x405   : > { %4046 = vmatmul.msk.bf16.gmra.mxu3 %vm1104_vm3, %v1283_v44 }
 0x414   : > { %v1284_v47 = vpop.trf.xlu0 }
 0x415   : > { %4047 = vmatmul.msk.bf16.gmra.mxu3 %vm1104_vm3, %v1284_v47 }
 0x424   : > { %v1285_v48 = vpop.trf.xlu0 }
 0x425   : > { %4048 = vmatmul.msk.bf16.gmra.mxu3 %vm1104_vm3, %v1285_v48 }
 0x44c   : > { %v5024_v8 = vpop.f32.mrf.mxu3 }
 0x454   : > { %v1269_v19 = vpop.f32.mrf.mxu3 }
 0x478   : > { %v1314_v20 = vpop.f32.mrf.mxu3 }
 0x479   : > { %v1315_v35 = vadd.f32 %v1314_v20, %v4911_v53 }
 0x47b   : > { %v1334_v11 = vsel %vm1150_vm4, %v1315_v35, -inf }
 0x480   : > { %v1316_v23 = vpop.f32.mrf.mxu3 }
 0x481   : > { %v1317_v16 = vadd.f32 %v1316_v23, %v4911_v53 }
 0x483   : > { %v1337_v17 = vsel %vm1150_vm4, %v1317_v16, -inf }
 0x488   : > { %v1319_v55 = vpop.f32.mrf.mxu3 }
 0x489   : > { %v1320_v1 = vadd.f32 %v1319_v55, %v4911_v53 }
 0x48b   : > { %v1340_v28 = vsel %vm1150_vm4, %v1320_v1, -inf }
 0x490   : > { %v1321_v56 = vpop.f32.mrf.mxu3 }
 0x491   : > { %v1322_v46 = vadd.f32 %v1321_v56, %v4911_v53 }
 0x493   : > { %v1343_v49 = vsel %vm1150_vm4, %v1322_v46, -inf }
 0x498   : > { %v1324_v24 = vpop.f32.mrf.mxu3 }
 0x499   : > { %v1325_v25 = vadd.f32 %v1324_v24, %v4911_v53 }
 0x49b   : > { %v1346_v26 = vsel %vm1150_vm4, %v1325_v25, -inf }
 0x49c   : > { %1347 = vmax.xlane.f32.xlu1 %v1346_v26 }
 0x4a0   : > { %v1326_v27 = vpop.f32.mrf.mxu3 }
 0x4a1   : > { %v1327_v41 = vadd.f32 %v1326_v27, %v4911_v53 }
 0x4a3   : > { %v1349_v32 = vsel %vm1150_vm4, %v1327_v41, -inf }
 0x4a4   : > { %1341 = vmax.xlane.f32.xlu1 %v1340_v28 }
 0x4a8   : > { %v1329_v36 = vpop.f32.mrf.mxu3 }
 0x4a9   : > { %v1330_v37 = vadd.f32 %v1329_v36, %v4911_v53  ;;  %v856_v36 = vld [vmem:[%s4658_s1 + $0x10] sm:$0xff] }
 0x4ab   : > { %v1352_v10 = vsel %vm1150_vm4, %v1330_v37, -inf }
 0x4ac   : > { %1353 = vmax.xlane.f32.xlu2 %v1352_v10  ;;  %1335 = vmax.xlane.f32.xlu1 %v1334_v11  ;;  %v1001_v10 = vld [vmem:[%s6554_s20 + $0x8] sm:$0xff] }
 0x4b0   : > { %v1331_v42 = vpop.f32.mrf.mxu3 }
 0x4b1   : > { %v1332_v43 = vadd.f32 %v1331_v42, %v4911_v53 }
 0x4b3   : > { %v1355_v45 = vsel %vm1150_vm4, %v1332_v43, -inf }
 0x4b4   : > { %1356 = vmax.xlane.f32.xlu0 %v1355_v45  ;;  %1350 = vmax.xlane.f32.xlu2 %v1349_v32 }
 0x4bc   : > { %1344 = vmax.xlane.f32.xlu2 %v1343_v49 }
 0x4c4   : > { %1338 = vmax.xlane.f32.xlu2 %v1337_v17 }
 0x50f   : > { %v1348_v50 = vpop.xlane.xlu1 %1347 }
 0x510   : > { %v1362_v6 = vsub.f32 %v1325_v25, %v1348_v50 }
 0x512   : > { %v1374_v31 = vmul.f32 1.442695, %v1362_v6 }
 0x517   : > { %v1342_v51 = vpop.xlane.xlu1 %1341 }
 0x518   : > { %v1360_v60 = vsub.f32 %v1320_v1, %v1342_v51 }
 0x51a   : > { %v1370_v62 = vmul.f32 1.442695, %v1360_v60 }
 0x51f   : > { %v1354_v52 = vpop.xlane.xlu2 %1353  ;;  %v1336_v59 = vpop.xlane.xlu1 %1335 }
 0x520   : > { %v1358_v21 = vsub.f32 %v1315_v35, %v1336_v59  ;;  %v1364_v9 = vsub.f32 %v1330_v37, %v1354_v52  ;;  %v860_v37 = vld [vmem:[%s4658_s1 + $0x30] sm:$0xff] }
 0x522   : > { %v1366_v22 = vmul.f32 1.442695, %v1358_v21  ;;  %v1378_v40 = vmul.f32 1.442695, %v1364_v9 }
 0x524   : > { %4224 = vpow2.f32 %v1366_v22 }
 0x525   : > { %4226 = vpow2.f32 %v1370_v62 }
 0x526   : > { %4228 = vpow2.f32 %v1374_v31 }
 0x527   : > { %v1351_v0 = vpop.xlane.xlu2 %1350  ;;  %4230 = vpow2.f32 %v1378_v40  ;;  %v1357_v55 = vpop.xlane.xlu0 %1356 }
 0x528   : > { %v1363_v48 = vsub.f32 %v1327_v41, %v1351_v0  ;;  %v1365_v24 = vsub.f32 %v1332_v43, %v1357_v55 }
 0x52a   : > { %v5042_v3 = vpop.eup %4224  ;;  %v1376_v23 = vmul.f32 1.442695, %v1363_v48  ;;  %v1380_v26 = vmul.f32 1.442695, %v1365_v24 }
 0x52b   : > { %v1382_v30 = vsel %vm1150_vm4, %v5042_v3, 0.0  ;;  %v5046_v63 = vpop.eup %4226 }
 0x52c   : > { %1383 = vadd.xlane.f32.xlu1 %v1382_v30  ;;  %v1388_v39 = vsel %vm1150_vm4, %v5046_v63, 0.0  ;;  %v5050_v13 = vpop.eup %4228 }
 0x52d   : > { %v1394_v15 = vsel %vm1150_vm4, %v5050_v13, 0.0  ;;  %v4231_v44 = vpop.eup %4230 }
 0x52e   : > { %v1400_v20 = vsel %vm1150_vm4, %v4231_v44, 0.0 }
 0x52f   : > { %v1345_v7 = vpop.xlane.xlu2 %1344 }
 0x530   : > { %v1361_v54 = vsub.f32 %v1322_v46, %v1345_v7 }
 0x532   : > { %v1372_v57 = vmul.f32 1.442695, %v1361_v54 }
 0x534   : > { %1389 = vadd.xlane.f32.xlu1 %v1388_v39 }
 0x537   : > { %v1339_v4 = vpop.xlane.xlu2 %1338 }
 0x538   : > { %v1359_v12 = vsub.f32 %v1317_v16, %v1339_v4 }
 0x53a   : > { %v1368_v14 = vmul.f32 1.442695, %v1359_v12 }
 0x53c   : > { %4232 = vpow2.f32 %v1368_v14  ;;  %1395 = vadd.xlane.f32.xlu1 %v1394_v15 }
 0x53d   : > { %4234 = vpow2.f32 %v1372_v57 }
 0x53e   : > { %4236 = vpow2.f32 %v1376_v23 }
 0x53f   : > { %4238 = vpow2.f32 %v1380_v26 }
 0x542   : > { %v5054_v47 = vpop.eup %4232 }
 0x543   : > { %v1385_v19 = vsel %vm1150_vm4, %v5054_v47, 0.0  ;;  %v4235_v56 = vpop.eup %4234 }
 0x544   : > { %1386 = vadd.xlane.f32.xlu2 %v1385_v19  ;;  %1401 = vadd.xlane.f32.xlu1 %v1400_v20  ;;  %v1391_v25 = vsel %vm1150_vm4, %v4235_v56, 0.0  ;;  %v4237_v1 = vpop.eup %4236 }
 0x545   : > { %v1397_v27 = vsel %vm1150_vm4, %v4237_v1, 0.0  ;;  %v4239_v28 = vpop.eup %4238 }
 0x546   : > { %v1403_v35 = vsel %vm1150_vm4, %v4239_v28, 0.0 }
 0x54c   : > { %1392 = vadd.xlane.f32.xlu2 %v1391_v25 }
 0x554   : > { %1398 = vadd.xlane.f32.xlu2 %v1397_v27 }
 0x55c   : > { %1404 = vadd.xlane.f32.xlu2 %v1403_v35 }
 0x55d   : > { %874 = vperm.xlu1 %4175, %v856_v36  }
 0x565   : > { %894 = vperm.xlu1 %4175, %v860_v37  }
 0x574   : > { %1011 = vperm.xlu2 %4174, %v1001_v10  }
 0x59f   : > { %v1384_v11 = vpop.xlane.xlu1 %1383 }
 0x5a7   : > { %v1390_v41 = vpop.xlane.xlu1 %1389 }
 0x5af   : > { %v1396_v43 = vpop.xlane.xlu1 %1395 }
 0x5b7   : > { %v1387_v42 = vpop.xlane.xlu2 %1386  ;;  %v1402_v46 = vpop.xlane.xlu1 %1401 }
 0x5b8   : > { %4240 = vrcp.f32 %v1402_v46 }
 0x5be   : > { %v4241_v51 = vpop.eup %4240 }
 0x5bf   : > { %v1393_v45 = vpop.xlane.xlu2 %1392  ;;  %v1420_v59 = vmul.f32 %v4241_v51, %v4231_v44 }
 0x5c7   : > { %v1399_v32 = vpop.xlane.xlu2 %1398 }
 0x5cf   : > { %v1405_v49 = vpop.xlane.xlu2 %1404  ;;  %v875_v16 = vpop.permute.xlu1 %874 }
 0x5d0   : > { %4242 = vrcp.f32 %v1405_v49  ;;  %v974_v17 = vadd.f32 %v4896_v33, %v875_v16 }
 0x5d1   : > { %4244 = vrcp.f32 %v1399_v32 }
 0x5d2   : > { %v5066_v50 = vpack.c.bf16 %v974_v17, %v974_v17  ;;  %4246 = vrcp.f32 %v1396_v43 }
 0x5d3   : > { %4248 = vrcp.f32 %v1393_v45 }
 0x5d4   : > { %1457 = vxpose.xlu2.c.b16.start.end [1/1] (short) (narrow) %v5066_v50, 64  ;;  %4250 = vrcp.f32 %v1390_v41 }
 0x5d5   : > { %4252 = vrcp.f32 %v1387_v42 }
 0x5d6   : > { %v4243_v52 = vpop.eup %4242  ;;  %4254 = vrcp.f32 %v1384_v11 }
 0x5d7   : > { %v1421_v21 = vmul.f32 %v4243_v52, %v4239_v28  ;;  %v4245_v22 = vpop.eup %4244  ;;  %v895_v54 = vpop.permute.xlu1 %894 }
 0x5d8   : > { %v4247_v62 = vpop.eup %4246  ;;  %v1419_v6 = vmul.f32 %v4245_v22, %v4237_v1  ;;  %v1012_v20 = vpop.permute.xlu2 %1011 }
 0x5d9   : > { %v1425_v60 = vpack.c.bf16 %v1421_v21, %v1420_v59  ;;  %v1418_v33 = vmul.f32 %v4247_v62, %v5050_v13  ;;  %v4249_v31 = vpop.eup %4248  ;;  %v984_v13 = vadd.f32 %v5000_v58, %v895_v54 }
 0x5da   : > { %v4251_v7 = vpop.eup %4250  ;;  %v1417_v39 = vmul.f32 %v4249_v31, %v4235_v56 }
 0x5db   : > { %v1439_v0 = vsel %vm1150_vm4, %v1425_v60, 0  ;;  %v1424_v30 = vpack.c.bf16 %v1419_v6, %v1418_v33  ;;  %v1416_v40 = vmul.f32 %v4251_v7, %v5046_v63  ;;  %v4253_v12 = vpop.eup %4252  ;;  %v5077_v19 = vpack.c.bf16 %v984_v13, %v984_v13  ;;  %v1075_v63 = vpop.f32.mrf.mxu1 }
 0x5dc   : > { %1445 = vmatpush.bf16.xpose.msrb.mxu2 %v1439_v0  ;;  %v4255_v14 = vpop.eup %4254  ;;  %v1415_v57 = vmul.f32 %v4253_v12, %v5054_v47  ;;  %v1076_v56 = vadd.f32 %v1075_v63, %v1012_v20 }
 0x5dd   : > { %v1436_v9 = vsel %vm1150_vm4, %v1424_v30, 0  ;;  %v1423_v4 = vpack.c.bf16 %v1417_v39, %v1416_v40  ;;  %v1414_v44 = vmul.f32 %v4255_v14, %v5042_v3  ;;  %v1486_v55 = vsel %vm1117_vm2, %v5077_v19, 0 }
 0x5de   : > { %v5082_v24 = vpack.c.bf16 %v1076_v56, %v1076_v56 }
 0x5df   : > { %v1433_v15 = vsel %vm1150_vm4, %v1423_v4, 0  ;;  %v1422_v48 = vpack.c.bf16 %v1415_v57, %v1414_v44 }
 0x5e1   : > { %v1430_v23 = vsel %vm1150_vm4, %v1422_v48, 0 }
 0x5e4   : > { %1446 = vmatpush.bf16.xpose.msrb.mxu2 %v1436_v9 }
 0x5ec   : > { %1447 = vmatpush.bf16.xpose.msrb.mxu2 %v1433_v15  ;;  %v4151_v15 = vld [vmem:[%s4669_s2 + $0x8] sm:$0xff]  ;;  %s4542_s2 = smov 64  }
 0x5ed   : > { %4039 = vmatmul.msk.bf16.gmra.mxu1 %vm922_vm1, %v4151_v15 }
 0x5f4   : > { %1448 = vmatpush.bf16.xpose.msrb.mxu2 %v1430_v23 }
 0x5fb   : > { %4049 = vmatmul.msk.bf16.vlgmr.msrb.gmra.mxu2 %vm1150_vm4, %v5082_v24 }
 0x5fc   : > { %1495 = vmatpush.bf16.msra.mxu2 %v1486_v55 }
 0x675   : > { %v1465_v58 = vpop.trf.xlu2 }
 0x676   : > { %4050 = vmatmul.msk.bf16.vlgmr.msra.gmra.mxu2 %vm1104_vm3, %v1465_v58 }
 0x67e   : > { %v5087_v3 = vpop.f32.mrf.mxu2 }
 0x685   : > { %v1466_v47 = vpop.trf.xlu2 }
 0x686   : > { %v1452_v25 = vpop.f32.mrf.mxu2  ;;  %4051 = vmatmul.msk.bf16.gmra.mxu2 %vm1104_vm3, %v1466_v47 }
 0x695   : > { %v1467_v26 = vpop.trf.xlu2 }
 0x696   : > { %4052 = vmatmul.msk.bf16.gmra.mxu2 %vm1104_vm3, %v1467_v26 }
 0x6a5   : > { %v1468_v1 = vpop.trf.xlu2 }
 0x6a6   : > { %4053 = vmatmul.msk.bf16.gmra.mxu2 %vm1104_vm3, %v1468_v1 }
 0x6f9   : > { %v1497_v27 = vpop.f32.mrf.mxu2 }
 0x6fa   : > { %v1498_v62 = vadd.f32 %v1497_v27, %v4911_v53 }
 0x6fc   : > { %v1517_v0 = vsel %vm1150_vm4, %v1498_v62, -inf }
 0x701   : > { %v1499_v28 = vpop.f32.mrf.mxu2 }
 0x702   : > { %v1500_v11 = vadd.f32 %v1499_v28, %v4911_v53 }
 0x704   : > { %v1520_v42 = vsel %vm1150_vm4, %v1500_v11, -inf }
 0x709   : > { %v1502_v35 = vpop.f32.mrf.mxu2 }
 0x70a   : > { %v1503_v22 = vadd.f32 %v1502_v35, %v4911_v53 }
 0x70c   : > { %v1523_v60 = vsel %vm1150_vm4, %v1503_v22, -inf }
 0x711   : > { %v1504_v36 = vpop.f32.mrf.mxu2 }
 0x712   : > { %v1505_v37 = vadd.f32 %v1504_v36, %v4911_v53 }
 0x714   : > { %v1526_v10 = vsel %vm1150_vm4, %v1505_v37, -inf }
 0x715   : > { %1527 = vmax.xlane.f32.xlu0 %v1526_v10 }
 0x719   : > { %v1507_v41 = vpop.f32.mrf.mxu2 }
 0x71a   : > { %v1508_v49 = vadd.f32 %v1507_v41, %v4911_v53 }
 0x71c   : > { %v1529_v52 = vsel %vm1150_vm4, %v1508_v49, -inf }
 0x71d   : > { %1521 = vmax.xlane.f32.xlu0 %v1520_v42 }
 0x721   : > { %v1509_v43 = vpop.f32.mrf.mxu2 }
 0x722   : > { %v1510_v59 = vadd.f32 %v1509_v43, %v4911_v53  ;;  %v1002_v43 = vld [vmem:[%s6554_s20 + $0x10] sm:$0xff] }
 0x724   : > { %v1532_v21 = vsel %vm1150_vm4, %v1510_v59, -inf }
 0x729   : > { %v1512_v45 = vpop.f32.mrf.mxu2 }
 0x72a   : > { %v5097_v32 = vadd.f32 %v1512_v45, %v4911_v53 }
 0x72c   : > { %v1535_v46 = vsel %vm1150_vm4, %v5097_v32, -inf }
 0x72d   : > { %1536 = vmax.xlane.f32.xlu1 %v1535_v46 }
 0x731   : > { %v1514_v16 = vpop.f32.mrf.mxu2 }
 0x732   : > { %v1515_v17 = vadd.f32 %v1514_v16, %v4911_v53 }
 0x734   : > { %v1538_v51 = vsel %vm1150_vm4, %v1515_v17, -inf }
 0x735   : > { %1539 = vmax.xlane.f32.xlu2 %v1538_v51  ;;  %1530 = vmax.xlane.f32.xlu1 %v1529_v52  ;;  %v857_v51 = vld [vmem:[%s4658_s1 + $0x18] sm:$0xff] }
 0x73d   : > { %1533 = vmax.xlane.f32.xlu1 %v1532_v21 }
 0x745   : > { %1524 = vmax.xlane.f32.xlu1 %v1523_v60 }
 0x74d   : > { %1518 = vmax.xlane.f32.xlu1 %v1517_v0 }
 0x788   : > { %v1528_v6 = vpop.xlane.xlu0 %1527 }
 0x789   : > { %v1544_v31 = vsub.f32 %v1505_v37, %v1528_v6 }
 0x78b   : > { %v1555_v9 = vmul.f32 1.442695, %v1544_v31 }
 0x790   : > { %v1522_v33 = vpop.xlane.xlu0 %1521 }
 0x791   : > { %v1542_v30 = vsub.f32 %v1500_v11, %v1522_v33 }
 0x793   : > { %v1551_v7 = vmul.f32 1.442695, %v1542_v30 }
 0x795   : > { %4256 = vpow2.f32 %v1551_v7 }
 0x796   : > { %4258 = vpow2.f32 %v1555_v9 }
 0x79b   : > { %v5111_v39 = vpop.eup %4256 }
 0x79c   : > { %v1568_v40 = vsel %vm1150_vm4, %v5111_v39, 0.0  ;;  %v5115_v12 = vpop.eup %4258 }
 0x79d   : > { %1569 = vadd.xlane.f32.xlu0 %v1568_v40  ;;  %v1574_v54 = vsel %vm1150_vm4, %v5115_v12, 0.0 }
 0x7a0   : > { %v1537_v4 = vpop.xlane.xlu1 %1536 }
 0x7a1   : > { %v1547_v41 = vsub.f32 %v5097_v32, %v1537_v4  ;;  %v861_v32 = vld [vmem:[%s4658_s1 + $0x38] sm:$0xff] }
 0x7a3   : > { %v1561_v45 = vmul.f32 1.442695, %v1547_v41 }
 0x7a5   : > { %1575 = vadd.xlane.f32.xlu0 %v1574_v54 }
 0x7a8   : > { %v1531_v14 = vpop.xlane.xlu1 %1530  ;;  %v1540_v57 = vpop.xlane.xlu2 %1539 }
 0x7a9   : > { %v1548_v48 = vsub.f32 %v1515_v17, %v1540_v57  ;;  %v1545_v36 = vsub.f32 %v1508_v49, %v1531_v14 }
 0x7ab   : > { %v1563_v23 = vmul.f32 1.442695, %v1548_v48  ;;  %v1557_v10 = vmul.f32 1.442695, %v1545_v36 }
 0x7b0   : > { %v1534_v13 = vpop.xlane.xlu1 %1533 }
 0x7b1   : > { %v1546_v44 = vsub.f32 %v1510_v59, %v1534_v13 }
 0x7b3   : > { %v1559_v20 = vmul.f32 1.442695, %v1546_v44 }
 0x7b5   : > { %4260 = vpow2.f32 %v1559_v20 }
 0x7b6   : > { %4262 = vpow2.f32 %v1563_v23 }
 0x7b8   : > { %v1525_v63 = vpop.xlane.xlu1 %1524 }
 0x7b9   : > { %v1543_v26 = vsub.f32 %v1503_v22, %v1525_v63 }
 0x7bb   : > { %v4261_v55 = vpop.eup %4260  ;;  %v1553_v28 = vmul.f32 1.442695, %v1543_v26 }
 0x7bc   : > { %v1580_v56 = vsel %vm1150_vm4, %v4261_v55, 0.0  ;;  %v4263_v47 = vpop.eup %4262 }
 0x7bd   : > { %1581 = vadd.xlane.f32.xlu0 %v1580_v56  ;;  %v1586_v27 = vsel %vm1150_vm4, %v4263_v47, 0.0 }
 0x7c0   : > { %v1519_v58 = vpop.xlane.xlu1 %1518 }
 0x7c1   : > { %v1541_v25 = vsub.f32 %v1498_v62, %v1519_v58 }
 0x7c3   : > { %v1549_v1 = vmul.f32 1.442695, %v1541_v25 }
 0x7c5   : > { %4264 = vpow2.f32 %v1549_v1  ;;  %1587 = vadd.xlane.f32.xlu0 %v1586_v27 }
 0x7c6   : > { %4266 = vpow2.f32 %v1553_v28 }
 0x7c7   : > { %4268 = vpow2.f32 %v1557_v10 }
 0x7c8   : > { %4270 = vpow2.f32 %v1561_v45 }
 0x7cb   : > { %v5123_v35 = vpop.eup %4264 }
 0x7cc   : > { %v1565_v37 = vsel %vm1150_vm4, %v5123_v35, 0.0  ;;  %v4267_v11 = vpop.eup %4266 }
 0x7cd   : > { %1566 = vadd.xlane.f32.xlu1 %v1565_v37  ;;  %v1571_v42 = vsel %vm1150_vm4, %v4267_v11, 0.0  ;;  %v4269_v46 = vpop.eup %4268  ;;  %v1078_v37 = vpop.f32.mrf.mxu1 }
 0x7ce   : > { %v1577_v49 = vsel %vm1150_vm4, %v4269_v46, 0.0  ;;  %v4271_v16 = vpop.eup %4270 }
 0x7cf   : > { %v1583_v17 = vsel %vm1150_vm4, %v4271_v16, 0.0 }
 0x7d5   : > { %1572 = vadd.xlane.f32.xlu1 %v1571_v42 }
 0x7d9   : > { %1016 = vperm.xlu0 %4173, %v1002_v43  }
 0x7dd   : > { %1578 = vadd.xlane.f32.xlu1 %v1577_v49 }
 0x7e5   : > { %1584 = vadd.xlane.f32.xlu1 %v1583_v17 }
 0x7fe   : > { %879 = vperm.xlu1 %4175, %v857_v51  }
 0x806   : > { %899 = vperm.xlu1 %4175, %v861_v32  }
 0x810   : > { %v1570_v52 = vpop.xlane.xlu0 %1569 }
 0x818   : > { %v1576_v21 = vpop.xlane.xlu0 %1575 }
 0x830   : > { %v1582_v60 = vpop.xlane.xlu0 %1581 }
 0x838   : > { %v1588_v0 = vpop.xlane.xlu0 %1587 }
 0x839   : > { %4272 = vrcp.f32 %v1588_v0 }
 0x83f   : > { %v4273_v33 = vpop.eup %4272 }
 0x840   : > { %v1567_v59 = vpop.xlane.xlu1 %1566  ;;  %v1604_v7 = vmul.f32 %v4273_v33, %v4263_v47 }
 0x848   : > { %v1573_v22 = vpop.xlane.xlu1 %1572 }
 0x84b   : > { %v1017_v10 = vpop.permute.xlu0 %1016 }
 0x850   : > { %v1579_v62 = vpop.xlane.xlu1 %1578 }
 0x858   : > { %v1585_v6 = vpop.xlane.xlu1 %1584 }
 0x859   : > { %4274 = vrcp.f32 %v1585_v6 }
 0x85a   : > { %4276 = vrcp.f32 %v1579_v62 }
 0x85b   : > { %4278 = vrcp.f32 %v1582_v60 }
 0x85c   : > { %4280 = vrcp.f32 %v1573_v22 }
 0x85d   : > { %4282 = vrcp.f32 %v1576_v21 }
 0x85e   : > { %4284 = vrcp.f32 %v1567_v59 }
 0x85f   : > { %v4275_v30 = vpop.eup %4274  ;;  %4286 = vrcp.f32 %v1570_v52 }
 0x860   : > { %v1603_v31 = vmul.f32 %v4275_v30, %v4271_v16  ;;  %v4277_v9 = vpop.eup %4276 }
 0x861   : > { %v4279_v4 = vpop.eup %4278  ;;  %v1601_v14 = vmul.f32 %v4277_v9, %v4269_v46 }
 0x862   : > { %v1608_v40 = vpack.c.bf16 %v1604_v7, %v1603_v31  ;;  %v1602_v15 = vmul.f32 %v4279_v4, %v4261_v55  ;;  %v4281_v13 = vpop.eup %4280 }
 0x863   : > { %v4283_v44 = vpop.eup %4282  ;;  %v1599_v20 = vmul.f32 %v4281_v13, %v4267_v11 }
 0x864   : > { %v1622_v54 = vsel %vm1150_vm4, %v1608_v40, 0  ;;  %v1607_v57 = vpack.c.bf16 %v1602_v15, %v1601_v14  ;;  %v1600_v23 = vmul.f32 %v4283_v44, %v5115_v12  ;;  %v4285_v58 = vpop.eup %4284 }
 0x865   : > { %1628 = vmatpush.bf16.xpose.msra.mxu1 %v1622_v54  ;;  %v4287_v25 = vpop.eup %4286  ;;  %v1597_v1 = vmul.f32 %v4285_v58, %v5123_v35  ;;  %v1079_v35 = vadd.f32 %v1078_v37, %v1017_v10 }
 0x866   : > { %v1619_v48 = vsel %vm1150_vm4, %v1607_v57, 0  ;;  %v1606_v56 = vpack.c.bf16 %v1600_v23, %v1599_v20  ;;  %v1598_v27 = vmul.f32 %v4287_v25, %v5111_v39  ;;  %v5154_v39 = vpop.f32.mrf.mxu1 }
 0x867   : > { %v5150_v42 = vpack.c.bf16 %v1079_v35, %v1079_v35 }
 0x868   : > { %v1616_v55 = vsel %vm1150_vm4, %v1606_v56, 0  ;;  %v1605_v36 = vpack.c.bf16 %v1598_v27, %v1597_v1 }
 0x86d   : > { %1629 = vmatpush.bf16.xpose.msra.mxu1 %v1619_v48 }
 0x870   : > { %v880_v63 = vpop.permute.xlu1 %879 }
 0x871   : > { %v976_v47 = vadd.f32 %v4898_v34, %v880_v63  ;;  %v1613_v34 = vsel %vm1150_vm4, %v1605_v36, 0 }
 0x873   : > { %v5138_v26 = vpack.c.bf16 %v976_v47, %v976_v47 }
 0x875   : > { %1630 = vmatpush.bf16.xpose.msra.mxu1 %v1616_v55  ;;  %1640 = vxpose.xlu0.c.b16.start.end [1/1] (short) (narrow) %v5138_v26, 64 }
 0x878   : > { %v900_v28 = vpop.permute.xlu1 %899 }
 0x879   : > { %v986_v12 = vadd.f32 %v5006_v5, %v900_v28 }
 0x87b   : > { %v5145_v11 = vpack.c.bf16 %v986_v12, %v986_v12 }
 0x87d   : > { %1631 = vmatpush.bf16.xpose.msra.mxu1 %v1613_v34  ;;  %v1669_v41 = vsel %vm1117_vm2, %v5145_v11, 0 }
 0x884   : > { %4054 = vmatmul.msk.bf16.vlgmr.msra.gmra.mxu1 %vm1150_vm4, %v5150_v42 }
 0x885   : > { %1678 = vmatpush.bf16.msrb.mxu1 %v1669_v41 }
 0x901   : > { %v5156_v5 = vpop.f32.mrf.mxu1 }
 0x909   : > { %v1635_v43 = vpop.f32.mrf.mxu1 }
 0x921   : > { %v1648_v45 = vpop.trf.xlu0 }
 0x922   : > { %4055 = vmatmul.msk.bf16.vlgmr.msrb.gmra.mxu1 %vm1104_vm3, %v1648_v45 }
 0x931   : > { %v1649_v46 = vpop.trf.xlu0 }
 0x932   : > { %4056 = vmatmul.msk.bf16.gmra.mxu1 %vm1104_vm3, %v1649_v46 }
 0x941   : > { %v1650_v49 = vpop.trf.xlu0 }
 0x942   : > { %4057 = vmatmul.msk.bf16.gmra.mxu1 %vm1104_vm3, %v1650_v49 }
 0x951   : > { %v1651_v16 = vpop.trf.xlu0 }
 0x952   : > { %4058 = vmatmul.msk.bf16.gmra.mxu1 %vm1104_vm3, %v1651_v16 }
 0x99f   : > { %v1680_v17 = vpop.f32.mrf.mxu1 }
 0x9a0   : > { %v1681_v21 = vadd.f32 %v1680_v17, %v4911_v53 }
 0x9a2   : > { %v1700_v60 = vsel %vm1150_vm4, %v1681_v21, -inf }
 0x9a7   : > { %v1682_v51 = vpop.f32.mrf.mxu1 }
 0x9a8   : > { %v1683_v13 = vadd.f32 %v1682_v51, %v4911_v53 }
 0x9aa   : > { %v1703_v44 = vsel %vm1150_vm4, %v1683_v13, -inf }
 0x9af   : > { %v1685_v32 = vpop.f32.mrf.mxu1 }
 0x9b0   : > { %v1686_v52 = vadd.f32 %v1685_v32, %v4911_v53 }
 0x9b2   : > { %v1706_v59 = vsel %vm1150_vm4, %v1686_v52, -inf }
 0x9b3   : > { %1707 = vmax.xlane.f32.xlu2 %v1706_v59 }
 0x9b7   : > { %v1687_v22 = vpop.f32.mrf.mxu1 }
 0x9b8   : > { %v1688_v15 = vadd.f32 %v1687_v22, %v4911_v53 }
 0x9ba   : > { %v1709_v57 = vsel %vm1150_vm4, %v1688_v15, -inf }
 0x9bb   : > { %1701 = vmax.xlane.f32.xlu2 %v1700_v60 }
 0x9bf   : > { %v1690_v62 = vpop.f32.mrf.mxu1 }
 0x9c0   : > { %v1691_v31 = vadd.f32 %v1690_v62, %v4911_v53 }
 0x9c2   : > { %v1712_v4 = vsel %vm1150_vm4, %v1691_v31, -inf }
 0x9c7   : > { %v1692_v0 = vpop.f32.mrf.mxu1 }
 0x9c8   : > { %v1693_v54 = vadd.f32 %v1692_v0, %v4911_v53 }
 0x9ca   : > { %v1715_v14 = vsel %vm1150_vm4, %v1693_v54, -inf }
 0x9cf   : > { %v1695_v6 = vpop.f32.mrf.mxu1 }
 0x9d0   : > { %v1696_v33 = vadd.f32 %v1695_v6, %v4911_v53 }
 0x9d2   : > { %v1718_v30 = vsel %vm1150_vm4, %v1696_v33, -inf }
 0x9d3   : > { %1719 = vmax.xlane.f32.xlu1 %v1718_v30 }
 0x9d7   : > { %v1697_v7 = vpop.f32.mrf.mxu1 }
 0x9d8   : > { %v5170_v9 = vadd.f32 %v1697_v7, %v4911_v53 }
 0x9da   : > { %v1721_v40 = vsel %vm1150_vm4, %v5170_v9, -inf }
 0x9db   : > { %1722 = vmax.xlane.f32.xlu0 %v1721_v40  ;;  %1713 = vmax.xlane.f32.xlu1 %v1712_v4 }
 0x9e3   : > { %1716 = vmax.xlane.f32.xlu1 %v1715_v14 }
 0x9eb   : > { %1710 = vmax.xlane.f32.xlu1 %v1709_v57 }
 0x9f3   : > { %1704 = vmax.xlane.f32.xlu1 %v1703_v44 }
 0xa26   : > { %v1708_v48 = vpop.xlane.xlu2 %1707 }
 0xa27   : > { %v1726_v63 = vsub.f32 %v1686_v52, %v1708_v48 }
 0xa29   : > { %v1736_v58 = vmul.f32 1.442695, %v1726_v63 }
 0xa2e   : > { %v1702_v20 = vpop.xlane.xlu2 %1701 }
 0xa2f   : > { %v1724_v23 = vsub.f32 %v1681_v21, %v1702_v20 }
 0xa31   : > { %v1732_v56 = vmul.f32 1.442695, %v1724_v23 }
 0xa33   : > { %4288 = vpow2.f32 %v1732_v56 }
 0xa34   : > { %4290 = vpow2.f32 %v1736_v58 }
 0xa39   : > { %v5181_v47 = vpop.eup %4288 }
 0xa3a   : > { %v1748_v25 = vsel %vm1150_vm4, %v5181_v47, 0.0  ;;  %v5185_v55 = vpop.eup %4290 }
 0xa3b   : > { %1749 = vadd.xlane.f32.xlu2 %v1748_v25  ;;  %v1754_v53 = vsel %vm1150_vm4, %v5185_v55, 0.0 }
 0xa43   : > { %1755 = vadd.xlane.f32.xlu2 %v1754_v53 }
 0xa46   : > { %v1720_v1 = vpop.xlane.xlu1 %1719 }
 0xa47   : > { %v1730_v12 = vsub.f32 %v1696_v33, %v1720_v1 }
 0xa49   : > { %v1744_v37 = vmul.f32 1.442695, %v1730_v12 }
 0xa4e   : > { %v1714_v27 = vpop.xlane.xlu1 %1713  ;;  %v1723_v22 = vpop.xlane.xlu0 %1722 }
 0xa4f   : > { %v1728_v28 = vsub.f32 %v1691_v31, %v1714_v27  ;;  %v1731_v62 = vsub.f32 %v5170_v9, %v1723_v22  ;;  %v1003_v9 = vld [vmem:[%s6554_s20 + $0x18] sm:$0xff] }
 0xa51   : > { %v1740_v36 = vmul.f32 1.442695, %v1728_v28  ;;  %v1746_v6 = vmul.f32 1.442695, %v1731_v62 }
 0xa53   : > { %4292 = vpow2.f32 %v1740_v36 }
 0xa54   : > { %4294 = vpow2.f32 %v1744_v37 }
 0xa56   : > { %v1717_v10 = vpop.xlane.xlu1 %1716 }
 0xa57   : > { %v1729_v52 = vsub.f32 %v1693_v54, %v1717_v10 }
 0xa59   : > { %v5189_v34 = vpop.eup %4292  ;;  %v1742_v21 = vmul.f32 1.442695, %v1729_v52 }
 0xa5a   : > { %v1760_v41 = vsel %vm1150_vm4, %v5189_v34, 0.0  ;;  %v4295_v43 = vpop.eup %4294 }
 0xa5b   : > { %1761 = vadd.xlane.f32.xlu2 %v1760_v41  ;;  %v1766_v45 = vsel %vm1150_vm4, %v4295_v43, 0.0 }
 0xa5e   : > { %v1711_v35 = vpop.xlane.xlu1 %1710 }
 0xa5f   : > { %v1727_v16 = vsub.f32 %v1688_v15, %v1711_v35 }
 0xa61   : > { %v1738_v51 = vmul.f32 1.442695, %v1727_v16 }
 0xa63   : > { %1767 = vadd.xlane.f32.xlu2 %v1766_v45 }
 0xa66   : > { %v1705_v46 = vpop.xlane.xlu1 %1704 }
 0xa67   : > { %v1725_v49 = vsub.f32 %v1683_v13, %v1705_v46 }
 0xa69   : > { %v1734_v17 = vmul.f32 1.442695, %v1725_v49 }
 0xa6b   : > { %4296 = vpow2.f32 %v1734_v17 }
 0xa6c   : > { %4298 = vpow2.f32 %v1738_v51 }
 0xa6d   : > { %4300 = vpow2.f32 %v1742_v21 }
 0xa6e   : > { %4302 = vpow2.f32 %v1746_v6  ;;  %v4514_v6 = vld [vmem:[%s6553_s4] sm:$0x3] }
 0xa71   : > { %v5194_v32 = vpop.eup %4296 }
 0xa72   : > { %v1751_v59 = vsel %vm1150_vm4, %v5194_v32, 0.0  ;;  %v4299_v60 = vpop.eup %4298 }
 0xa73   : > { %1752 = vadd.xlane.f32.xlu1 %v1751_v59  ;;  %v1757_v0 = vsel %vm1150_vm4, %v4299_v60, 0.0  ;;  %v4301_v33 = vpop.eup %4300 }
 0xa74   : > { %v1763_v30 = vsel %vm1150_vm4, %v4301_v33, 0.0  ;;  %v4303_v31 = vpop.eup %4302 }
 0xa75   : > { %v1769_v7 = vsel %vm1150_vm4, %v4303_v31, 0.0 }
 0xa7b   : > { %1758 = vadd.xlane.f32.xlu1 %v1757_v0  ;;  %1897 = vrot.lane.b32.xlu2 %v4891_v29, %s4542_s2 }
 0xa83   : > { %1764 = vadd.xlane.f32.xlu1 %v1763_v30  ;;  %1917 = vrot.lane.b32.xlu2 %v4900_v38, %s4542_s2 }
 0xa8b   : > { %1770 = vadd.xlane.f32.xlu1 %v1769_v7 }
 0xaa4   : > { %1021 = vperm.xlu1 %4175, %v1003_v9  }
 0xaae   : > { %v1750_v40 = vpop.xlane.xlu2 %1749 }
 0xab6   : > { %v1756_v4 = vpop.xlane.xlu2 %1755 }
 0xace   : > { %v1762_v54 = vpop.xlane.xlu2 %1761 }
 0xad6   : > { %v1768_v14 = vpop.xlane.xlu2 %1767 }
 0xad7   : > { %4304 = vrcp.f32 %v1768_v14 }
 0xadd   : > { %v4305_v38 = vpop.eup %4304 }
 0xade   : > { %v1898_v29 = vpop.permute.xlu2 %1897  ;;  %v1786_v20 = vmul.f32 %v4305_v38, %v4295_v43 }
 0xadf   : > { %1900 = vxpose.xlu1.c.b16.start.end [1/1] (short) (narrow) %v1898_v29, 64 }
 0xae6   : > { %v1753_v15 = vpop.xlane.xlu1 %1752  ;;  %v1918_v16 = vpop.permute.xlu2 %1917 }
 0xae7   : > { %v1932_v52 = vsel %vm1117_vm2, %v1918_v16, 0 }
 0xaee   : > { %v1759_v57 = vpop.xlane.xlu1 %1758 }
 0xaf6   : > { %v1765_v13 = vpop.xlane.xlu1 %1764 }
 0xafe   : > { %v1771_v44 = vpop.xlane.xlu1 %1770 }
 0xaff   : > { %4306 = vrcp.f32 %v1771_v44 }
 0xb00   : > { %4308 = vrcp.f32 %v1765_v13 }
 0xb01   : > { %4310 = vrcp.f32 %v1762_v54 }
 0xb02   : > { %4312 = vrcp.f32 %v1759_v57 }
 0xb03   : > { %4314 = vrcp.f32 %v1756_v4 }
 0xb04   : > { %4316 = vrcp.f32 %v1753_v15 }
 0xb05   : > { %v4307_v48 = vpop.eup %4306  ;;  %4318 = vrcp.f32 %v1750_v40 }
 0xb06   : > { %v1787_v23 = vmul.f32 %v4307_v48, %v4303_v31  ;;  %v4309_v63 = vpop.eup %4308 }
 0xb07   : > { %v4311_v58 = vpop.eup %4310  ;;  %v1785_v53 = vmul.f32 %v4309_v63, %v4301_v33  ;;  %v5228_v33 = vperm.slane %v4514_v6, 1 }
 0xb08   : > { %v1791_v56 = vpack.c.bf16 %v1787_v23, %v1786_v20  ;;  %v1784_v1 = vmul.f32 %v4311_v58, %v5189_v34  ;;  %v4313_v28 = vpop.eup %4312  ;;  %v1820_v23 = vpack.c.bf16 %v5087_v3, %v5024_v8 }
 0xb09   : > { %v4315_v36 = vpop.eup %4314  ;;  %v1783_v37 = vmul.f32 %v4313_v28, %v4299_v60 }
 0xb0a   : > { %v1805_v25 = vsel %vm1150_vm4, %v1791_v56, 0  ;;  %v1790_v27 = vpack.c.bf16 %v1785_v53, %v1784_v1  ;;  %v1782_v10 = vmul.f32 %v4315_v36, %v5185_v55  ;;  %v4317_v35 = vpop.eup %4316 }
 0xb0b   : > { %1811 = vmatpush.bf16.xpose.msra.mxu3 %v1805_v25  ;;  %v4319_v43 = vpop.eup %4318  ;;  %v1781_v46 = vmul.f32 %v4317_v35, %v5194_v32 }
 0xb0c   : > { %v1802_v12 = vsel %vm1150_vm4, %v1790_v27, 0  ;;  %v1789_v41 = vpack.c.bf16 %v1783_v37, %v1782_v10  ;;  %v1780_v34 = vmul.f32 %v4319_v43, %v5181_v47 }
 0xb0e   : > { %v1799_v45 = vsel %vm1150_vm4, %v1789_v41, 0  ;;  %v1788_v49 = vpack.c.bf16 %v1781_v46, %v1780_v34 }
 0xb10   : > { %v1796_v51 = vsel %vm1150_vm4, %v1788_v49, 0 }
 0xb13   : > { %1812 = vmatpush.bf16.xpose.msra.mxu3 %v1802_v12 }
 0xb16   : > { %v1022_v17 = vpop.permute.xlu1 %1021 }
 0xb17   : > { %v1081_v55 = vadd.f32 %v5154_v39, %v1022_v17 }
 0xb19   : > { %v5217_v59 = vpack.c.bf16 %v1081_v55, %v1081_v55 }
 0xb1b   : > { %1813 = vmatpush.bf16.xpose.msra.mxu3 %v1799_v45 }
 0xb23   : > { %1814 = vmatpush.bf16.xpose.msra.mxu3 %v1796_v51 }
 0xb2a   : > { %4059 = vmatmul.msk.bf16.vlgmr.msra.gmra.mxu3 %vm1150_vm4, %v5217_v59 }
 0xb2b   : > { %1941 = vmatpush.bf16.msrb.mxu3 %v1932_v52 }
 0xb8b   : > { %v1908_v32 = vpop.trf.xlu1 }
 0xb8c   : > { %4072 = vmatmul.msk.bf16.vlgmr.msrb.gmra.mxu3 %vm1104_vm3, %v1908_v32 }
 0xb9b   : > { %v1909_v47 = vpop.trf.xlu1 }
 0xb9c   : > { %4073 = vmatmul.msk.bf16.gmra.mxu3 %vm1104_vm3, %v1909_v47 }
 0xbab   : > { %v1910_v21 = vpop.trf.xlu1 }
 0xbac   : > { %4074 = vmatmul.msk.bf16.gmra.mxu3 %vm1104_vm3, %v1910_v21 }
 0xbad   : > { %v1816_v22 = vpop.f32.mrf.mxu3 }
 0xbae   : > { %v1821_v63 = vpack.c.bf16 %v1816_v22, %v5156_v5 }
 0xbb5   : > { %v1818_v60 = vpop.f32.mrf.mxu3 }
 0xbbb   : > { %v1911_v62 = vpop.trf.xlu1 }
 0xbbc   : > { %4075 = vmatmul.msk.bf16.gmra.mxu3 %vm1104_vm3, %v1911_v62 }
 0xc0f   : > { %v1943_v39 = vpop.f32.mrf.mxu3 }
 0xc10   : > { %v1944_v9 = vadd.f32 %v1943_v39, %v5228_v33 }
 0xc12   : > { %v1963_v4 = vsel %vm1150_vm4, %v1944_v9, -inf }
 0xc17   : > { %v1945_v0 = vpop.f32.mrf.mxu3 }
 0xc18   : > { %v1946_v48 = vadd.f32 %v1945_v0, %v5228_v33 }
 0xc1a   : > { %v1966_v20 = vsel %vm1150_vm4, %v1946_v48, -inf }
 0xc1f   : > { %v1948_v30 = vpop.f32.mrf.mxu3 }
 0xc20   : > { %v1949_v31 = vadd.f32 %v1948_v30, %v5228_v33 }
 0xc22   : > { %v1969_v7 = vsel %vm1150_vm4, %v1949_v31, -inf }
 0xc23   : > { %1970 = vmax.xlane.f32.xlu0 %v1969_v7 }
 0xc27   : > { %v1950_v40 = vpop.f32.mrf.mxu3 }
 0xc28   : > { %v1951_v15 = vadd.f32 %v1950_v40, %v5228_v33 }
 0xc2a   : > { %v1972_v38 = vsel %vm1150_vm4, %v1951_v15, -inf }
 0xc2b   : > { %1964 = vmax.xlane.f32.xlu0 %v1963_v4 }
 0xc2f   : > { %v1953_v54 = vpop.f32.mrf.mxu3 }
 0xc30   : > { %v5235_v14 = vadd.f32 %v1953_v54, %v5228_v33 }
 0xc32   : > { %v1975_v29 = vsel %vm1150_vm4, %v5235_v14, -inf }
 0xc33   : > { %1976 = vmax.xlane.f32.xlu2 %v1975_v29  ;;  %v4153_v29 = vld [vmem:[%s4674_s0 + $0x8] sm:$0xff] }
 0xc34   : > { %1872 = vmatpush.bf16.msra.mxu0 %v4153_v29 }
 0xc37   : > { %v1955_v57 = vpop.f32.mrf.mxu3 }
 0xc38   : > { %v1956_v13 = vadd.f32 %v1955_v57, %v5228_v33 }
 0xc3a   : > { %v1978_v44 = vsel %vm1150_vm4, %v1956_v13, -inf }
 0xc3b   : > { %1979 = vmax.xlane.f32.xlu1 %v1978_v44  ;;  %1973 = vmax.xlane.f32.xlu2 %v1972_v38 }
 0xc3f   : > { %v1958_v56 = vpop.f32.mrf.mxu3 }
 0xc40   : > { %v1959_v58 = vadd.f32 %v1958_v56, %v5228_v33 }
 0xc42   : > { %v1981_v25 = vsel %vm1150_vm4, %v1959_v58, -inf }
 0xc43   : > { %1967 = vmax.xlane.f32.xlu2 %v1966_v20 }
 0xc47   : > { %v1960_v53 = vpop.f32.mrf.mxu3 }
 0xc48   : > { %v1961_v1 = vadd.f32 %v1960_v53, %v5228_v33 }
 0xc4a   : > { %v1984_v27 = vsel %vm1150_vm4, %v1961_v1, -inf }
 0xc54   : > { %1826 = vxpose.xlu0.c.b16.start [1/2] (short) (narrow) %v1820_v23, 64 }
 0xc5b   : > { %2277 = vrot.lane.b32.xlu2 %v5066_v50, %s4542_s2 }
 0xc64   : > { %1827 = vxpose.xlu0.c.b16.end [2/2] (short) (narrow) %v1821_v63, 64 }
 0xc84   : > { %1982 = vmax.xlane.f32.xlu2 %v1981_v25 }
 0xc8c   : > { %1985 = vmax.xlane.f32.xlu2 %v1984_v27 }
 0xc96   : > { %v1971_v8 = vpop.xlane.xlu0 %1970 }
 0xc97   : > { %v1989_v35 = vsub.f32 %v1949_v31, %v1971_v8 }
 0xc99   : > { %v1999_v45 = vmul.f32 1.442695, %v1989_v35 }
 0xc9e   : > { %v1965_v3 = vpop.xlane.xlu0 %1964 }
 0xc9f   : > { %v1987_v28 = vsub.f32 %v1944_v9, %v1965_v3 }
 0xca1   : > { %v1995_v36 = vmul.f32 1.442695, %v1987_v28 }
 0xca3   : > { %4320 = vpow2.f32 %v1995_v36 }
 0xca6   : > { %v1977_v50 = vpop.xlane.xlu2 %1976 }
 0xca7   : > { %v1991_v62 = vsub.f32 %v5235_v14, %v1977_v50 }
 0xca9   : > { %v5254_v5 = vpop.eup %4320  ;;  %v2003_v39 = vmul.f32 1.442695, %v1991_v62 }
 0xcaa   : > { %v2011_v12 = vsel %vm1150_vm4, %v5254_v5, 0.0 }
 0xcab   : > { %2012 = vadd.xlane.f32.xlu2 %v2011_v12 }
 0xcae   : > { %v1974_v37 = vpop.xlane.xlu2 %1973  ;;  %v1980_v17 = vpop.xlane.xlu1 %1979 }
 0xcaf   : > { %v1990_v34 = vsub.f32 %v1951_v15, %v1974_v37  ;;  %v1992_v52 = vsub.f32 %v1956_v13, %v1980_v17  ;;  %v4152_v15 = vld [vmem:[%s4674_s0] sm:$0xff] }
 0xcb0   : > { %1873 = vmatpush.bf16.msra.mxu0 %v4152_v15 }
 0xcb1   : > { %v2001_v16 = vmul.f32 1.442695, %v1990_v34  ;;  %v2005_v32 = vmul.f32 1.442695, %v1992_v52 }
 0xcb6   : > { %v1968_v10 = vpop.xlane.xlu2 %1967 }
 0xcb7   : > { %v1988_v41 = vsub.f32 %v1946_v48, %v1968_v10 }
 0xcb9   : > { %v1997_v43 = vmul.f32 1.442695, %v1988_v41 }
 0xcbb   : > { %4322 = vpow2.f32 %v1997_v43 }
 0xcbc   : > { %4324 = vpow2.f32 %v1999_v45 }
 0xcbd   : > { %4326 = vpow2.f32 %v2001_v16 }
 0xcbe   : > { %4328 = vpow2.f32 %v2005_v32  ;;  %v2278_v0 = vpop.permute.xlu2 %2277 }
 0xcbf   : > { %4330 = vpow2.f32 %v2003_v39 }
 0xcc1   : > { %v5258_v46 = vpop.eup %4322 }
 0xcc2   : > { %v2014_v49 = vsel %vm1150_vm4, %v5258_v46, 0.0  ;;  %v5262_v51 = vpop.eup %4324 }
 0xcc3   : > { %2015 = vadd.xlane.f32.xlu2 %v2014_v49  ;;  %v2017_v55 = vsel %vm1150_vm4, %v5262_v51, 0.0  ;;  %v5266_v47 = vpop.eup %4326 }
 0xcc4   : > { %v2020_v21 = vsel %vm1150_vm4, %v5266_v47, 0.0  ;;  %v5270_v22 = vpop.eup %4328 }
 0xcc5   : > { %v2026_v60 = vsel %vm1150_vm4, %v5270_v22, 0.0  ;;  %v5275_v6 = vpop.eup %4330 }
 0xcc6   : > { %v2023_v30 = vsel %vm1150_vm4, %v5275_v6, 0.0 }
 0xccb   : > { %2018 = vadd.xlane.f32.xlu2 %v2017_v55 }
 0xcd3   : > { %2021 = vadd.xlane.f32.xlu2 %v2020_v21 }
 0xcdb   : > { %2027 = vadd.xlane.f32.xlu2 %v2026_v60 }
 0xcf3   : > { %2056 = vrot.lane.b32.xlu2 %v5016_v18, %s4542_s2 }
 0xcf5   : > { %2024 = vadd.xlane.f32.xlu0 %v2023_v30 }
 0xcf7   : > { %v1983_v31 = vpop.xlane.xlu2 %1982 }
 0xcf8   : > { %v1993_v7 = vsub.f32 %v1959_v58, %v1983_v31 }
 0xcfa   : > { %v2007_v9 = vmul.f32 1.442695, %v1993_v7 }
 0xcfb   : > { %2467 = vrot.lane.b32.xlu2 %v5138_v26, %s4542_s2 }
 0xcfc   : > { %4332 = vpow2.f32 %v2007_v9 }
 0xcff   : > { %v1986_v18 = vpop.xlane.xlu2 %1985 }
 0xd00   : > { %v1994_v54 = vsub.f32 %v1961_v1, %v1986_v18 }
 0xd02   : > { %v4333_v40 = vpop.eup %4332  ;;  %v2009_v14 = vmul.f32 1.442695, %v1994_v54 }
 0xd03   : > { %2297 = vrot.lane.b32.xlu2 %v5077_v19, %s4542_s2  ;;  %v2029_v4 = vsel %vm1150_vm4, %v4333_v40, 0.0  ;;  %v1834_v19 = vpop.trf.xlu0 }
 0xd04   : > { %2030 = vadd.xlane.f32.xlu0 %v2029_v4  ;;  %4334 = vpow2.f32 %v2009_v14  ;;  %4068 = vmatmul.msk.bf16.vlgmr.msra.gmra.mxu0 %vm922_vm1, %v1834_v19 }
 0xd0a   : > { %v4335_v57 = vpop.eup %4334 }
 0xd0b   : > { %2107 = vrot.lane.b32.xlu2 %v5011_v61, %s4542_s2  ;;  %v2032_v13 = vsel %vm1150_vm4, %v4335_v57, 0.0 }
 0xd10   : > { %v1835_v38 = vpop.trf.xlu0 }
 0xd14   : > { %4069 = vmatmul.msk.bf16.gmra.mxu0 %vm922_vm1, %v1835_v38 }
 0xd18   : > { %2087 = vrot.lane.b32.xlu0 %v4995_v2, %s4542_s2 }
 0xd1e   : > { %v2013_v26 = vpop.xlane.xlu2 %2012 }
 0xd20   : > { %v1836_v20 = vpop.trf.xlu0 }
 0xd24   : > { %4070 = vmatmul.msk.bf16.gmra.mxu0 %vm922_vm1, %v1836_v20 }
 0xd30   : > { %v1837_v56 = vpop.trf.xlu0 }
 0xd34   : > { %2033 = vadd.xlane.f32.xlu2 %v2032_v13  ;;  %4071 = vmatmul.msk.bf16.gmra.mxu0 %vm922_vm1, %v1837_v56 }
 0xd36   : > { %v2016_v61 = vpop.xlane.xlu2 %2015 }
 0xd3e   : > { %v2019_v44 = vpop.xlane.xlu2 %2018 }
 0xd46   : > { %v2022_v2 = vpop.xlane.xlu2 %2021 }
 0xd4c   : > { %2487 = vrot.lane.b32.xlu2 %v5145_v11, %s4542_s2 }
 0xd4e   : > { %v2028_v48 = vpop.xlane.xlu2 %2027 }
 0xd56   : > { %v2057_v23 = vpop.permute.xlu2 %2056 }
 0xd5e   : > { %v2468_v63 = vpop.permute.xlu2 %2467 }
 0xd5f   : > { %2470 = vxpose.xlu1.c.b16.start.end [1/1] (short) (narrow) %v2468_v63, 64 }
 0xd66   : > { %v2298_v58 = vpop.permute.xlu2 %2297 }
 0xd67   : > { %v2312_v25 = vsel %vm1117_vm2, %v2298_v58, 0 }
 0xd68   : > { %2321 = vmatpush.bf16.msrb.mxu0 %v2312_v25  ;;  %v2025_v53 = vpop.xlane.xlu0 %2024 }
 0xd6e   : > { %v2108_v8 = vpop.permute.xlu2 %2107 }
 0xd6f   : > { %v2122_v31 = vsel %vm1117_vm2, %v2108_v8, 0 }
 0xd77   : > { %v2031_v1 = vpop.xlane.xlu0 %2030 }
 0xd78   : > { %4336 = vrcp.f32 %v2031_v1 }
 0xd7e   : > { %v4337_v3 = vpop.eup %4336 }
 0xd7f   : > { %v2049_v50 = vmul.f32 %v4337_v3, %v4333_v40 }
 0xd81   : > { %v5325_v29 = vpop.f32.mrf.mxu0 }
 0xd8a   : > { %v2088_v27 = vpop.permute.xlu0 %2087 }
 0xd8b   : > { %4176 = vxpose.binary.xlu2.c.b16.start.end [1/2] (short) (narrow) %v2088_v27, %v2278_v0, 64 }
 0xda7   : > { %v2034_v11 = vpop.xlane.xlu2 %2033 }
 0xda8   : > { %4338 = vrcp.f32 %v2034_v11 }
 0xda9   : > { %4340 = vrcp.f32 %v2025_v53 }
 0xdaa   : > { %4342 = vrcp.f32 %v2028_v48 }
 0xdab   : > { %4344 = vrcp.f32 %v2022_v2 }
 0xdac   : > { %4346 = vrcp.f32 %v2019_v44 }
 0xdad   : > { %4348 = vrcp.f32 %v2016_v61 }
 0xdae   : > { %v4339_v28 = vpop.eup %4338  ;;  %4350 = vrcp.f32 %v2013_v26 }
 0xdaf   : > { %v2488_v36 = vpop.permute.xlu2 %2487  ;;  %v2050_v12 = vmul.f32 %v4339_v28, %v4335_v57  ;;  %v4341_v37 = vpop.eup %4340 }
 0xdb0   : > { %v2502_v10 = vsel %vm1117_vm2, %v2488_v36, 0  ;;  %v4343_v35 = vpop.eup %4342  ;;  %v2047_v45 = vmul.f32 %v4341_v37, %v5275_v6  ;;  %v5328_v57 = vpop.f32.mrf.mxu0 }
 0xdb1   : > { %2511 = vmatpush.bf16.msra.mxu1 %v2502_v10  ;;  %v2054_v41 = vpack.c.bf16 %v2050_v12, %v2049_v50  ;;  %v2048_v34 = vmul.f32 %v4343_v35, %v5270_v22  ;;  %v4345_v16 = vpop.eup %4344 }
 0xdb2   : > { %v4347_v17 = vpop.eup %4346  ;;  %v2046_v55 = vmul.f32 %v4345_v16, %v5266_v47 }
 0xdb3   : > { %v2071_v43 = vsel %vm1150_vm4, %v2054_v41, 0  ;;  %v2053_v49 = vpack.c.bf16 %v2048_v34, %v2047_v45  ;;  %v2045_v32 = vmul.f32 %v4347_v17, %v5262_v51  ;;  %v4349_v60 = vpop.eup %4348 }
 0xdb4   : > { %2077 = vmatpush.bf16.xpose.msrb.mxu2 %v2071_v43  ;;  %v4351_v62 = vpop.eup %4350  ;;  %v2044_v0 = vmul.f32 %v4349_v60, %v5258_v46 }
 0xdb5   : > { %v2068_v52 = vsel %vm1150_vm4, %v2053_v49, 0  ;;  %v2052_v21 = vpack.c.bf16 %v2046_v55, %v2045_v32  ;;  %v2043_v22 = vmul.f32 %v4351_v62, %v5254_v5 }
 0xdb7   : > { %v2065_v39 = vsel %vm1150_vm4, %v2052_v21, 0  ;;  %v2051_v6 = vpack.c.bf16 %v2044_v0, %v2043_v22 }
 0xdb8   : > { %v5330_v19 = vpop.f32.mrf.mxu0 }
 0xdb9   : > { %v2062_v30 = vsel %vm1150_vm4, %v2051_v6, 0 }
 0xdbc   : > { %2078 = vmatpush.bf16.xpose.msrb.mxu2 %v2068_v52 }
 0xdc0   : > { %v5332_v13 = vpop.f32.mrf.mxu0 }
 0xdc4   : > { %2079 = vmatpush.bf16.xpose.msrb.mxu2 %v2065_v39 }
 0xdc8   : > { %v5334_v61 = vpop.f32.mrf.mxu0 }
 0xdcc   : > { %2080 = vmatpush.bf16.xpose.msrb.mxu2 %v2062_v30 }
 0xdd0   : > { %v5336_v38 = vpop.f32.mrf.mxu0 }
 0xdd3   : > { %4076 = vmatmul.msk.bf16.vlgmr.msrb.gmra.mxu2 %vm1150_vm4, %v2057_v23 }
 0xdd4   : > { %2131 = vmatpush.bf16.msra.mxu2 %v2122_v31 }
 0xdd8   : > { %v5338_v48 = vpop.f32.mrf.mxu0 }
 0xde0   : > { %v5340_v63 = vpop.f32.mrf.mxu0 }
 0xe0b   : > { %v2478_v51 = vpop.trf.xlu1 }
 0xe0c   : > { %4087 = vmatmul.msk.bf16.vlgmr.msra.gmra.mxu1 %vm1104_vm3, %v2478_v51 }
 0xe1b   : > { %v2479_v47 = vpop.trf.xlu1 }
 0xe1c   : > { %4088 = vmatmul.msk.bf16.gmra.mxu1 %vm1104_vm3, %v2479_v47 }
 0xe2b   : > { %v2480_v7 = vpop.trf.xlu1 }
 0xe2c   : > { %4089 = vmatmul.msk.bf16.gmra.mxu1 %vm1104_vm3, %v2480_v7  ;;  %v4177_v46 = vpop.trf.xlu2 }
 0xe2d   : > { %4082 = vmatmul.msk.bf16.vlgmr.msrb.gmra.mxu0 %vm1104_vm3, %v4177_v46 }
 0xe34   : > { %v4178_v5 = vpop.trf.xlu2 }
 0xe35   : > { %4077 = vmatmul.msk.bf16.vlgmr.msra.gmra.mxu2 %vm1104_vm3, %v4178_v5 }
 0xe3b   : > { %v2481_v9 = vpop.trf.xlu1 }
 0xe3c   : > { %4090 = vmatmul.msk.bf16.gmra.mxu1 %vm1104_vm3, %v2481_v9  ;;  %v4179_v40 = vpop.trf.xlu2 }
 0xe3d   : > { %4083 = vmatmul.msk.bf16.gmra.mxu0 %vm1104_vm3, %v4179_v40 }
 0xe44   : > { %v4180_v4 = vpop.trf.xlu2 }
 0xe45   : > { %4078 = vmatmul.msk.bf16.gmra.mxu2 %vm1104_vm3, %v4180_v4 }
 0xe4c   : > { %v4181_v18 = vpop.trf.xlu2 }
 0xe4d   : > { %4084 = vmatmul.msk.bf16.gmra.mxu0 %vm1104_vm3, %v4181_v18 }
 0xe54   : > { %v4182_v54 = vpop.trf.xlu2 }
 0xe55   : > { %4079 = vmatmul.msk.bf16.gmra.mxu2 %vm1104_vm3, %v4182_v54 }
 0xe56   : > { %v5323_v14 = vpop.f32.mrf.mxu2 }
 0xe5c   : > { %v4183_v26 = vpop.trf.xlu2 }
 0xe5d   : > { %4085 = vmatmul.msk.bf16.gmra.mxu0 %vm1104_vm3, %v4183_v26 }
 0xe5e   : > { %v2084_v15 = vpop.f32.mrf.mxu2 }
 0xe64   : > { %v4184_v62 = vpop.trf.xlu2 }
 0xe65   : > { %4080 = vmatmul.msk.bf16.gmra.mxu2 %vm1104_vm3, %v4184_v62 }
 0xe89   : > { %v2513_v44 = vpop.f32.mrf.mxu1 }
 0xe8a   : > { %v5383_v32 = vadd.f32 %v2513_v44, %v5228_v33 }
 0xe8c   : > { %v2533_v60 = vsel %vm1150_vm4, %v5383_v32, -inf }
 0xe91   : > { %v2515_v2 = vpop.f32.mrf.mxu1 }
 0xe92   : > { %v5348_v1 = vadd.f32 %v2515_v2, %v5228_v33 }
 0xe94   : > { %v2536_v3 = vsel %vm1150_vm4, %v5348_v1, -inf }
 0xe99   : > { %v2518_v20 = vpop.f32.mrf.mxu1 }
 0xe9a   : > { %v5358_v36 = vadd.f32 %v2518_v20, %v5228_v33 }
 0xe9c   : > { %v2539_v41 = vsel %vm1150_vm4, %v5358_v36, -inf }
 0xea1   : > { %v2520_v23 = vpop.f32.mrf.mxu1 }
 0xea2   : > { %v5378_v17 = vadd.f32 %v2520_v23, %v5228_v33 }
 0xea4   : > { %v2542_v55 = vsel %vm1150_vm4, %v5378_v17, -inf }
 0xea9   : > { %v2523_v56 = vpop.f32.mrf.mxu1 }
 0xeaa   : > { %v5343_v58 = vadd.f32 %v2523_v56, %v5228_v33  ;;  %v2323_v25 = vpop.f32.mrf.mxu0 }
 0xeab   : > { %v5368_v35 = vadd.f32 %v2323_v25, %v5228_v33 }
 0xeac   : > { %v2545_v53 = vsel %vm1150_vm4, %v5343_v58, -inf }
 0xead   : > { %2546 = vmax.xlane.f32.xlu1 %v2545_v53  ;;  %v2343_v49 = vsel %vm1150_vm4, %v5368_v35, -inf }
 0xeb1   : > { %v2525_v27 = vpop.f32.mrf.mxu1 }
 0xeb2   : > { %v5351_v8 = vadd.f32 %v2525_v27, %v5228_v33  ;;  %v2325_v11 = vpop.f32.mrf.mxu0 }
 0xeb3   : > { %v5389_v39 = vadd.f32 %v2325_v11, %v5228_v33 }
 0xeb4   : > { %v2548_v28 = vsel %vm1150_vm4, %v5351_v8, -inf }
 0xeb5   : > { %2537 = vmax.xlane.f32.xlu1 %v2536_v3  ;;  %2549 = vmax.xlane.f32.xlu2 %v2548_v28  ;;  %v2346_v6 = vsel %vm1150_vm4, %v5389_v39, -inf }
 0xeb8   : > { %v2133_v15 = vpop.f32.mrf.mxu2 }
 0xeb9   : > { %v2528_v50 = vpop.f32.mrf.mxu1 }
 0xeba   : > { %v5361_v12 = vadd.f32 %v2528_v50, %v5228_v33  ;;  %v2328_v37 = vpop.f32.mrf.mxu0 }
 0xebb   : > { %v2329_v31 = vadd.f32 %v2328_v37, %v5228_v33 }
 0xebc   : > { %v2551_v10 = vsel %vm1150_vm4, %v5361_v12, -inf }
 0xebd   : > { %2552 = vmax.xlane.f32.xlu0 %v2551_v10  ;;  %2540 = vmax.xlane.f32.xlu2 %v2539_v41  ;;  %v2349_v7 = vsel %vm1150_vm4, %v2329_v31, -inf }
 0xec0   : > { %v5417_v20 = vpop.f32.mrf.mxu2 }
 0xec1   : > { %v2530_v43 = vpop.f32.mrf.mxu1 }
 0xec2   : > { %v5371_v45 = vadd.f32 %v2530_v43, %v5228_v33  ;;  %v2330_v34 = vpop.f32.mrf.mxu0 }
 0xec3   : > { %v5403_v5 = vadd.f32 %v2330_v34, %v5228_v33 }
 0xec4   : > { %v2554_v16 = vsel %vm1150_vm4, %v5371_v45, -inf }
 0xec5   : > { %2555 = vmax.xlane.f32.xlu0 %v2554_v16  ;;  %2344 = vmax.xlane.f32.xlu2 %v2343_v49  ;;  %v2352_v9 = vsel %vm1150_vm4, %v5403_v5, -inf }
 0xec8   : > { %v2138_v25 = vpop.f32.mrf.mxu2 }
 0xeca   : > { %v2333_v52 = vpop.f32.mrf.mxu0 }
 0xecb   : > { %v2334_v40 = vadd.f32 %v2333_v52, %v5228_v33 }
 0xecd   : > { %2543 = vmax.xlane.f32.xlu0 %v2542_v55  ;;  %v2355_v4 = vsel %vm1150_vm4, %v2334_v40, -inf }
 0xed0   : > { %v2140_v3 = vpop.f32.mrf.mxu2 }
 0xed2   : > { %v2335_v21 = vpop.f32.mrf.mxu0 }
 0xed3   : > { %v2336_v18 = vadd.f32 %v2335_v21, %v5228_v33 }
 0xed5   : > { %2534 = vmax.xlane.f32.xlu0 %v2533_v60  ;;  %v2358_v54 = vsel %vm1150_vm4, %v2336_v18, -inf }
 0xed8   : > { %v5431_v49 = vpop.f32.mrf.mxu2 }
 0xeda   : > { %v2338_v0 = vpop.f32.mrf.mxu0 }
 0xedb   : > { %v5392_v22 = vadd.f32 %v2338_v0, %v5228_v33 }
 0xedd   : > { %2347 = vmax.xlane.f32.xlu0 %v2346_v6  ;;  %v2361_v30 = vsel %vm1150_vm4, %v5392_v22, -inf  ;;  %v5444_v6 = vadd.f32 %v2138_v25, %v5228_v33 }
 0xede   : > { %2362 = vmax.xlane.f32.xlu2 %v2361_v30 }
 0xee2   : > { %v2340_v51 = vpop.f32.mrf.mxu0 }
 0xee3   : > { %v2341_v47 = vadd.f32 %v2340_v51, %v5228_v33 }
 0xee5   : > { %2350 = vmax.xlane.f32.xlu0 %v2349_v7  ;;  %v2364_v46 = vsel %vm1150_vm4, %v2341_v47, -inf }
 0xee6   : > { %2365 = vmax.xlane.f32.xlu1 %v2364_v46 }
 0xeed   : > { %2353 = vmax.xlane.f32.xlu0 %v2352_v9 }
 0xef5   : > { %2356 = vmax.xlane.f32.xlu0 %v2355_v4 }
 0xefd   : > { %2359 = vmax.xlane.f32.xlu0 %v2358_v54 }
 0xf20   : > { %v5419_v23 = vpop.xlane.xlu1 %2546 }
 0xf28   : > { %v5425_v27 = vpop.xlane.xlu1 %2537  ;;  %v5427_v11 = vpop.xlane.xlu2 %2549 }
 0xf30   : > { %v5411_v26 = vpop.xlane.xlu0 %2552  ;;  %v5429_v34 = vpop.xlane.xlu2 %2540 }
 0xf38   : > { %v5413_v44 = vpop.xlane.xlu0 %2555  ;;  %v5441_v62 = vpop.xlane.xlu2 %2344 }
 0xf40   : > { %v5415_v2 = vpop.xlane.xlu0 %2543 }
 0xf48   : > { %v5421_v56 = vpop.xlane.xlu0 %2534 }
 0xf50   : > { %v5423_v53 = vpop.xlane.xlu0 %2347 }
 0xf51   : > { %v2363_v7 = vpop.xlane.xlu2 %2362 }
 0xf52   : > { %v2373_v25 = vsub.f32 %v5392_v22, %v2363_v7  ;;  %v2563_v22 = vsub.f32 %v5361_v12, %v5411_v26  ;;  %v5479_v12 = vadd.f32 %v2140_v3, %v5228_v33  ;;  %v2368_v7 = vsub.f32 %v5389_v39, %v5423_v53 }
 0xf53   : > { %v2564_v39 = vsub.f32 %v5371_v45, %v5413_v44  ;;  %v2560_v53 = vsub.f32 %v5378_v17, %v5415_v2  ;;  %v5513_v45 = vadd.f32 %v5431_v49, %v5228_v33 }
 0xf55   : > { %v2571_v44 = vmul.f32 1.442695, %v2560_v53 }
 0xf58   : > { %v2351_v28 = vpop.xlane.xlu0 %2350 }
 0xf59   : > { %v2369_v50 = vsub.f32 %v2329_v31, %v2351_v28  ;;  %v2366_v37 = vpop.xlane.xlu1 %2365  ;;  %v2145_v31 = vpop.f32.mrf.mxu2 }
 0xf5a   : > { %v2374_v10 = vsub.f32 %v2341_v47, %v2366_v37  ;;  %v2159_v47 = vsel %vm1150_vm4, %v5444_v6, -inf  ;;  %v5449_v9 = vadd.f32 %v2145_v31, %v5228_v33 }
 0xf5b   : > { %v2379_v41 = vmul.f32 1.442695, %v2369_v50 }
 0xf5c   : > { %v2389_v43 = vmul.f32 1.442695, %v2374_v10  ;;  %v2168_v37 = vsel %vm1150_vm4, %v5449_v9, -inf  ;;  %v2387_v10 = vmul.f32 1.442695, %v2373_v25 }
 0xf5d   : > { %4352 = vpow2.f32 %v2379_v41 }
 0xf5e   : > { %4354 = vpow2.f32 %v2389_v43 }
 0xf60   : > { %v2354_v16 = vpop.xlane.xlu0 %2353 }
 0xf61   : > { %v2148_v54 = vpop.f32.mrf.mxu2 }
 0xf62   : > { %v5459_v41 = vadd.f32 %v2148_v54, %v5228_v33 }
 0xf63   : > { %v5433_v52 = vpop.eup %4352 }
 0xf64   : > { %v5435_v55 = vpop.eup %4354  ;;  %v2397_v21 = vsel %vm1150_vm4, %v5433_v52, 0.0 }
 0xf65   : > { %2398 = vadd.xlane.f32.xlu2 %v2397_v21  ;;  %v2412_v60 = vsel %vm1150_vm4, %v5435_v55, 0.0  ;;  %v2171_v21 = vsel %vm1150_vm4, %v5459_v41, -inf }
 0xf66   : > { %2413 = vadd.xlane.f32.xlu0 %v2412_v60  ;;  %v2370_v60 = vsub.f32 %v5403_v5, %v2354_v16  ;;  %v2561_v5 = vsub.f32 %v5343_v58, %v5419_v23  ;;  %v5495_v58 = vadd.f32 %v5417_v20, %v5228_v33  ;;  %v2377_v23 = vmul.f32 1.442695, %v2368_v7 }
 0xf68   : > { %v2357_v0 = vpop.xlane.xlu0 %2356  ;;  %v2381_v26 = vmul.f32 1.442695, %v2370_v60  ;;  %v2156_v20 = vsel %vm1150_vm4, %v5495_v58, -inf }
 0xf69   : > { %v2371_v30 = vsub.f32 %v2334_v40, %v2357_v0  ;;  %v2150_v31 = vpop.f32.mrf.mxu2 }
 0xf6b   : > { %v2383_v51 = vmul.f32 1.442695, %v2371_v30 }
 0xf6d   : > { %4356 = vpow2.f32 %v2383_v51  ;;  %v5476_v51 = vadd.f32 %v2150_v31, %v5228_v33 }
 0xf6e   : > { %2160 = vmax.xlane.f32.xlu0 %v2159_v47 }
 0xf6f   : > { %v2174_v16 = vsel %vm1150_vm4, %v5476_v51, -inf }
 0xf70   : > { %v2360_v46 = vpop.xlane.xlu0 %2359 }
 0xf71   : > { %v2372_v4 = vsub.f32 %v2336_v18, %v2360_v46  ;;  %v5462_v18 = vadd.f32 %v2133_v15, %v5228_v33  ;;  %v2577_v15 = vmul.f32 1.442695, %v2563_v22  ;;  %v2162_v46 = vsel %vm1150_vm4, %v5479_v12, -inf }
 0xf73   : > { %v5451_v28 = vpop.eup %4356  ;;  %v2385_v50 = vmul.f32 1.442695, %v2372_v4  ;;  %v2153_v0 = vsel %vm1150_vm4, %v5462_v18, -inf  ;;  %v2573_v4 = vmul.f32 1.442695, %v2561_v5 }
 0xf74   : > { %v2403_v40 = vsel %vm1150_vm4, %v5451_v28, 0.0 }
 0xf75   : > { %4358 = vpow2.f32 %v2385_v50  ;;  %2404 = vadd.xlane.f32.xlu1 %v2403_v40 }
 0xf76   : > { %2169 = vmax.xlane.f32.xlu0 %v2168_v37  ;;  %4360 = vpow2.f32 %v2387_v10  ;;  %v2579_v37 = vmul.f32 1.442695, %v2564_v39  ;;  %v2367_v10 = vsub.f32 %v5368_v35, %v5441_v62  ;;  %v2562_v35 = vsub.f32 %v5351_v8, %v5427_v11 }
 0xf77   : > { %4362 = vpow2.f32 %v2577_v15 }
 0xf78   : > { %4364 = vpow2.f32 %v2381_v26  ;;  %v2375_v49 = vmul.f32 1.442695, %v2367_v10  ;;  %v2575_v31 = vmul.f32 1.442695, %v2562_v35  ;;  %v2559_v26 = vsub.f32 %v5358_v36, %v5429_v34 }
 0xf79   : > { %4366 = vpow2.f32 %v2573_v4 }
 0xf7a   : > { %4368 = vpow2.f32 %v2377_v23  ;;  %v2569_v8 = vmul.f32 1.442695, %v2559_v26 }
 0xf7b   : > { %v5464_v43 = vpop.eup %4358  ;;  %4370 = vpow2.f32 %v2579_v37 }
 0xf7c   : > { %v2406_v30 = vsel %vm1150_vm4, %v5464_v43, 0.0  ;;  %v5481_v47 = vpop.eup %4360  ;;  %4372 = vpow2.f32 %v2571_v44 }
 0xf7d   : > { %2154 = vmax.xlane.f32.xlu1 %v2153_v0  ;;  %2407 = vadd.xlane.f32.xlu2 %v2406_v30  ;;  %v2409_v3 = vsel %vm1150_vm4, %v5481_v47, 0.0  ;;  %v5497_v54 = vpop.eup %4362  ;;  %4374 = vpow2.f32 %v2375_v49 }
 0xf7e   : > { %2172 = vmax.xlane.f32.xlu0 %v2171_v21  ;;  %v5499_v25 = vpop.eup %4364  ;;  %v2599_v50 = vsel %vm1150_vm4, %v5497_v54, 0.0  ;;  %v2165_v21 = vsel %vm1150_vm4, %v5513_v45, -inf  ;;  %4376 = vpow2.f32 %v2575_v31 }
 0xf7f   : > { %v2400_v40 = vsel %vm1150_vm4, %v5499_v25, 0.0  ;;  %v5515_v17 = vpop.eup %4366  ;;  %4378 = vpow2.f32 %v2569_v8 }
 0xf80   : > { %v5517_v2 = vpop.eup %4368  ;;  %v2593_v22 = vsel %vm1150_vm4, %v5515_v17, 0.0 }
 0xf81   : > { %v2394_v33 = vsel %vm1150_vm4, %v5517_v2, 0.0  ;;  %v5527_v60 = vpop.eup %4370 }
 0xf82   : > { %v5529_v0 = vpop.eup %4372  ;;  %v2602_v62 = vsel %vm1150_vm4, %v5527_v60, 0.0 }
 0xf83   : > { %v2590_v30 = vsel %vm1150_vm4, %v5529_v0, 0.0  ;;  %v5537_v15 = vpop.eup %4374 }
 0xf84   : > { %v2391_v5 = vsel %vm1150_vm4, %v5537_v15, 0.0  ;;  %v5543_v11 = vpop.eup %4376 }
 0xf85   : > { %2163 = vmax.xlane.f32.xlu1 %v2162_v46  ;;  %2410 = vadd.xlane.f32.xlu2 %v2409_v3  ;;  %v5547_v7 = vpop.eup %4378 }
 0xf86   : > { %2175 = vmax.xlane.f32.xlu0 %v2174_v16  ;;  %v2596_v16 = vsel %vm1150_vm4, %v5543_v11, 0.0  ;;  %v2587_v46 = vsel %vm1150_vm4, %v5547_v7, 0.0 }
 0xf8d   : > { %2600 = vadd.xlane.f32.xlu1 %v2599_v50  ;;  %2157 = vmax.xlane.f32.xlu2 %v2156_v20 }
 0xf8e   : > { %2401 = vadd.xlane.f32.xlu0 %v2400_v40 }
 0xf95   : > { %2594 = vadd.xlane.f32.xlu1 %v2593_v22  ;;  %2166 = vmax.xlane.f32.xlu2 %v2165_v21 }
 0xf96   : > { %2395 = vadd.xlane.f32.xlu0 %v2394_v33 }
 0xf9d   : > { %2603 = vadd.xlane.f32.xlu2 %v2602_v62 }
 0xf9e   : > { %2591 = vadd.xlane.f32.xlu0 %v2590_v30 }
 0xfa5   : > { %2392 = vadd.xlane.f32.xlu2 %v2391_v5 }
 0xfad   : > { %2597 = vadd.xlane.f32.xlu2 %v2596_v16 }
 0xfb5   : > { %2588 = vadd.xlane.f32.xlu2 %v2587_v46 }
 0xfd8   : > { %v2399_v23 = vpop.xlane.xlu2 %2398 }
 0xfd9   : > { %v2414_v3 = vpop.xlane.xlu0 %2413 }
 0xfe1   : > { %v2161_v36 = vpop.xlane.xlu0 %2160 }
 0xfe2   : > { %v2179_v34 = vsub.f32 %v5444_v6, %v2161_v36 }
 0xfe4   : > { %v2189_v4 = vmul.f32 1.442695, %v2179_v34 }
 0xfe6   : > { %4380 = vpow2.f32 %v2189_v4 }
 0xfe8   : > { %v2405_v39 = vpop.xlane.xlu1 %2404 }
 0xfe9   : > { %v2170_v53 = vpop.xlane.xlu0 %2169 }
 0xfea   : > { %v2182_v35 = vsub.f32 %v5449_v9, %v2170_v53 }
 0xfec   : > { %v5552_v50 = vpop.eup %4380  ;;  %v2195_v26 = vmul.f32 1.442695, %v2182_v35 }
 0xfed   : > { %v2207_v20 = vsel %vm1150_vm4, %v5552_v50, 0.0 }
 0xfee   : > { %2208 = vadd.xlane.f32.xlu0 %v2207_v20 }
 0xff0   : > { %v2155_v40 = vpop.xlane.xlu1 %2154  ;;  %v2408_v37 = vpop.xlane.xlu2 %2407 }
 0xff1   : > { %v2177_v44 = vsub.f32 %v5462_v18, %v2155_v40  ;;  %v5557_v10 = vpop.xlane.xlu0 %2172 }
 0xff3   : > { %v2185_v22 = vmul.f32 1.442695, %v2177_v44 }
 0xff5   : > { %4382 = vpow2.f32 %v2185_v22 }
 0xff6   : > { %4384 = vrcp.f32 %v2414_v3 }
 0xff8   : > { %v2164_v6 = vpop.xlane.xlu1 %2163  ;;  %v2411_v21 = vpop.xlane.xlu2 %2410 }
 0xff9   : > { %v2180_v33 = vsub.f32 %v5479_v12, %v2164_v6  ;;  %4386 = vrcp.f32 %v2411_v21  ;;  %v2176_v49 = vpop.xlane.xlu0 %2175 }
 0xffa   : > { %4388 = vrcp.f32 %v2408_v37 }
 0xffb   : > { %v5561_v62 = vpop.eup %4382  ;;  %v2191_v30 = vmul.f32 1.442695, %v2180_v33  ;;  %4390 = vrcp.f32 %v2405_v39  ;;  %v2184_v39 = vsub.f32 %v5476_v51, %v2176_v49  ;;  %v2558_v33 = vsub.f32 %v5348_v1, %v5425_v27 }
 0xffc   : > { %v2201_v18 = vsel %vm1150_vm4, %v5561_v62, 0.0  ;;  %v4385_v31 = vpop.eup %4384 }
 0xffd   : > { %4392 = vpow2.f32 %v2191_v30  ;;  %2202 = vadd.xlane.f32.xlu1 %v2201_v18  ;;  %v2430_v16 = vmul.f32 %v4385_v31, %v5435_v55  ;;  %v2199_v40 = vmul.f32 1.442695, %v2184_v39  ;;  %v2567_v27 = vmul.f32 1.442695, %v2558_v33 }
 0xffe   : > { %4394 = vpow2.f32 %v2195_v26 }
 0xfff   : > { %v4387_v5 = vpop.eup %4386 }
0x1000   : > { %v2158_v8 = vpop.xlane.xlu2 %2157  ;;  %v2429_v12 = vmul.f32 %v4387_v5, %v5481_v47  ;;  %v4389_v46 = vpop.eup %4388 }
0x1001   : > { %v2178_v9 = vsub.f32 %v5495_v58, %v2158_v8  ;;  %v2402_v3 = vpop.xlane.xlu0 %2401  ;;  %v4391_v36 = vpop.eup %4390  ;;  %v2428_v55 = vmul.f32 %v4389_v46, %v5464_v43  ;;  %v2183_v43 = vsub.f32 %v5459_v41, %v5557_v10  ;;  %v2557_v8 = vsub.f32 %v5383_v32, %v5421_v56 }
0x1002   : > { %v2434_v34 = vpack.c.bf16 %v2430_v16, %v2429_v12  ;;  %4396 = vrcp.f32 %v2402_v3  ;;  %v2427_v58 = vmul.f32 %v4391_v36, %v5451_v28  ;;  %v2601_v26 = vpop.xlane.xlu1 %2600 }
0x1003   : > { %v5568_v4 = vpop.eup %4392  ;;  %v2187_v53 = vmul.f32 1.442695, %v2178_v9  ;;  %4398 = vrcp.f32 %v2399_v23  ;;  %v2197_v41 = vmul.f32 1.442695, %v2183_v43  ;;  %v2565_v46 = vmul.f32 1.442695, %v2557_v8 }
0x1004   : > { %v2210_v20 = vsel %vm1150_vm4, %v5568_v4, 0.0  ;;  %v2451_v47 = vsel %vm1150_vm4, %v2434_v34, 0  ;;  %v5576_v37 = vpop.eup %4394  ;;  %v2433_v51 = vpack.c.bf16 %v2428_v55, %v2427_v58 }
0x1005   : > { %4400 = vpow2.f32 %v2187_v53  ;;  %2211 = vadd.xlane.f32.xlu1 %v2210_v20  ;;  %2457 = vmatpush.bf16.xpose.msra.mxu3 %v2451_v47  ;;  %v2216_v28 = vsel %vm1150_vm4, %v5576_v37, 0.0 }
0x1006   : > { %4402 = vpow2.f32 %v2199_v40  ;;  %v2448_v35 = vsel %vm1150_vm4, %v2433_v51, 0 }
0x1008   : > { %v2167_v44 = vpop.xlane.xlu2 %2166  ;;  %v4397_v22 = vpop.eup %4396 }
0x1009   : > { %v2181_v23 = vsub.f32 %v5513_v45, %v2167_v44  ;;  %v4399_v6 = vpop.eup %4398  ;;  %v2426_v45 = vmul.f32 %v4397_v22, %v5499_v25  ;;  %v2396_v25 = vpop.xlane.xlu0 %2395 }
0x100a   : > { %v2425_v1 = vmul.f32 %v4399_v6, %v5433_v52  ;;  %v2595_v34 = vpop.xlane.xlu1 %2594 }
0x100b   : > { %v5579_v21 = vpop.eup %4400  ;;  %v2193_v49 = vmul.f32 1.442695, %v2181_v23 }
0x100c   : > { %v2204_v30 = vsel %vm1150_vm4, %v5579_v21, 0.0  ;;  %v2432_v18 = vpack.c.bf16 %v2426_v45, %v2425_v1  ;;  %v5592_v31 = vpop.eup %4402 }
0x100d   : > { %4404 = vpow2.f32 %v2193_v49  ;;  %2217 = vadd.xlane.f32.xlu1 %v2216_v28  ;;  %2458 = vmatpush.bf16.xpose.msra.mxu3 %v2448_v35  ;;  %v2222_v12 = vsel %vm1150_vm4, %v5592_v31, 0.0 }
0x100e   : > { %2205 = vadd.xlane.f32.xlu2 %v2204_v30  ;;  %4406 = vpow2.f32 %v2567_v27  ;;  %v2445_v52 = vsel %vm1150_vm4, %v2432_v18, 0 }
0x100f   : > { %4408 = vpow2.f32 %v2197_v41 }
0x1010   : > { %v2604_v10 = vpop.xlane.xlu2 %2603 }
0x1011   : > { %4410 = vrcp.f32 %v2604_v10  ;;  %v2592_v33 = vpop.xlane.xlu0 %2591 }
0x1012   : > { %4412 = vrcp.f32 %v2601_v26 }
0x1013   : > { %v5594_v5 = vpop.eup %4404  ;;  %4414 = vrcp.f32 %v2396_v25 }
0x1014   : > { %v2213_v16 = vsel %vm1150_vm4, %v5594_v5, 0.0  ;;  %v5603_v3 = vpop.eup %4406 }
0x1015   : > { %2223 = vadd.xlane.f32.xlu1 %v2222_v12  ;;  %2459 = vmatpush.bf16.xpose.msra.mxu3 %v2445_v52  ;;  %v5605_v32 = vpop.eup %4408  ;;  %v2584_v39 = vsel %vm1150_vm4, %v5603_v3, 0.0  ;;  %v4517_v52 = vld [vmem:[#allocation2 + $0x28] sm:$0xff] }
0x1016   : > { %2214 = vadd.xlane.f32.xlu0 %v2213_v16  ;;  %v2219_v20 = vsel %vm1150_vm4, %v5605_v32, 0.0 }
0x1017   : > { %v4411_v56 = vpop.eup %4410 }
0x1018   : > { %v2393_v9 = vpop.xlane.xlu2 %2392  ;;  %v4413_v36 = vpop.eup %4412  ;;  %v2620_v47 = vmul.f32 %v4411_v56, %v5527_v60 }
0x1019   : > { %4416 = vrcp.f32 %v2393_v9  ;;  %v4415_v53 = vpop.eup %4414  ;;  %v2619_v51 = vmul.f32 %v4413_v36, %v5497_v54  ;;  %v4519_v36 = vld [vmem:[#allocation2 + $0x38] sm:$0xff] }
0x101a   : > { %4418 = vpow2.f32 %v2565_v46  ;;  %v2424_v44 = vmul.f32 %v4415_v53, %v5517_v2 }
0x101b   : > { %4420 = vrcp.f32 %v2595_v34  ;;  %v2624_v6 = vpack.c.bf16 %v2620_v47, %v2619_v51  ;;  %v4521_v47 = vld [vmem:[#allocation2 + $0x30] sm:$0xff] }
0x101d   : > { %2585 = vadd.xlane.f32.xlu1 %v2584_v39  ;;  %v2641_v2 = vsel %vm1150_vm4, %v2624_v6, 0  ;;  %v4520_v39 = vld [vmem:[#allocation2 + $0x20] sm:$0xff] }
0x101e   : > { %2220 = vadd.xlane.f32.xlu0 %v2219_v20 }
0x101f   : > { %v4417_v55 = vpop.eup %4416 }
0x1020   : > { %v2598_v58 = vpop.xlane.xlu2 %2597  ;;  %v2423_v40 = vmul.f32 %v4417_v55, %v5537_v15  ;;  %v5615_v22 = vpop.eup %4418 }
0x1021   : > { %4422 = vrcp.f32 %v2598_v58  ;;  %v4421_v49 = vpop.eup %4420  ;;  %v2581_v60 = vsel %vm1150_vm4, %v5615_v22, 0.0 }
0x1022   : > { %v2431_v23 = vpack.c.bf16 %v2424_v44, %v2423_v40  ;;  %4424 = vrcp.f32 %v2592_v33  ;;  %v2617_v28 = vmul.f32 %v4421_v49, %v5515_v17  ;;  %v5638_v17 = vld [vmem:[%s6555_s6] ss:$0 sm:$0xff] }
0x1023   : > { %v2721_v26 = vadd.f32 %v5638_v17, %v5330_v19  ;;  %v2724_v25 = vadd.f32 %v5638_v17, %v5336_v38  ;;  %v4518_v19 = vld [vmem:[#allocation2 + $0x8] sm:$0xff]  ;;  %v2726_v9 = vadd.f32 %v5638_v17, %v5340_v63  ;;  %v2723_v38 = vadd.f32 %v5638_v17, %v5334_v61 }
0x1024   : > { %v2442_v43 = vsel %vm1150_vm4, %v2431_v23, 0  ;;  %v2725_v20 = vadd.f32 %v5638_v17, %v5338_v48 }
0x1025   : > { %2460 = vmatpush.bf16.xpose.msra.mxu3 %v2442_v43  ;;  %v5656_v16 = vadd.f32 %v4517_v52, %v2724_v25  ;;  %v5668_v34 = vadd.f32 %v4519_v36, %v2726_v9  ;;  %v5670_v53 = vadd.f32 %v4520_v39, %v2723_v38  ;;  %v4522_v39 = vld [vmem:[%s4674_s0 + $0x8] sm:$0xff] }
0x1026   : > { %2436 = vrot.lane.b32.xlu2 %v5150_v42, %s4542_s2  ;;  %2582 = vadd.xlane.f32.xlu0 %v2581_v60  ;;  %v5678_v55 = vadd.f32 %v4521_v47, %v2725_v20  ;;  %v4523_v20 = vld [vmem:[%s4674_s0] sm:$0xff] }
0x1027   : > { %v4423_v54 = vpop.eup %4422  ;;  %v2768_v56 = vsel %vm922_vm1, %v5656_v16, 0.0  ;;  %v2774_v63 = vsel %vm922_vm1, %v5668_v34, 0.0  ;;  %v2765_v61 = vsel %vm922_vm1, %v5670_v53, 0.0 }
0x1028   : > { %v2589_v15 = vpop.xlane.xlu2 %2588  ;;  %v2618_v35 = vmul.f32 %v4423_v54, %v5543_v11  ;;  %v4425_v1 = vpop.eup %4424  ;;  %v2719_v11 = vadd.f32 %v5638_v17, %v5325_v29  ;;  %v2720_v29 = vadd.f32 %v5638_v17, %v5328_v57  ;;  %v2771_v58 = vsel %vm922_vm1, %v5678_v55, 0.0 }
0x1029   : > { %4426 = vrcp.f32 %v2589_v15  ;;  %v2616_v41 = vmul.f32 %v4425_v1, %v5529_v0  ;;  %v4515_v0 = vld [vmem:[#allocation2] sm:$0xff] }
0x102a   : > { %v2623_v30 = vpack.c.bf16 %v2618_v35, %v2617_v28  ;;  %v5658_v46 = vadd.f32 %v4518_v19, %v2720_v29 }
0x102c   : > { %v2638_v45 = vsel %vm1150_vm4, %v2623_v30, 0  ;;  %v2756_v57 = vsel %vm922_vm1, %v5658_v46, 0.0 }
0x102d   : > { %2647 = vmatpush.bf16.xpose.msrb.mxu3 %v2641_v2 }
0x102f   : > { %v4427_v27 = vpop.eup %4426 }
0x1030   : > { %v2615_v42 = vmul.f32 %v4427_v27, %v5547_v7  ;;  %v5642_v7 = vadd.f32 %v4515_v0, %v2719_v11 }
0x1032   : > { %v2622_v10 = vpack.c.bf16 %v2616_v41, %v2615_v42 }
0x1034   : > { %v2635_v18 = vsel %vm1150_vm4, %v2622_v10, 0 }
0x1035   : > { %2648 = vmatpush.bf16.xpose.msrb.mxu3 %v2638_v45 }
0x1036   : > { %2626 = vrot.lane.b32.xlu1 %v5217_v59, %s4542_s2  ;;  %v2753_v59 = vsel %vm922_vm1, %v5642_v7, 0.0 }
0x103a   : > { %2246 = vrot.lane.b32.xlu0 %v5082_v24, %s4542_s2  ;;  %v4516_v24 = vld [vmem:[#allocation2 + $0x10] sm:$0xff] }
0x103b   : > { %v5648_v8 = vadd.f32 %v4516_v24, %v2721_v26 }
0x103d   : > { %2649 = vmatpush.bf16.xpose.msrb.mxu3 %v2635_v18  ;;  %v2759_v12 = vsel %vm922_vm1, %v5648_v8, 0.0 }
0x104f   : > { %2754 = vadd.xlane.f32.xlu2 %v2753_v59 }
0x1057   : > { %2760 = vadd.xlane.f32.xlu2 %v2759_v12  ;;  %v4543_v12 = vmov 32.0  }
0x105f   : > { %2769 = vadd.xlane.f32.xlu2 %v2768_v56 }
0x1060   : > { %2757 = vadd.xlane.f32.xlu1 %v2756_v57 }
0x1061   : > { %v2209_v51 = vpop.xlane.xlu0 %2208 }
0x1067   : > { %2775 = vadd.xlane.f32.xlu2 %v2774_v63 }
0x1068   : > { %2766 = vadd.xlane.f32.xlu1 %v2765_v61 }
0x1070   : > { %v2203_v40 = vpop.xlane.xlu1 %2202  ;;  %2772 = vadd.xlane.f32.xlu1 %v2771_v58 }
0x1078   : > { %v2212_v44 = vpop.xlane.xlu1 %2211 }
0x1080   : > { %v2218_v23 = vpop.xlane.xlu1 %2217 }
0x1081   : > { %v2206_v6 = vpop.xlane.xlu2 %2205 }
0x1088   : > { %v2224_v48 = vpop.xlane.xlu1 %2223 }
0x1089   : > { %v2215_v33 = vpop.xlane.xlu0 %2214  ;;  %v2437_v43 = vpop.permute.xlu2 %2436  ;;  %4428 = vrcp.f32 %v2224_v48 }
0x108a   : > { %4086 = vmatmul.msk.bf16.vlgmr.msra.gmra.mxu3 %vm1150_vm4, %v2437_v43 }
0x108f   : > { %v4429_v2 = vpop.eup %4428 }
0x1090   : > { %v2586_v60 = vpop.xlane.xlu1 %2585  ;;  %v2240_v35 = vmul.f32 %v4429_v2, %v5592_v31 }
0x1091   : > { %v2221_v49 = vpop.xlane.xlu0 %2220 }
0x1092   : > { %4430 = vrcp.f32 %v2221_v49 }
0x1093   : > { %4432 = vrcp.f32 %v2215_v33 }
0x1094   : > { %4434 = vrcp.f32 %v2218_v23 }
0x1095   : > { %4436 = vrcp.f32 %v2586_v60 }
0x1098   : > { %v4431_v54 = vpop.eup %4430 }
0x1099   : > { %v2583_v15 = vpop.xlane.xlu0 %2582  ;;  %v2239_v28 = vmul.f32 %v4431_v54, %v5605_v32  ;;  %v4433_v30 = vpop.eup %4432 }
0x109a   : > { %4438 = vrcp.f32 %v2583_v15  ;;  %v4435_v1 = vpop.eup %4434  ;;  %v2237_v42 = vmul.f32 %v4433_v30, %v5594_v5 }
0x109b   : > { %v2244_v45 = vpack.c.bf16 %v2240_v35, %v2239_v28  ;;  %4440 = vrcp.f32 %v2212_v44  ;;  %v4437_v41 = vpop.eup %4436  ;;  %v2238_v10 = vmul.f32 %v4435_v1, %v5576_v37 }
0x109c   : > { %4442 = vrcp.f32 %v2209_v51  ;;  %v2614_v31 = vmul.f32 %v4437_v41, %v5603_v3 }
0x109d   : > { %v2261_v27 = vsel %vm1150_vm4, %v2244_v45, 0  ;;  %v2243_v11 = vpack.c.bf16 %v2238_v10, %v2237_v42  ;;  %4444 = vrcp.f32 %v2206_v6 }
0x109e   : > { %2267 = vmatpush.bf16.xpose.msrb.mxu2 %v2261_v27  ;;  %4446 = vrcp.f32 %v2203_v40 }
0x109f   : > { %v2258_v24 = vsel %vm1150_vm4, %v2243_v11, 0  ;;  %4448 = vrcp.f32 %v4543_v12 }
0x10a0   : > { %v4439_v18 = vpop.eup %4438 }
0x10a1   : > { %v2613_v32 = vmul.f32 %v4439_v18, %v5615_v22  ;;  %v4441_v0 = vpop.eup %4440  ;;  %v4155_v18 = vld [vmem:[%s4683_s21 + $0x8] sm:$0xff] }
0x10a2   : > { %v4443_v59 = vpop.eup %4442  ;;  %v2236_v5 = vmul.f32 %v4441_v0, %v5568_v4  ;;  %3208 = vmatpush.bf16.msra.mxu0 %v4155_v18  ;;  %v4154_v0 = vld [vmem:[%s4683_s21] sm:$0xff] }
0x10a3   : > { %v2621_v26 = vpack.c.bf16 %v2614_v31, %v2613_v32  ;;  %v2235_v37 = vmul.f32 %v4443_v59, %v5552_v50  ;;  %v4445_v3 = vpop.eup %4444 }
0x10a4   : > { %v4447_v29 = vpop.eup %4446  ;;  %v2234_v4 = vmul.f32 %v4445_v3, %v5579_v21 }
0x10a5   : > { %v2632_v25 = vsel %vm1150_vm4, %v2621_v26, 0  ;;  %v2242_v22 = vpack.c.bf16 %v2236_v5, %v2235_v37  ;;  %v4449_v19 = vpop.eup %4448  ;;  %v2233_v56 = vmul.f32 %v4447_v29, %v5561_v62 }
0x10a6   : > { %2268 = vmatpush.bf16.xpose.msrb.mxu2 %v2258_v24  ;;  %2650 = vmatpush.bf16.xpose.msrb.mxu3 %v2632_v25  ;;  %v2802_v38 = vmul.f32 32.0, %v4449_v19  ;;  %vm2806_vm5 = vweird.f32 %v4449_v19 }
0x10a7   : > { %v2255_v9 = vsel %vm1150_vm4, %v2242_v22, 0  ;;  %v2241_v50 = vpack.c.bf16 %v2234_v4, %v2233_v56  ;;  %3209 = vmatpush.bf16.msra.mxu0 %v4154_v0  ;;  %v5735_v56 = vld [vmem:[%s742_s28] ss:$0 sm:$0xff] }
0x10a8   : > { %v2627_v52 = vpop.permute.xlu1 %2626  ;;  %v2803_v57 = vsub.f32 1.0, %v2802_v38 }
0x10a9   : > { %v2252_v36 = vsel %vm1150_vm4, %v2241_v50, 0 }
0x10aa   : > { %v2804_v63 = vmul.f32 %v4449_v19, %v2803_v57 }
0x10ac   : > { %v2247_v61 = vpop.permute.xlu0 %2246  ;;  %v2805_v47 = vadd.f32 %v4449_v19, %v2804_v63 }
0x10ad   : > { %4091 = vmatmul.msk.bf16.vlgmr.msrb.gmra.mxu3 %vm1150_vm4, %v2627_v52 }
0x10ae   : > { %2269 = vmatpush.bf16.xpose.msrb.mxu2 %v2255_v9  ;;  %v5702_v21 = vsel %vm2806_vm5, %v4449_v19, %v2805_v47  ;;  %4160 = vmatpush.bf16.msra.mxu3 %v4155_v18  ;;  %v4526_v18 = vld [vmem:[#allocation2 + $0x48] sm:$0xff] }
0x10b2   : > { %4161 = vmatpush.bf16.msra.mxu3 %v4154_v0 }
0x10b6   : > { %2270 = vmatpush.bf16.xpose.msrb.mxu2 %v2252_v36  ;;  %v5742_v36 = vld [vmem:[%s745_s19] ss:$0 sm:$0xff]  ;;  %s6556_s19 = scalar_lea.vmem %s6516_s10, %s4646_s26  ;;  %s6558_s26 = sld [smem:[#allocation4_spill]] }
0x10bc   : > { %p4136_p5 = scmp.ne.s32.totalorder %s6558_s26, 1 }
0x10bd   : > { %4081 = vmatmul.msk.bf16.vlgmr.msrb.gmra.mxu2 %vm1150_vm4, %v2247_v61  ;;  %s6559_s9 = sld [smem:[#allocation15_spill]] (!%p4136_p5) }
0x10be   : > { %2692 = vmatpush.bf16.msra.mxu2 %v4522_v39 }
0x10c2   : > { %2693 = vmatpush.bf16.msra.mxu2 %v4523_v20  ;;  %v2755_v58 = vpop.xlane.xlu2 %2754 }
0x10c3   : > { %v2808_v62 = vmul.f32 %v5702_v21, %v2755_v58 }
0x10c5   : > { %v2824_v40 = vsub.f32 %v5642_v7, %v2808_v62  ;;  %v2722_v62 = vadd.f32 %v5638_v17, %v5332_v13 }
0x10c7   : > { %v2840_v44 = vmul.f32 %v2824_v40, %v2824_v40 }
0x10c9   : > { %v2856_v51 = vsel %vm922_vm1, %v2840_v44, 0.0 }
0x10ca   : > { %2857 = vadd.xlane.f32.xlu1 %v2856_v51  ;;  %v2761_v23 = vpop.xlane.xlu2 %2760 }
0x10cb   : > { %v2810_v6 = vmul.f32 %v5702_v21, %v2761_v23 }
0x10cd   : > { %v5709_v33 = vsub.f32 %v5648_v8, %v2810_v6 }
0x10cf   : > { %v2842_v43 = vmul.f32 %v5709_v33, %v5709_v33 }
0x10d1   : > { %v2862_v48 = vsel %vm922_vm1, %v2842_v43, 0.0 }
0x10d2   : > { %2863 = vadd.xlane.f32.xlu1 %v2862_v48  ;;  %v5721_v1 = vpop.xlane.xlu2 %2769 }
0x10d3   : > { %v2758_v49 = vpop.xlane.xlu1 %2757 }
0x10d4   : > { %v2809_v60 = vmul.f32 %v5702_v21, %v2758_v49 }
0x10d6   : > { %v2825_v7 = vsub.f32 %v5658_v46, %v2809_v60 }
0x10d8   : > { %v2841_v2 = vmul.f32 %v2825_v7, %v2825_v7 }
0x10da   : > { %v2859_v54 = vsel %vm922_vm1, %v2841_v2, 0.0  ;;  %v5726_v11 = vpop.xlane.xlu2 %2775 }
0x10db   : > { %2860 = vadd.xlane.f32.xlu2 %v2859_v54  ;;  %v5717_v8 = vpop.xlane.xlu1 %2766 }
0x10e3   : > { %v5719_v30 = vpop.xlane.xlu1 %2772 }
0x110d   : > { %v2462_v15 = vpop.f32.mrf.mxu3 }
0x1115   : > { %v2464_v28 = vpop.f32.mrf.mxu3 }
0x1130   : > { %v2652_v35 = vpop.f32.mrf.mxu3 }
0x1131   : > { %v2657_v5 = vpack.c.bf16 %v2652_v35, %v2462_v15  ;;  %v2812_v15 = vmul.f32 %v5702_v21, %v5717_v8  ;;  %v4525_v35 = vld [vmem:[#allocation2 + $0x40] sm:$0xff] }
0x1138   : > { %v2654_v45 = vpop.f32.mrf.mxu3 }
0x113d   : > { %v2858_v27 = vpop.xlane.xlu1 %2857 }
0x113e   : > { %v2904_v42 = vmul.f32 %v2858_v27, %v5702_v21  ;;  %v5774_v27 = vsub.f32 %v5670_v53, %v2812_v15 }
0x1140   : > { %v2920_v46 = vadd.f32 1e-05, %v2904_v42  ;;  %v2272_v41 = vpop.f32.mrf.mxu2  ;;  %v2844_v8 = vmul.f32 %v5774_v27, %v5774_v27 }
0x1141   : > { %v2656_v10 = vpack.c.bf16 %v2272_v41, %v5323_v14  ;;  %v2813_v41 = vmul.f32 %v5702_v21, %v5721_v1  ;;  %v2814_v1 = vmul.f32 %v5702_v21, %v5719_v30  ;;  %v2815_v30 = vmul.f32 %v5702_v21, %v5726_v11 }
0x1142   : > { %4450 = vrsqrt.f32 %v2920_v46  ;;  %vm2942_vm7 = vweird.f32 %v2920_v46  ;;  %v2868_v0 = vsel %vm922_vm1, %v2844_v8, 0.0 }
0x1143   : > { %2658 = vxpose.xlu0.c.b16.start [1/2] (short) (narrow) %v2656_v10, 64 }
0x1148   : > { %v4451_v32 = vpop.eup %4450  ;;  %v2274_v31 = vpop.f32.mrf.mxu2 }
0x1149   : > { %v2937_v26 = vmul.f32 %v4451_v32, %v2920_v46  ;;  %vm2943_vm6 = vweird.f32 %v4451_v32  ;;  %v5786_v31 = vsub.f32 %v5656_v16, %v2813_v41  ;;  %v5799_v16 = vsub.f32 %v5678_v55, %v2814_v1 }
0x114a   : > { %vm2944_vm8 = vmor %vm2942_vm7, %vm2943_vm6  ;;  %v5812_v55 = vsub.f32 %v5668_v34, %v2815_v30 }
0x114b   : > { %v2938_v59 = vmul.f32 %v4451_v32, %v2937_v26 }
0x114d   : > { %v2939_v14 = vmul.f32 0.5, %v2938_v59 }
0x114e   : > { %v2861_v24 = vpop.xlane.xlu2 %2860 }
0x114f   : > { %v2905_v25 = vmul.f32 %v2861_v24, %v5702_v21  ;;  %v2940_v12 = vsub.f32 1.5, %v2939_v14  ;;  %v2845_v24 = vmul.f32 %v5786_v31, %v5786_v31 }
0x1151   : > { %v2921_v37 = vadd.f32 1e-05, %v2905_v25  ;;  %v2941_v3 = vmul.f32 %v4451_v32, %v2940_v12  ;;  %v4527_v25 = vld [vmem:[#allocation2 + $0x50] sm:$0xff]  ;;  %v2871_v14 = vsel %vm922_vm1, %v2845_v24, 0.0 }
0x1153   : > { %4452 = vrsqrt.f32 %v2921_v37  ;;  %2659 = vxpose.xlu0.c.b16.end [2/2] (short) (narrow) %v2657_v5, 64  ;;  %v2945_v19 = vsel %vm2944_vm8, %v4451_v32, %v2941_v3  ;;  %vm2952_vm10 = vweird.f32 %v2921_v37  ;;  %v2846_v3 = vmul.f32 %v5799_v16, %v5799_v16 }
0x1154   : > { %v3096_v38 = vmul.f32 %v2945_v19, %v2824_v40  ;;  %v4524_v40 = vld [vmem:[#allocation2 + $0x18] sm:$0xff] }
0x1155   : > { %v2738_v44 = vadd.f32 %v4524_v40, %v2722_v62  ;;  %v2874_v19 = vsel %vm922_vm1, %v2846_v3, 0.0 }
0x1156   : > { %v3115_v39 = vmul.f32 %v5735_v56, %v3096_v38  ;;  %v2847_v38 = vmul.f32 %v5812_v55, %v5812_v55 }
0x1157   : > { %v2762_v51 = vsel %vm922_vm1, %v2738_v44, 0.0 }
0x1158   : > { %v5747_v61 = vadd.f32 %v5742_v36, %v3115_v39  ;;  %v2877_v39 = vsel %vm922_vm1, %v2847_v38, 0.0 }
0x1159   : > { %v4453_v22 = vpop.eup %4452 }
0x115a   : > { %v2947_v29 = vmul.f32 %v4453_v22, %v2921_v37  ;;  %vm2953_vm9 = vweird.f32 %v4453_v22 }
0x115b   : > { %vm2954_vm11 = vmor %vm2952_vm10, %vm2953_vm9 }
0x115c   : > { %v2948_v52 = vmul.f32 %v4453_v22, %v2947_v29  ;;  %v4528_v29 = vld [vmem:[#allocation2 + $0x58] sm:$0xff] }
0x115e   : > { %v2949_v9 = vmul.f32 0.5, %v2948_v52 }
0x1160   : > { %v2950_v4 = vsub.f32 1.5, %v2949_v9 }
0x1162   : > { %v2951_v50 = vmul.f32 %v4453_v22, %v2950_v4 }
0x1164   : > { %v2955_v57 = vsel %vm2954_vm11, %v4453_v22, %v2951_v50  ;;  %v4529_v50 = vld [vmem:[#allocation2 + $0x60] sm:$0xff] }
0x1165   : > { %v3097_v63 = vmul.f32 %v2955_v57, %v2825_v7 }
0x1167   : > { %v3116_v20 = vmul.f32 %v5735_v56, %v3097_v63 }
0x1169   : > { %v5750_v47 = vadd.f32 %v5742_v36, %v3116_v20 }
0x116b   : > { %v3150_v58 = vpack.c.bf16 %v5750_v47, %v5747_v61 }
0x116d   : > { %4104 = vmatmul.msk.bf16.vlgmr.msra.gmra.mxu0 %vm922_vm1, %v3150_v58  ;;  %v4530_v58 = vld [vmem:[#allocation2 + $0x68] sm:$0xff] }
0x11e4   : > { %2763 = vadd.xlane.f32.xlu0 %v2762_v51 }
0x11ef   : > { %v2666_v23 = vpop.trf.xlu0 }
0x11f0   : > { %4092 = vmatmul.msk.bf16.vlgmr.msra.gmra.mxu2 %vm922_vm1, %v2666_v23 }
0x11ff   : > { %v2667_v6 = vpop.trf.xlu0 }
0x1200   : > { %4093 = vmatmul.msk.bf16.gmra.mxu2 %vm922_vm1, %v2667_v6 }
0x120f   : > { %v2668_v43 = vpop.trf.xlu0 }
0x1210   : > { %4094 = vmatmul.msk.bf16.gmra.mxu2 %vm922_vm1, %v2668_v43 }
0x121f   : > { %v2669_v48 = vpop.trf.xlu0 }
0x1220   : > { %4095 = vmatmul.msk.bf16.gmra.mxu2 %vm922_vm1, %v2669_v48 }
0x1257   : > { %v2764_v49 = vpop.xlane.xlu0 %2763 }
0x1258   : > { %v2811_v13 = vmul.f32 %v5702_v21, %v2764_v49 }
0x125a   : > { %v5763_v60 = vsub.f32 %v2738_v44, %v2811_v13  ;;  %v2864_v44 = vpop.xlane.xlu1 %2863 }
0x125b   : > { %v2906_v51 = vmul.f32 %v2864_v44, %v5702_v21 }
0x125c   : > { %v2843_v7 = vmul.f32 %v5763_v60, %v5763_v60 }
0x125d   : > { %v2922_v23 = vadd.f32 1e-05, %v2906_v51 }
0x125e   : > { %v2865_v2 = vsel %vm922_vm1, %v2843_v7, 0.0 }
0x125f   : > { %2866 = vadd.xlane.f32.xlu2 %v2865_v2  ;;  %4454 = vrsqrt.f32 %v2922_v23  ;;  %vm2962_vm13 = vweird.f32 %v2922_v23 }
0x1265   : > { %v4455_v6 = vpop.eup %4454 }
0x1266   : > { %v2957_v43 = vmul.f32 %v4455_v6, %v2922_v23  ;;  %vm2963_vm12 = vweird.f32 %v4455_v6  ;;  %v4158_v23 = vld [vmem:[%s4692_s23 + $0x10] sm:$0xff] }
0x1267   : > { %vm2964_vm14 = vmor %vm2962_vm13, %vm2963_vm12 }
0x1268   : > { %v2958_v48 = vmul.f32 %v4455_v6, %v2957_v43 }
0x126a   : > { %v2959_v2 = vmul.f32 0.5, %v2958_v48 }
0x1273   : > { %v2695_v54 = vpop.f32.mrf.mxu2 }
0x1274   : > { %v2727_v28 = vadd.f32 %v5638_v17, %v2695_v54  ;;  %v2960_v54 = vsub.f32 1.5, %v2959_v2 }
0x1276   : > { %v5771_v45 = vadd.f32 %v4525_v35, %v2727_v28  ;;  %v2961_v28 = vmul.f32 %v4455_v6, %v2960_v54  ;;  %v4157_v54 = vld [vmem:[%s4692_s23 + $0x8] sm:$0xff] }
0x1278   : > { %v2777_v42 = vsel %vm922_vm1, %v5771_v45, 0.0 }
0x1279   : > { %2778 = vadd.xlane.f32.xlu1 %v2777_v42 }
0x127b   : > { %v2697_v46 = vpop.f32.mrf.mxu2 }
0x127c   : > { %v2728_v10 = vadd.f32 %v5638_v17, %v2697_v46  ;;  %v2965_v46 = vsel %vm2964_vm14, %v4455_v6, %v2961_v28 }
0x127d   : > { %v3098_v8 = vmul.f32 %v2965_v46, %v5709_v33 }
0x127e   : > { %v5783_v32 = vadd.f32 %v4526_v18, %v2728_v10 }
0x1280   : > { %v2780_v53 = vsel %vm922_vm1, %v5783_v32, 0.0 }
0x1281   : > { %2781 = vadd.xlane.f32.xlu2 %v2780_v53  ;;  %2869 = vadd.xlane.f32.xlu1 %v2868_v0 }
0x1283   : > { %v2700_v26 = vpop.f32.mrf.mxu2 }
0x1284   : > { %v2729_v59 = vadd.f32 %v5638_v17, %v2700_v26  ;;  %v3117_v26 = vmul.f32 %v5735_v56, %v3098_v8  ;;  %v4156_v8 = vld [vmem:[%s4692_s23] sm:$0xff] }
0x1286   : > { %v5796_v5 = vadd.f32 %v4527_v25, %v2729_v59  ;;  %v5838_v25 = vadd.f32 %v5742_v36, %v3117_v26 }
0x1288   : > { %v2783_v37 = vsel %vm922_vm1, %v5796_v5, 0.0 }
0x1289   : > { %2784 = vadd.xlane.f32.xlu1 %v2783_v37  ;;  %2872 = vadd.xlane.f32.xlu2 %v2871_v14 }
0x128b   : > { %v2702_v12 = vpop.f32.mrf.mxu2 }
0x128c   : > { %v2730_v22 = vadd.f32 %v5638_v17, %v2702_v12 }
0x128e   : > { %v5809_v52 = vadd.f32 %v4528_v29, %v2730_v22 }
0x1290   : > { %v2786_v9 = vsel %vm922_vm1, %v5809_v52, 0.0 }
0x1291   : > { %2875 = vadd.xlane.f32.xlu1 %v2874_v19  ;;  %2787 = vadd.xlane.f32.xlu2 %v2786_v9 }
0x1293   : > { %v2705_v4 = vpop.f32.mrf.mxu2 }
0x1294   : > { %v2731_v11 = vadd.f32 %v5638_v17, %v2705_v4 }
0x1296   : > { %v5820_v57 = vadd.f32 %v4529_v50, %v2731_v11  ;;  %v4531_v11 = vld [vmem:[#allocation2 + $0x70] sm:$0xff] }
0x1298   : > { %v2789_v34 = vsel %vm922_vm1, %v5820_v57, 0.0 }
0x1299   : > { %2790 = vadd.xlane.f32.xlu1 %v2789_v34  ;;  %2878 = vadd.xlane.f32.xlu2 %v2877_v39  ;;  %v4159_v39 = vld [vmem:[%s4692_s23 + $0x18] sm:$0xff] }
0x129a   : > { %3339 = vmatpush.bf16.msrb.mxu0 %v4159_v39 }
0x129b   : > { %v2707_v63 = vpop.f32.mrf.mxu2 }
0x129c   : > { %v2732_v20 = vadd.f32 %v5638_v17, %v2707_v63 }
0x129e   : > { %v5826_v62 = vadd.f32 %v4530_v58, %v2732_v20  ;;  %3340 = vmatpush.bf16.msrb.mxu0 %v4158_v23 }
0x12a0   : > { %v2792_v40 = vsel %vm922_vm1, %v5826_v62, 0.0 }
0x12a1   : > { %2793 = vadd.xlane.f32.xlu2 %v2792_v40 }
0x12a2   : > { %3341 = vmatpush.bf16.msrb.mxu0 %v4157_v54 }
0x12a3   : > { %v2710_v33 = vpop.f32.mrf.mxu2 }
0x12a4   : > { %v2733_v22 = vadd.f32 %v5638_v17, %v2710_v33 }
0x12a6   : > { %v5858_v38 = vadd.f32 %v4531_v11, %v2733_v22  ;;  %3342 = vmatpush.bf16.msrb.mxu0 %v4156_v8 }
0x12a8   : > { %v2795_v63 = vsel %vm922_vm1, %v5858_v38, 0.0 }
0x12ab   : > { %v2712_v50 = vpop.f32.mrf.mxu2 }
0x12ac   : > { %v2734_v58 = vadd.f32 %v5638_v17, %v2712_v50 }
0x12d2   : > { %v2867_v49 = vpop.xlane.xlu2 %2866 }
0x12d3   : > { %v2907_v13 = vmul.f32 %v2867_v49, %v5702_v21  ;;  %v4532_v49 = vld [vmem:[#allocation2 + $0x78] sm:$0xff] }
0x12d5   : > { %v2923_v7 = vadd.f32 1e-05, %v2907_v13  ;;  %v5873_v13 = vadd.f32 %v4532_v49, %v2734_v58 }
0x12d7   : > { %4456 = vrsqrt.f32 %v2923_v7  ;;  %vm2972_vm0 = vweird.f32 %v2923_v7  ;;  %v2798_v28 = vsel %vm922_vm1, %v5873_v13, 0.0 }
0x12dd   : > { %v4457_v15 = vpop.eup %4456 }
0x12de   : > { %v2967_v35 = vmul.f32 %v4457_v15, %v2923_v7  ;;  %vm2973_vm15 = vweird.f32 %v4457_v15 }
0x12df   : > { %vm2974_vm2 = vmor %vm2972_vm0, %vm2973_vm15 }
0x12e0   : > { %v2968_v42 = vmul.f32 %v4457_v15, %v2967_v35 }
0x12e2   : > { %v2969_v41 = vmul.f32 0.5, %v2968_v42 }
0x12e4   : > { %v2970_v10 = vsub.f32 1.5, %v2969_v41 }
0x12e6   : > { %v2971_v18 = vmul.f32 %v4457_v15, %v2970_v10 }
0x12e8   : > { %v2975_v53 = vsel %vm2974_vm2, %v4457_v15, %v2971_v18 }
0x12e9   : > { %v3099_v0 = vmul.f32 %v2975_v53, %v5763_v60 }
0x12eb   : > { %v3118_v1 = vmul.f32 %v5735_v56, %v3099_v0 }
0x12ec   : > { %v2779_v59 = vpop.xlane.xlu1 %2778 }
0x12ed   : > { %v2816_v24 = vmul.f32 %v5702_v21, %v2779_v59  ;;  %v5841_v37 = vadd.f32 %v5742_v36, %v3118_v1 }
0x12ef   : > { %v5844_v14 = vsub.f32 %v5771_v45, %v2816_v24  ;;  %v3151_v60 = vpack.c.bf16 %v5841_v37, %v5838_v25 }
0x12f1   : > { %4105 = vmatmul.msk.bf16.gmra.mxu0 %vm922_vm1, %v3151_v60  ;;  %v2848_v12 = vmul.f32 %v5844_v14, %v5844_v14 }
0x12f3   : > { %v2880_v30 = vsel %vm922_vm1, %v2848_v12, 0.0 }
0x12f4   : > { %2881 = vadd.xlane.f32.xlu1 %v2880_v30  ;;  %v2870_v3 = vpop.xlane.xlu1 %2869  ;;  %v2782_v29 = vpop.xlane.xlu2 %2781 }
0x12f5   : > { %v2908_v19 = vmul.f32 %v2870_v3, %v5702_v21  ;;  %v2817_v45 = vmul.f32 %v5702_v21, %v2782_v29 }
0x12f7   : > { %v2924_v9 = vadd.f32 1e-05, %v2908_v19  ;;  %v5856_v4 = vsub.f32 %v5783_v32, %v2817_v45 }
0x12f9   : > { %4458 = vrsqrt.f32 %v2924_v9  ;;  %v2849_v34 = vmul.f32 %v5856_v4, %v5856_v4  ;;  %vm2982_vm5 = vweird.f32 %v2924_v9 }
0x12fb   : > { %v2883_v20 = vsel %vm922_vm1, %v2849_v34, 0.0 }
0x12fc   : > { %2796 = vadd.xlane.f32.xlu1 %v2795_v63  ;;  %v2785_v32 = vpop.xlane.xlu1 %2784  ;;  %2884 = vadd.xlane.f32.xlu2 %v2883_v20  ;;  %v2873_v40 = vpop.xlane.xlu2 %2872 }
0x12fd   : > { %v2818_v44 = vmul.f32 %v5702_v21, %v2785_v32  ;;  %v2909_v51 = vmul.f32 %v2873_v40, %v5702_v21  ;;  %v3211_v40 = vpop.f32.mrf.mxu0 }
0x12ff   : > { %v4459_v6 = vpop.eup %4458  ;;  %v5871_v43 = vsub.f32 %v5796_v5, %v2818_v44  ;;  %v2925_v48 = vadd.f32 1e-05, %v2909_v51 }
0x1300   : > { %v2977_v17 = vmul.f32 %v4459_v6, %v2924_v9  ;;  %vm2983_vm3 = vweird.f32 %v4459_v6 }
0x1301   : > { %4460 = vrsqrt.f32 %v2925_v48  ;;  %v2850_v7 = vmul.f32 %v5871_v43, %v5871_v43  ;;  %vm2984_vm6 = vmor %vm2982_vm5, %vm2983_vm3  ;;  %vm2992_vm8 = vweird.f32 %v2925_v48 }
0x1302   : > { %v2978_v2 = vmul.f32 %v4459_v6, %v2977_v17 }
0x1303   : > { %v2886_v15 = vsel %vm922_vm1, %v2850_v7, 0.0 }
0x1304   : > { %v2979_v5 = vmul.f32 0.5, %v2978_v2  ;;  %2887 = vadd.xlane.f32.xlu1 %v2886_v15  ;;  %v2876_v35 = vpop.xlane.xlu1 %2875  ;;  %2799 = vadd.xlane.f32.xlu2 %v2798_v28  ;;  %v2788_v42 = vpop.xlane.xlu2 %2787 }
0x1305   : > { %v2910_v46 = vmul.f32 %v2876_v35, %v5702_v21  ;;  %v2819_v41 = vmul.f32 %v5702_v21, %v2788_v42  ;;  %v3213_v42 = vpop.f32.mrf.mxu0 }
0x1306   : > { %v2980_v10 = vsub.f32 1.5, %v2979_v5 }
0x1307   : > { %v4461_v18 = vpop.eup %4460  ;;  %v2926_v53 = vadd.f32 1e-05, %v2910_v46  ;;  %v5885_v0 = vsub.f32 %v5809_v52, %v2819_v41  ;;  %v5923_v41 = vld [vmem:[%s6556_s19] ss:$0 sm:$0xff] }
0x1308   : > { %v2981_v26 = vmul.f32 %v4459_v6, %v2980_v10  ;;  %v2987_v1 = vmul.f32 %v4461_v18, %v2925_v48  ;;  %vm2993_vm7 = vweird.f32 %v4461_v18 }
0x1309   : > { %4462 = vrsqrt.f32 %v2926_v53  ;;  %v2851_v59 = vmul.f32 %v5885_v0, %v5885_v0  ;;  %vm2994_vm9 = vmor %vm2992_vm8, %vm2993_vm7  ;;  %vm3002_vm11 = vweird.f32 %v2926_v53 }
0x130a   : > { %v2988_v24 = vmul.f32 %v4461_v18, %v2987_v1  ;;  %v2985_v60 = vsel %vm2984_vm6, %v4459_v6, %v2981_v26  ;;  %v3212_v26 = vadd.f32 %v5923_v41, %v3211_v40 }
0x130b   : > { %v2889_v33 = vsel %vm922_vm1, %v2851_v59, 0.0  ;;  %v3100_v45 = vmul.f32 %v2985_v60, %v5774_v27 }
0x130c   : > { %v2989_v12 = vmul.f32 0.5, %v2988_v24  ;;  %v2791_v30 = vpop.xlane.xlu1 %2790  ;;  %2890 = vadd.xlane.f32.xlu2 %v2889_v33  ;;  %v2879_v22 = vpop.xlane.xlu2 %2878  ;;  %v3251_v60 = vmax.f32 %v3212_v26, 0.0 }
0x130d   : > { %v2820_v52 = vmul.f32 %v5702_v21, %v2791_v30  ;;  %v2911_v3 = vmul.f32 %v2879_v22, %v5702_v21  ;;  %v3119_v27 = vmul.f32 %v5735_v56, %v3100_v45 }
0x130e   : > { %v2990_v29 = vsub.f32 1.5, %v2989_v12 }
0x130f   : > { %v4463_v19 = vpop.eup %4462  ;;  %v5894_v9 = vsub.f32 %v5820_v57, %v2820_v52  ;;  %v2927_v11 = vadd.f32 1e-05, %v2911_v3  ;;  %v5907_v17 = vadd.f32 %v5742_v36, %v3119_v27 }
0x1310   : > { %v2991_v50 = vmul.f32 %v4461_v18, %v2990_v29  ;;  %v2997_v34 = vmul.f32 %v4463_v19, %v2926_v53  ;;  %vm3003_vm10 = vweird.f32 %v4463_v19 }
0x1311   : > { %4464 = vrsqrt.f32 %v2927_v11  ;;  %v2852_v39 = vmul.f32 %v5894_v9, %v5894_v9  ;;  %vm3004_vm12 = vmor %vm3002_vm11, %vm3003_vm10  ;;  %vm3012_vm14 = vweird.f32 %v2927_v11 }
0x1312   : > { %v2995_v63 = vsel %vm2994_vm9, %v4461_v18, %v2991_v50  ;;  %v2998_v20 = vmul.f32 %v4463_v19, %v2997_v34  ;;  %v3214_v18 = vadd.f32 %v5923_v41, %v3213_v42 }
0x1313   : > { %v3101_v58 = vmul.f32 %v2995_v63, %v5786_v31  ;;  %v2892_v32 = vsel %vm922_vm1, %v2852_v39, 0.0 }
0x1314   : > { %v2999_v57 = vmul.f32 0.5, %v2998_v20  ;;  %2893 = vadd.xlane.f32.xlu1 %v2892_v32  ;;  %v2794_v44 = vpop.xlane.xlu2 %2793  ;;  %v3252_v24 = vmax.f32 %v3214_v18, 0.0 }
0x1315   : > { %v2821_v51 = vmul.f32 %v5702_v21, %v2794_v44  ;;  %v3120_v23 = vmul.f32 %v5735_v56, %v3101_v58 }
0x1316   : > { %v3000_v6 = vsub.f32 1.5, %v2999_v57  ;;  %v3267_v30 = vpack.c.bf16 %v3252_v24, %v3251_v60 }
0x1317   : > { %v4465_v48 = vpop.eup %4464  ;;  %v5904_v49 = vsub.f32 %v5826_v62, %v2821_v51  ;;  %v5910_v31 = vadd.f32 %v5742_v36, %v3120_v23 }
0x1318   : > { %v3001_v7 = vmul.f32 %v4463_v19, %v3000_v6  ;;  %v3007_v2 = vmul.f32 %v4465_v48, %v2927_v11  ;;  %vm3013_vm13 = vweird.f32 %v4465_v48 }
0x1319   : > { %v3152_v54 = vpack.c.bf16 %v5910_v31, %v5907_v17  ;;  %v2853_v15 = vmul.f32 %v5904_v49, %v5904_v49  ;;  %vm3014_vm15 = vmor %vm3012_vm14, %vm3013_vm13 }
0x131a   : > { %v3008_v28 = vmul.f32 %v4465_v48, %v3007_v2  ;;  %v3005_v5 = vsel %vm3004_vm12, %v4463_v19, %v3001_v7 }
0x131b   : > { %4106 = vmatmul.msk.bf16.gmra.mxu0 %vm922_vm1, %v3152_v54  ;;  %v2895_v62 = vsel %vm922_vm1, %v2853_v15, 0.0  ;;  %v3102_v10 = vmul.f32 %v3005_v5, %v5799_v16 }
0x131c   : > { %v3009_v35 = vmul.f32 0.5, %v3008_v28  ;;  %2896 = vadd.xlane.f32.xlu2 %v2895_v62 }
0x131d   : > { %v3121_v1 = vmul.f32 %v5735_v56, %v3102_v10 }
0x131e   : > { %v3010_v46 = vsub.f32 1.5, %v3009_v35 }
0x131f   : > { %v5932_v12 = vadd.f32 %v5742_v36, %v3121_v1 }
0x1320   : > { %v3011_v8 = vmul.f32 %v4465_v48, %v3010_v46 }
0x1322   : > { %v3015_v53 = vsel %vm3014_vm15, %v4465_v48, %v3011_v8 }
0x1323   : > { %v3103_v59 = vmul.f32 %v3015_v53, %v5812_v55 }
0x1325   : > { %v3122_v33 = vmul.f32 %v5735_v56, %v3103_v59 }
0x1327   : > { %v5935_v16 = vadd.f32 %v5742_v36, %v3122_v33 }
0x1329   : > { %v3153_v22 = vpack.c.bf16 %v5935_v16, %v5932_v12 }
0x132b   : > { %4107 = vmatmul.msk.bf16.vlgmr.msra.gmra.mxu3 %vm922_vm1, %v3153_v22  ;;  %4128 = vmatmul.msk.bf16.vlgmr.msrb.gmra.mxu0 %vm1150_vm4, %v3267_v30 }
0x1367   : > { %v2882_v52 = vpop.xlane.xlu1 %2881 }
0x1368   : > { %v2912_v55 = vmul.f32 %v2882_v52, %v5702_v21 }
0x136a   : > { %v2928_v3 = vadd.f32 1e-05, %v2912_v55 }
0x136c   : > { %4466 = vrsqrt.f32 %v2928_v3  ;;  %vm3022_vm2 = vweird.f32 %v2928_v3 }
0x136e   : > { %v3216_v29 = vpop.f32.mrf.mxu0 }
0x136f   : > { %v2797_v19 = vpop.xlane.xlu1 %2796  ;;  %v2885_v45 = vpop.xlane.xlu2 %2884  ;;  %v3217_v27 = vadd.f32 %v5923_v41, %v3216_v29 }
0x1370   : > { %v2822_v11 = vmul.f32 %v5702_v21, %v2797_v19  ;;  %v2913_v50 = vmul.f32 %v2885_v45, %v5702_v21 }
0x1371   : > { %v3253_v2 = vmax.f32 %v3217_v27, 0.0 }
0x1372   : > { %v4467_v34 = vpop.eup %4466  ;;  %v5945_v39 = vsub.f32 %v5858_v38, %v2822_v11  ;;  %v2929_v63 = vadd.f32 1e-05, %v2913_v50 }
0x1373   : > { %v3017_v20 = vmul.f32 %v4467_v34, %v2928_v3  ;;  %vm3023_vm0 = vweird.f32 %v4467_v34 }
0x1374   : > { %4468 = vrsqrt.f32 %v2929_v63  ;;  %v2854_v58 = vmul.f32 %v5945_v39, %v5945_v39  ;;  %vm3024_vm3 = vmor %vm3022_vm2, %vm3023_vm0  ;;  %vm3032_vm6 = vweird.f32 %v2929_v63 }
0x1375   : > { %v3018_v32 = vmul.f32 %v4467_v34, %v3017_v20 }
0x1376   : > { %v3218_v40 = vpop.f32.mrf.mxu0  ;;  %v2898_v57 = vsel %vm922_vm1, %v2854_v58, 0.0 }
0x1377   : > { %v3019_v44 = vmul.f32 0.5, %v3018_v32  ;;  %v3219_v51 = vadd.f32 %v5923_v41, %v3218_v40  ;;  %2899 = vadd.xlane.f32.xlu1 %v2898_v57  ;;  %v2888_v23 = vpop.xlane.xlu1 %2887  ;;  %v2800_v6 = vpop.xlane.xlu2 %2799 }
0x1378   : > { %v2914_v38 = vmul.f32 %v2888_v23, %v5702_v21  ;;  %v2823_v48 = vmul.f32 %v5702_v21, %v2800_v6 }
0x1379   : > { %v3020_v7 = vsub.f32 1.5, %v3019_v44  ;;  %v3254_v54 = vmax.f32 %v3219_v51, 0.0 }
0x137a   : > { %v4469_v15 = vpop.eup %4468  ;;  %v2930_v28 = vadd.f32 1e-05, %v2914_v38  ;;  %v5955_v62 = vsub.f32 %v5873_v13, %v2823_v48 }
0x137b   : > { %v3021_v5 = vmul.f32 %v4467_v34, %v3020_v7  ;;  %v3027_v35 = vmul.f32 %v4469_v15, %v2929_v63  ;;  %v3268_v42 = vpack.c.bf16 %v3254_v54, %v3253_v2  ;;  %vm3033_vm5 = vweird.f32 %v4469_v15 }
0x137c   : > { %4470 = vrsqrt.f32 %v2930_v28  ;;  %v2855_v46 = vmul.f32 %v5955_v62, %v5955_v62  ;;  %vm3034_vm7 = vmor %vm3032_vm6, %vm3033_vm5  ;;  %vm3042_vm9 = vweird.f32 %v2930_v28 }
0x137d   : > { %v3028_v10 = vmul.f32 %v4469_v15, %v3027_v35  ;;  %4129 = vmatmul.msk.bf16.gmra.mxu0 %vm1150_vm4, %v3268_v42  ;;  %v3025_v18 = vsel %vm3024_vm3, %v4467_v34, %v3021_v5 }
0x137e   : > { %v2901_v8 = vsel %vm922_vm1, %v2855_v46, 0.0  ;;  %v3104_v24 = vmul.f32 %v3025_v18, %v5844_v14 }
0x137f   : > { %v3029_v53 = vmul.f32 0.5, %v3028_v10  ;;  %2902 = vadd.xlane.f32.xlu2 %v2901_v8  ;;  %v2891_v13 = vpop.xlane.xlu2 %2890 }
0x1380   : > { %v2915_v26 = vmul.f32 %v2891_v13, %v5702_v21  ;;  %v3123_v3 = vmul.f32 %v5735_v56, %v3104_v24 }
0x1381   : > { %v3030_v1 = vsub.f32 1.5, %v3029_v53 }
0x1382   : > { %v4471_v59 = vpop.eup %4470  ;;  %v2931_v33 = vadd.f32 1e-05, %v2915_v26  ;;  %v5968_v63 = vadd.f32 %v5742_v36, %v3123_v3 }
0x1383   : > { %v3031_v60 = vmul.f32 %v4469_v15, %v3030_v1  ;;  %v3037_v30 = vmul.f32 %v4471_v59, %v2930_v28  ;;  %vm3043_vm8 = vweird.f32 %v4471_v59 }
0x1384   : > { %4472 = vrsqrt.f32 %v2931_v33  ;;  %vm3044_vm10 = vmor %vm3042_vm9, %vm3043_vm8  ;;  %vm3052_vm12 = vweird.f32 %v2931_v33 }
0x1385   : > { %v3035_v22 = vsel %vm3034_vm7, %v4469_v15, %v3031_v60  ;;  %v3038_v52 = vmul.f32 %v4471_v59, %v3037_v30 }
0x1386   : > { %v3105_v55 = vmul.f32 %v3035_v22, %v5856_v4 }
0x1387   : > { %v3039_v29 = vmul.f32 0.5, %v3038_v52  ;;  %v2894_v19 = vpop.xlane.xlu1 %2893 }
0x1388   : > { %v2916_v45 = vmul.f32 %v2894_v19, %v5702_v21  ;;  %v3124_v11 = vmul.f32 %v5735_v56, %v3105_v55 }
0x1389   : > { %v3040_v50 = vsub.f32 1.5, %v3039_v29 }
0x138a   : > { %v4473_v14 = vpop.eup %4472  ;;  %v2932_v34 = vadd.f32 1e-05, %v2916_v45  ;;  %v5971_v20 = vadd.f32 %v5742_v36, %v3124_v11  ;;  %v5998_v45 = vld [vmem:[%s6557_s18] ss:$0 sm:$0xff] }
0x138b   : > { %v3041_v58 = vmul.f32 %v4471_v59, %v3040_v50  ;;  %v3047_v4 = vmul.f32 %v4473_v14, %v2931_v33  ;;  %vm3053_vm11 = vweird.f32 %v4473_v14 }
0x138c   : > { %4474 = vrsqrt.f32 %v2932_v34  ;;  %v3154_v32 = vpack.c.bf16 %v5971_v20, %v5968_v63  ;;  %vm3054_vm13 = vmor %vm3052_vm12, %vm3053_vm11  ;;  %vm3062_vm15 = vweird.f32 %v2932_v34 }
0x138d   : > { %v3048_v27 = vmul.f32 %v4473_v14, %v3047_v4  ;;  %v3045_v40 = vsel %vm3044_vm10, %v4471_v59, %v3041_v58 }
0x138e   : > { %4108 = vmatmul.msk.bf16.gmra.mxu3 %vm922_vm1, %v3154_v32  ;;  %v3106_v38 = vmul.f32 %v3045_v40, %v5871_v43 }
0x138f   : > { %v3049_v57 = vmul.f32 0.5, %v3048_v27  ;;  %v2897_v44 = vpop.xlane.xlu2 %2896 }
0x1390   : > { %v2917_v51 = vmul.f32 %v2897_v44, %v5702_v21  ;;  %v3125_v5 = vmul.f32 %v5735_v56, %v3106_v38 }
0x1391   : > { %v3050_v23 = vsub.f32 1.5, %v3049_v57 }
0x1392   : > { %v4475_v6 = vpop.eup %4474  ;;  %v2933_v48 = vadd.f32 1e-05, %v2917_v51  ;;  %v5982_v43 = vadd.f32 %v5742_v36, %v3125_v5 }
0x1393   : > { %v3051_v7 = vmul.f32 %v4473_v14, %v3050_v23  ;;  %v3057_v2 = vmul.f32 %v4475_v6, %v2932_v34  ;;  %vm3063_vm14 = vweird.f32 %v4475_v6 }
0x1394   : > { %4476 = vrsqrt.f32 %v2933_v48  ;;  %vm3064_vm0 = vmor %vm3062_vm15, %vm3063_vm14  ;;  %vm3072_vm3 = vweird.f32 %v2933_v48 }
0x1395   : > { %v3055_v54 = vsel %vm3054_vm13, %v4473_v14, %v3051_v7  ;;  %v3058_v15 = vmul.f32 %v4475_v6, %v3057_v2 }
0x1396   : > { %v3107_v28 = vmul.f32 %v3055_v54, %v5885_v0 }
0x1397   : > { %v3059_v35 = vmul.f32 0.5, %v3058_v15 }
0x1398   : > { %v3221_v42 = vpop.f32.mrf.mxu0  ;;  %v3126_v46 = vmul.f32 %v5735_v56, %v3107_v28 }
0x1399   : > { %v3060_v10 = vsub.f32 1.5, %v3059_v35  ;;  %v3222_v24 = vadd.f32 %v5923_v41, %v3221_v42 }
0x139a   : > { %v4477_v8 = vpop.eup %4476  ;;  %v5985_v18 = vadd.f32 %v5742_v36, %v3126_v46 }
0x139b   : > { %v3061_v53 = vmul.f32 %v4475_v6, %v3060_v10  ;;  %v3067_v13 = vmul.f32 %v4477_v8, %v2933_v48  ;;  %vm3073_vm2 = vweird.f32 %v4477_v8  ;;  %v3255_v55 = vmax.f32 %v3222_v24, 0.0 }
0x139c   : > { %v3155_v0 = vpack.c.bf16 %v5985_v18, %v5982_v43  ;;  %vm3074_vm5 = vmor %vm3072_vm3, %vm3073_vm2 }
0x139d   : > { %v3068_v26 = vmul.f32 %v4477_v8, %v3067_v13  ;;  %v3065_v1 = vsel %vm3064_vm0, %v4475_v6, %v3061_v53 }
0x139e   : > { %4109 = vmatmul.msk.bf16.gmra.mxu3 %vm922_vm1, %v3155_v0  ;;  %v3108_v22 = vmul.f32 %v3065_v1, %v5894_v9 }
0x139f   : > { %v3069_v59 = vmul.f32 0.5, %v3068_v26 }
0x13a0   : > { %v3223_v33 = vpop.f32.mrf.mxu0  ;;  %v3127_v50 = vmul.f32 %v5735_v56, %v3108_v22 }
0x13a1   : > { %v3070_v60 = vsub.f32 1.5, %v3069_v59  ;;  %v3224_v30 = vadd.f32 %v5923_v41, %v3223_v33 }
0x13a2   : > { %v6006_v58 = vadd.f32 %v5742_v36, %v3127_v50 }
0x13a3   : > { %v3071_v52 = vmul.f32 %v4477_v8, %v3070_v60  ;;  %v3256_v3 = vmax.f32 %v3224_v30, 0.0 }
0x13a5   : > { %v3075_v29 = vsel %vm3074_vm5, %v4477_v8, %v3071_v52  ;;  %v3269_v19 = vpack.c.bf16 %v3256_v3, %v3255_v55 }
0x13a6   : > { %v3109_v11 = vmul.f32 %v3075_v29, %v5904_v49 }
0x13a7   : > { %4130 = vmatmul.msk.bf16.gmra.mxu0 %vm1150_vm4, %v3269_v19 }
0x13a8   : > { %v3344_v9 = vpop.f32.mrf.mxu0  ;;  %v3128_v14 = vmul.f32 %v5735_v56, %v3109_v11 }
0x13a9   : > { %v3345_v34 = vadd.f32 %v5998_v45, %v3344_v9 }
0x13aa   : > { %v6009_v4 = vadd.f32 %v5742_v36, %v3128_v14 }
0x13ab   : > { %v6012_v32 = vadd.f32 %v3345_v34, %v5747_v61 }
0x13ac   : > { %v3156_v49 = vpack.c.bf16 %v6009_v4, %v6006_v58 }
0x13ad   : > { %v3402_v27 = vsel %vm922_vm1, %v6012_v32, 0.0 }
0x13ae   : > { %3403 = vadd.xlane.f32.xlu1 %v3402_v27  ;;  %v3226_v40 = vpop.f32.mrf.mxu3  ;;  %4110 = vmatmul.msk.bf16.gmra.mxu3 %vm922_vm1, %v3156_v49 }
0x13af   : > { %v3227_v23 = vadd.f32 %v5923_v41, %v3226_v40 }
0x13b0   : > { %v3346_v57 = vpop.f32.mrf.mxu0 }
0x13b1   : > { %v3347_v44 = vadd.f32 %v5998_v45, %v3346_v57  ;;  %v3257_v48 = vmax.f32 %v3227_v23, 0.0 }
0x13b3   : > { %v6021_v51 = vadd.f32 %v3347_v44, %v5750_v47 }
0x13b5   : > { %v3405_v61 = vsel %vm922_vm1, %v6021_v51, 0.0 }
0x13b6   : > { %v3228_v6 = vpop.f32.mrf.mxu3  ;;  %3406 = vadd.xlane.f32.xlu2 %v3405_v61 }
0x13b7   : > { %v3229_v38 = vadd.f32 %v5923_v41, %v3228_v6 }
0x13b9   : > { %v3258_v7 = vmax.f32 %v3229_v38, 0.0 }
0x13bb   : > { %v3270_v2 = vpack.c.bf16 %v3258_v7, %v3257_v48 }
0x13bd   : > { %4131 = vmatmul.msk.bf16.gmra.mxu0 %vm1150_vm4, %v3270_v2 }
0x13ea   : > { %v2900_v54 = vpop.xlane.xlu1 %2899 }
0x13eb   : > { %v2918_v15 = vmul.f32 %v2900_v54, %v5702_v21 }
0x13ed   : > { %v2934_v28 = vadd.f32 1e-05, %v2918_v15 }
0x13ef   : > { %4478 = vrsqrt.f32 %v2934_v28  ;;  %vm3082_vm7 = vweird.f32 %v2934_v28 }
0x13f2   : > { %v2903_v47 = vpop.xlane.xlu2 %2902 }
0x13f3   : > { %v2919_v5 = vmul.f32 %v2903_v47, %v5702_v21 }
0x13f5   : > { %v4479_v35 = vpop.eup %4478  ;;  %v2935_v42 = vadd.f32 1e-05, %v2919_v5 }
0x13f6   : > { %v3077_v46 = vmul.f32 %v4479_v35, %v2934_v28  ;;  %vm3083_vm6 = vweird.f32 %v4479_v35 }
0x13f7   : > { %4480 = vrsqrt.f32 %v2935_v42  ;;  %vm3084_vm8 = vmor %vm3082_vm7, %vm3083_vm6  ;;  %vm3092_vm10 = vweird.f32 %v2935_v42 }
0x13f8   : > { %v3078_v10 = vmul.f32 %v4479_v35, %v3077_v46 }
0x13fa   : > { %v3079_v8 = vmul.f32 0.5, %v3078_v10  ;;  %v3349_v53 = vpop.f32.mrf.mxu0 }
0x13fb   : > { %v3350_v13 = vadd.f32 %v5998_v45, %v3349_v53 }
0x13fc   : > { %v3080_v0 = vsub.f32 1.5, %v3079_v8 }
0x13fd   : > { %v4481_v26 = vpop.eup %4480  ;;  %v6032_v1 = vadd.f32 %v3350_v13, %v5838_v25 }
0x13fe   : > { %v3081_v59 = vmul.f32 %v4479_v35, %v3080_v0  ;;  %v3087_v24 = vmul.f32 %v4481_v26, %v2935_v42  ;;  %vm3093_vm9 = vweird.f32 %v4481_v26 }
0x13ff   : > { %v3408_v33 = vsel %vm922_vm1, %v6032_v1, 0.0  ;;  %vm3094_vm11 = vmor %vm3092_vm10, %vm3093_vm9 }
0x1400   : > { %v3088_v60 = vmul.f32 %v4481_v26, %v3087_v24  ;;  %3409 = vadd.xlane.f32.xlu1 %v3408_v33  ;;  %v3085_v30 = vsel %vm3084_vm8, %v4479_v35, %v3081_v59 }
0x1401   : > { %v3110_v25 = vmul.f32 %v3085_v30, %v5945_v39 }
0x1402   : > { %v3089_v22 = vmul.f32 0.5, %v3088_v60  ;;  %v3351_v52 = vpop.f32.mrf.mxu0 }
0x1403   : > { %v3352_v55 = vadd.f32 %v5998_v45, %v3351_v52  ;;  %v3129_v14 = vmul.f32 %v5735_v56, %v3110_v25 }
0x1404   : > { %v3090_v3 = vsub.f32 1.5, %v3089_v22 }
0x1405   : > { %v6039_v29 = vadd.f32 %v3352_v55, %v5841_v37  ;;  %v6047_v49 = vadd.f32 %v5742_v36, %v3129_v14 }
0x1406   : > { %v3091_v19 = vmul.f32 %v4481_v26, %v3090_v3 }
0x1407   : > { %v3411_v11 = vsel %vm922_vm1, %v6039_v29, 0.0 }
0x1408   : > { %v3095_v50 = vsel %vm3094_vm11, %v4481_v26, %v3091_v19  ;;  %3412 = vadd.xlane.f32.xlu2 %v3411_v11 }
0x1409   : > { %v3111_v9 = vmul.f32 %v3095_v50, %v5955_v62 }
0x140b   : > { %v3130_v34 = vmul.f32 %v5735_v56, %v3111_v9 }
0x140d   : > { %v6050_v37 = vadd.f32 %v5742_v36, %v3130_v34 }
0x140f   : > { %v3157_v39 = vpack.c.bf16 %v6050_v37, %v6047_v49 }
0x1411   : > { %v3231_v27 = vpop.f32.mrf.mxu3  ;;  %4111 = vmatmul.msk.bf16.gmra.mxu3 %vm922_vm1, %v3157_v39 }
0x1412   : > { %v3232_v40 = vadd.f32 %v5923_v41, %v3231_v27 }
0x1414   : > { %v3259_v44 = vmax.f32 %v3232_v40, 0.0 }
0x1419   : > { %v3233_v57 = vpop.f32.mrf.mxu3 }
0x141a   : > { %v3234_v62 = vadd.f32 %v5923_v41, %v3233_v57 }
0x141c   : > { %v3260_v23 = vmax.f32 %v3234_v62, 0.0 }
0x141e   : > { %v3271_v56 = vpack.c.bf16 %v3260_v23, %v3259_v44 }
0x1420   : > { %4132 = vmatmul.msk.bf16.gmra.mxu0 %vm1150_vm4, %v3271_v56 }
0x1421   : > { %v3236_v61 = vpop.f32.mrf.mxu3 }
0x1422   : > { %v3237_v48 = vadd.f32 %v5923_v41, %v3236_v61 }
0x1424   : > { %v3354_v6 = vpop.f32.mrf.mxu0  ;;  %v3261_v15 = vmax.f32 %v3237_v48, 0.0 }
0x1425   : > { %v3355_v36 = vadd.f32 %v5998_v45, %v3354_v6  ;;  %v3404_v6 = vpop.xlane.xlu1 %3403 }
0x1427   : > { %v6060_v38 = vadd.f32 %v3355_v36, %v5907_v17 }
0x1429   : > { %v3238_v7 = vpop.f32.mrf.mxu3  ;;  %v3414_v2 = vsel %vm922_vm1, %v6060_v38, 0.0 }
0x142a   : > { %v3239_v54 = vadd.f32 %v5923_v41, %v3238_v7  ;;  %3415 = vadd.xlane.f32.xlu1 %v3414_v2  ;;  %v3407_v2 = vpop.xlane.xlu2 %3406 }
0x142c   : > { %v3262_v28 = vmax.f32 %v3239_v54, 0.0  ;;  %v3356_v47 = vpop.f32.mrf.mxu0 }
0x142d   : > { %v3357_v5 = vadd.f32 %v5998_v45, %v3356_v47 }
0x142e   : > { %v3272_v35 = vpack.c.bf16 %v3262_v28, %v3261_v15 }
0x142f   : > { %v6068_v42 = vadd.f32 %v3357_v5, %v5910_v31 }
0x1430   : > { %4133 = vmatmul.msk.bf16.gmra.mxu0 %vm1150_vm4, %v3272_v35 }
0x1431   : > { %v3241_v17 = vpop.f32.mrf.mxu3  ;;  %v3417_v46 = vsel %vm922_vm1, %v6068_v42, 0.0 }
0x1432   : > { %3418 = vadd.xlane.f32.xlu2 %v3417_v46  ;;  %v3242_v10 = vadd.f32 %v5923_v41, %v3241_v17 }
0x1434   : > { %v3263_v26 = vmax.f32 %v3242_v10, 0.0 }
0x1439   : > { %v3243_v8 = vpop.f32.mrf.mxu3 }
0x143a   : > { %v3244_v53 = vadd.f32 %v5923_v41, %v3243_v8  ;;  %v3359_v13 = vpop.f32.mrf.mxu0 }
0x143b   : > { %v3360_v0 = vadd.f32 %v5998_v45, %v3359_v13 }
0x143c   : > { %v3264_v59 = vmax.f32 %v3244_v53, 0.0 }
0x143d   : > { %v6077_v31 = vadd.f32 %v3360_v0, %v5932_v12 }
0x143e   : > { %v3273_v24 = vpack.c.bf16 %v3264_v59, %v3263_v26 }
0x143f   : > { %v3420_v33 = vsel %vm922_vm1, %v6077_v31, 0.0 }
0x1440   : > { %3421 = vadd.xlane.f32.xlu1 %v3420_v33  ;;  %4134 = vmatmul.msk.bf16.gmra.mxu0 %vm1150_vm4, %v3273_v24 }
0x1442   : > { %v3361_v60 = vpop.f32.mrf.mxu0 }
0x1443   : > { %v3362_v30 = vadd.f32 %v5998_v45, %v3361_v60 }
0x1445   : > { %v6084_v22 = vadd.f32 %v3362_v30, %v5935_v16  ;;  %v3451_v30 = vmul.f32 %v3407_v2, %v5702_v21 }
0x1447   : > { %v3423_v52 = vsel %vm922_vm1, %v6084_v22, 0.0 }
0x1448   : > { %3424 = vadd.xlane.f32.xlu2 %v3423_v52 }
0x1473   : > { %v3410_v54 = vpop.xlane.xlu1 %3409 }
0x147b   : > { %v3413_v35 = vpop.xlane.xlu2 %3412 }
0x147c   : > { %v3453_v46 = vmul.f32 %v3413_v35, %v5702_v21 }
0x147e   : > { %v6132_v8 = vsub.f32 %v6039_v29, %v3453_v46 }
0x1480   : > { %v3485_v13 = vmul.f32 %v6132_v8, %v6132_v8 }
0x1482   : > { %v3507_v26 = vsel %vm922_vm1, %v3485_v13, 0.0 }
0x1494   : > { %v3246_v55 = vpop.f32.mrf.mxu3 }
0x1495   : > { %v3247_v12 = vadd.f32 %v5923_v41, %v3246_v55 }
0x1497   : > { %v3265_v50 = vmax.f32 %v3247_v12, 0.0 }
0x149c   : > { %v3248_v3 = vpop.f32.mrf.mxu3 }
0x149d   : > { %v3249_v25 = vadd.f32 %v5923_v41, %v3248_v3  ;;  %v3364_v19 = vpop.f32.mrf.mxu0  ;;  %v3416_v17 = vpop.xlane.xlu1 %3415  ;;  %v6156_v3 = vsub.f32 %v6021_v51, %v3451_v30 }
0x149e   : > { %v3365_v11 = vadd.f32 %v5998_v45, %v3364_v19 }
0x149f   : > { %v3266_v9 = vmax.f32 %v3249_v25, 0.0 }
0x14a0   : > { %v6092_v14 = vadd.f32 %v3365_v11, %v5968_v63 }
0x14a1   : > { %v3274_v16 = vpack.c.bf16 %v3266_v9, %v3265_v50  ;;  %v3452_v9 = vmul.f32 %v3410_v54, %v5702_v21 }
0x14a2   : > { %v3426_v34 = vsel %vm922_vm1, %v6092_v14, 0.0 }
0x14a3   : > { %3427 = vadd.xlane.f32.xlu0 %v3426_v34  ;;  %4135 = vmatmul.msk.bf16.gmra.mxu0 %vm1150_vm4, %v3274_v16  ;;  %v3483_v34 = vmul.f32 %v6156_v3, %v6156_v3 }
0x14a5   : > { %v3366_v39 = vpop.f32.mrf.mxu0  ;;  %v3419_v11 = vpop.xlane.xlu2 %3418 }
0x14a6   : > { %v3367_v27 = vadd.f32 %v5998_v45, %v3366_v39  ;;  %v6170_v39 = vsub.f32 %v6032_v1, %v3452_v9 }
0x14a8   : > { %v3393_v41 = vadd.f32 %v3367_v27, %v5971_v20 }
0x14aa   : > { %v3429_v40 = vsel %vm922_vm1, %v3393_v41, 0.0 }
0x14ab   : > { %3430 = vadd.xlane.f32.xlu1 %v3429_v40  ;;  %v3501_v40 = vsel %vm922_vm1, %v3483_v34, 0.0 }
0x14ad   : > { %v3369_v57 = vpop.f32.mrf.mxu0 }
0x14ae   : > { %v3370_v62 = vadd.f32 %v5998_v45, %v3369_v57 }
0x14b0   : > { %v6102_v63 = vadd.f32 %v3370_v62, %v5982_v43 }
0x14b2   : > { %v3432_v44 = vsel %vm922_vm1, %v6102_v63, 0.0 }
0x14b3   : > { %3433 = vadd.xlane.f32.xlu2 %v3432_v44  ;;  %v3422_v53 = vpop.xlane.xlu1 %3421 }
0x14b5   : > { %v3371_v23 = vpop.f32.mrf.mxu0 }
0x14b6   : > { %v3372_v56 = vadd.f32 %v5998_v45, %v3371_v23 }
0x14b8   : > { %v6108_v61 = vadd.f32 %v3372_v56, %v5985_v18  ;;  %v3450_v18 = vmul.f32 %v3404_v6, %v5702_v21 }
0x14ba   : > { %v3435_v20 = vsel %vm922_vm1, %v6108_v61, 0.0  ;;  %v6124_v5 = vsub.f32 %v6012_v32, %v3450_v18  ;;  %v3456_v32 = vmul.f32 %v3422_v53, %v5702_v21 }
0x14bb   : > { %3436 = vadd.xlane.f32.xlu0 %v3435_v20  ;;  %v3425_v57 = vpop.xlane.xlu2 %3424 }
0x14bc   : > { %v3482_v10 = vmul.f32 %v6124_v5, %v6124_v5  ;;  %v6139_v0 = vsub.f32 %v6077_v31, %v3456_v32  ;;  %v3457_v62 = vmul.f32 %v3425_v57, %v5702_v21 }
0x14bd   : > { %v3374_v36 = vpop.f32.mrf.mxu0 }
0x14be   : > { %v3375_v48 = vadd.f32 %v5998_v45, %v3374_v36  ;;  %v3488_v59 = vmul.f32 %v6139_v0, %v6139_v0  ;;  %v6190_v20 = vsub.f32 %v6084_v22, %v3457_v62  ;;  %v6248_v62 = vld [vmem:[%s751_s27] ss:$0 sm:$0xff] }
0x14c0   : > { %v6114_v43 = vadd.f32 %v3375_v48, %v6006_v58  ;;  %v3516_v29 = vsel %vm922_vm1, %v3488_v59, 0.0  ;;  %v3489_v22 = vmul.f32 %v6190_v20, %v6190_v20 }
0x14c2   : > { %v3438_v7 = vsel %vm922_vm1, %v6114_v43, 0.0 }
0x14c3   : > { %3439 = vadd.xlane.f32.xlu1 %v3438_v7 }
0x14c5   : > { %v3376_v15 = vpop.f32.mrf.mxu0 }
0x14c6   : > { %v3377_v28 = vadd.f32 %v5998_v45, %v3376_v15 }
0x14c8   : > { %v6121_v47 = vadd.f32 %v3377_v28, %v6009_v4  ;;  %v3498_v4 = vsel %vm922_vm1, %v3482_v10, 0.0 }
0x14ca   : > { %v3441_v58 = vsel %vm922_vm1, %v6121_v47, 0.0 }
0x14cb   : > { %3442 = vadd.xlane.f32.xlu2 %v3441_v58 }
0x14d3   : > { %3499 = vadd.xlane.f32.xlu2 %v3498_v4 }
0x14db   : > { %3508 = vadd.xlane.f32.xlu2 %v3507_v26 }
0x14e3   : > { %3517 = vadd.xlane.f32.xlu2 %v3516_v29 }
0x1516   : > { %v3428_v44 = vpop.xlane.xlu0 %3427 }
0x1517   : > { %v3458_v7 = vmul.f32 %v3428_v44, %v5702_v21 }
0x1519   : > { %v6205_v18 = vsub.f32 %v6092_v14, %v3458_v7 }
0x151b   : > { %v3490_v14 = vmul.f32 %v6205_v18, %v6205_v18 }
0x151d   : > { %v3522_v32 = vsel %vm922_vm1, %v3490_v14, 0.0 }
0x151e   : > { %v3431_v24 = vpop.xlane.xlu1 %3430 }
0x151f   : > { %v3459_v33 = vmul.f32 %v3431_v24, %v5702_v21 }
0x1520   : > { %v3379_v60 = vpop.f32.mrf.mxu0 }
0x1521   : > { %v6147_v52 = vsub.f32 %v3393_v41, %v3459_v33  ;;  %v3380_v31 = vadd.f32 %v5998_v45, %v3379_v60 }
0x1523   : > { %v6151_v55 = vadd.f32 %v3380_v31, %v6047_v49  ;;  %v3491_v12 = vmul.f32 %v6147_v52, %v6147_v52  ;;  %v3454_v49 = vmul.f32 %v3416_v17, %v5702_v21  ;;  %v3519_v17 = vsel %vm922_vm1, %v3489_v22, 0.0 }
0x1525   : > { %v3444_v25 = vsel %vm922_vm1, %v6151_v55, 0.0  ;;  %v3525_v19 = vsel %vm922_vm1, %v3491_v12, 0.0  ;;  %v6173_v27 = vsub.f32 %v6060_v38, %v3454_v49 }
0x1526   : > { %3445 = vadd.xlane.f32.xlu0 %v3444_v25  ;;  %3526 = vadd.xlane.f32.xlu2 %v3525_v19  ;;  %v3434_v6 = vpop.xlane.xlu2 %3433 }
0x1527   : > { %v3486_v1 = vmul.f32 %v6173_v27, %v6173_v27  ;;  %v3460_v54 = vmul.f32 %v3434_v6, %v5702_v21 }
0x1528   : > { %v3381_v50 = vpop.f32.mrf.mxu0 }
0x1529   : > { %v3382_v16 = vadd.f32 %v5998_v45, %v3381_v50  ;;  %v3455_v45 = vmul.f32 %v3419_v11, %v5702_v21  ;;  %v3510_v56 = vsel %vm922_vm1, %v3486_v1, 0.0 }
0x152b   : > { %v6167_v51 = vadd.f32 %v3382_v16, %v6050_v37  ;;  %v3484_v37 = vmul.f32 %v6170_v39, %v6170_v39  ;;  %v6185_v38 = vsub.f32 %v6068_v42, %v3455_v45  ;;  %v6241_v45 = vld [vmem:[%s748_s22] ss:$0 sm:$0xff] }
0x152d   : > { %v3447_v41 = vsel %vm922_vm1, %v6167_v51, 0.0  ;;  %v3504_v23 = vsel %vm922_vm1, %v3484_v37, 0.0  ;;  %v3487_v42 = vmul.f32 %v6185_v38, %v6185_v38 }
0x152e   : > { %3448 = vadd.xlane.f32.xlu1 %v3447_v41  ;;  %3502 = vadd.xlane.f32.xlu0 %v3501_v40  ;;  %v3437_v35 = vpop.xlane.xlu0 %3436 }
0x152f   : > { %v3513_v58 = vsel %vm922_vm1, %v3487_v42, 0.0  ;;  %v3461_v10 = vmul.f32 %v3437_v35, %v5702_v21 }
0x1536   : > { %v3440_v36 = vpop.xlane.xlu1 %3439  ;;  %3505 = vadd.xlane.f32.xlu1 %v3504_v23  ;;  %3511 = vadd.xlane.f32.xlu0 %v3510_v56 }
0x1537   : > { %v3462_v48 = vmul.f32 %v3440_v36, %v5702_v21 }
0x1539   : > { %v6195_v2 = vsub.f32 %v6114_v43, %v3462_v48  ;;  %v6210_v43 = vsub.f32 %v6102_v63, %v3460_v54  ;;  %v6220_v63 = vsub.f32 %v6108_v61, %v3461_v10 }
0x153b   : > { %v3494_v15 = vmul.f32 %v6195_v2, %v6195_v2  ;;  %v3492_v53 = vmul.f32 %v6210_v43, %v6210_v43  ;;  %v3493_v33 = vmul.f32 %v6220_v63, %v6220_v63 }
0x153d   : > { %v3534_v28 = vsel %vm922_vm1, %v3494_v15, 0.0  ;;  %v3528_v26 = vsel %vm922_vm1, %v3492_v53, 0.0  ;;  %v3531_v60 = vsel %vm922_vm1, %v3493_v33, 0.0 }
0x153e   : > { %3535 = vadd.xlane.f32.xlu2 %v3534_v28  ;;  %3514 = vadd.xlane.f32.xlu1 %v3513_v58  ;;  %v3443_v46 = vpop.xlane.xlu2 %3442 }
0x153f   : > { %3520 = vadd.xlane.f32.xlu0 %v3519_v17  ;;  %v3463_v4 = vmul.f32 %v3443_v46, %v5702_v21 }
0x1541   : > { %v6224_v13 = vsub.f32 %v6121_v47, %v3463_v4 }
0x1543   : > { %v3495_v61 = vmul.f32 %v6224_v13, %v6224_v13 }
0x1545   : > { %v3537_v47 = vsel %vm922_vm1, %v3495_v61, 0.0 }
0x1546   : > { %3523 = vadd.xlane.f32.xlu1 %v3522_v32  ;;  %v3500_v59 = vpop.xlane.xlu2 %3499 }
0x1547   : > { %3529 = vadd.xlane.f32.xlu0 %v3528_v26  ;;  %v3546_v29 = vmul.f32 %v3500_v59, %v5702_v21 }
0x1549   : > { %v3562_v24 = vadd.f32 1e-05, %v3546_v29 }
0x154b   : > { %4482 = vrsqrt.f32 %v3562_v24  ;;  %vm3584_vm12 = vweird.f32 %v3562_v24 }
0x154e   : > { %3532 = vadd.xlane.f32.xlu1 %v3531_v60  ;;  %v3509_v30 = vpop.xlane.xlu2 %3508 }
0x154f   : > { %3538 = vadd.xlane.f32.xlu0 %v3537_v47  ;;  %v3549_v31 = vmul.f32 %v3509_v30, %v5702_v21 }
0x1551   : > { %v4483_v12 = vpop.eup %4482  ;;  %v3565_v25 = vadd.f32 1e-05, %v3549_v31 }
0x1552   : > { %v3579_v19 = vmul.f32 %v4483_v12, %v3562_v24  ;;  %vm3585_vm4 = vweird.f32 %v4483_v12 }
0x1553   : > { %4484 = vrsqrt.f32 %v3565_v25  ;;  %vm3586_vm13 = vmor %vm3584_vm12, %vm3585_vm4  ;;  %vm3614_vm15 = vweird.f32 %v3565_v25 }
0x1554   : > { %v3580_v11 = vmul.f32 %v4483_v12, %v3579_v19 }
0x1556   : > { %v3581_v50 = vmul.f32 0.5, %v3580_v11  ;;  %v3518_v9 = vpop.xlane.xlu2 %3517 }
0x1557   : > { %v3552_v49 = vmul.f32 %v3518_v9, %v5702_v21 }
0x1558   : > { %v3582_v16 = vsub.f32 1.5, %v3581_v50 }
0x1559   : > { %v4485_v34 = vpop.eup %4484  ;;  %v3568_v41 = vadd.f32 1e-05, %v3552_v49 }
0x155a   : > { %v3583_v40 = vmul.f32 %v4483_v12, %v3582_v16  ;;  %v3609_v57 = vmul.f32 %v4485_v34, %v3565_v25  ;;  %vm3615_vm14 = vweird.f32 %v4485_v34 }
0x155b   : > { %4486 = vrsqrt.f32 %v3568_v41  ;;  %vm3616_vm0 = vmor %vm3614_vm15, %vm3615_vm14  ;;  %vm3644_vm3 = vweird.f32 %v3568_v41 }
0x155c   : > { %v3587_v37 = vsel %vm3586_vm13, %v4483_v12, %v3583_v40  ;;  %v3610_v1 = vmul.f32 %v4485_v34, %v3609_v57 }
0x155d   : > { %v3738_v44 = vmul.f32 %v3587_v37, %v6124_v5 }
0x155e   : > { %v3611_v23 = vmul.f32 0.5, %v3610_v1 }
0x155f   : > { %v3757_v56 = vmul.f32 %v6241_v45, %v3738_v44 }
0x1560   : > { %v3612_v6 = vsub.f32 1.5, %v3611_v23 }
0x1561   : > { %v4487_v36 = vpop.eup %4486  ;;  %v6253_v48 = vadd.f32 %v6248_v62, %v3757_v56 }
0x1562   : > { %v3613_v7 = vmul.f32 %v4485_v34, %v3612_v6  ;;  %v3639_v42 = vmul.f32 %v4487_v36, %v3568_v41  ;;  %vm3645_vm2 = vweird.f32 %v4487_v36 }
0x1563   : > { %3792 = vst.msk [vmem:[#allocation2] sm:$0xff] %vm922_vm1, %v6253_v48  ;;  %vm3646_vm5 = vmor %vm3644_vm3, %vm3645_vm2 }
0x1564   : > { %v3617_v54 = vsel %vm3616_vm0, %v4485_v34, %v3613_v7  ;;  %v3640_v22 = vmul.f32 %v4487_v36, %v3639_v42 }
0x1565   : > { %v3741_v5 = vmul.f32 %v3617_v54, %v6132_v8 }
0x1566   : > { %v3641_v15 = vmul.f32 0.5, %v3640_v22 }
0x1567   : > { %v3760_v28 = vmul.f32 %v6241_v45, %v3741_v5 }
0x1568   : > { %v3642_v58 = vsub.f32 1.5, %v3641_v15 }
0x1569   : > { %v6260_v35 = vadd.f32 %v6248_v62, %v3760_v28 }
0x156a   : > { %v3643_v17 = vmul.f32 %v4487_v36, %v3642_v58 }
0x156b   : > { %3795 = vst.msk [vmem:[#allocation2 + $0x18] sm:$0xff] %vm922_vm1, %v6260_v35 }
0x156c   : > { %v3647_v46 = vsel %vm3646_vm5, %v4487_v36, %v3643_v17 }
0x156d   : > { %v3744_v10 = vmul.f32 %v3647_v46, %v6139_v0 }
0x156f   : > { %v3763_v14 = vmul.f32 %v6241_v45, %v3744_v10 }
0x1571   : > { %v6267_v8 = vadd.f32 %v6248_v62, %v3763_v14 }
0x1573   : > { %3798 = vst.msk [vmem:[#allocation2 + $0x30] sm:$0xff] %vm922_vm1, %v6267_v8 }
0x1599   : > { %v3446_v4 = vpop.xlane.xlu0 %3445  ;;  %v3527_v53 = vpop.xlane.xlu2 %3526 }
0x159a   : > { %v3464_v32 = vmul.f32 %v3446_v4, %v5702_v21  ;;  %v3555_v26 = vmul.f32 %v3527_v53, %v5702_v21 }
0x159c   : > { %v6274_v59 = vsub.f32 %v6151_v55, %v3464_v32  ;;  %v3571_v29 = vadd.f32 1e-05, %v3555_v26 }
0x159e   : > { %4488 = vrsqrt.f32 %v3571_v29  ;;  %v3496_v0 = vmul.f32 %v6274_v59, %v6274_v59  ;;  %vm3674_vm7 = vweird.f32 %v3571_v29 }
0x15a0   : > { %v3540_v24 = vsel %vm922_vm1, %v3496_v0, 0.0 }
0x15a1   : > { %v3449_v33 = vpop.xlane.xlu1 %3448  ;;  %v3503_v61 = vpop.xlane.xlu0 %3502  ;;  %3541 = vadd.xlane.f32.xlu1 %v3540_v24 }
0x15a2   : > { %v3465_v60 = vmul.f32 %v3449_v33, %v5702_v21  ;;  %v3547_v47 = vmul.f32 %v3503_v61, %v5702_v21 }
0x15a4   : > { %v4489_v30 = vpop.eup %4488  ;;  %v6282_v31 = vsub.f32 %v6167_v51, %v3465_v60  ;;  %v3563_v55 = vadd.f32 1e-05, %v3547_v47 }
0x15a5   : > { %v3669_v12 = vmul.f32 %v4489_v30, %v3571_v29  ;;  %vm3675_vm6 = vweird.f32 %v4489_v30 }
0x15a6   : > { %4490 = vrsqrt.f32 %v3563_v55  ;;  %v3497_v25 = vmul.f32 %v6282_v31, %v6282_v31  ;;  %vm3676_vm8 = vmor %vm3674_vm7, %vm3675_vm6  ;;  %vm3594_vm10 = vweird.f32 %v3563_v55 }
0x15a7   : > { %v3670_v19 = vmul.f32 %v4489_v30, %v3669_v12 }
0x15a8   : > { %v3543_v11 = vsel %vm922_vm1, %v3497_v25, 0.0 }
0x15a9   : > { %v3671_v50 = vmul.f32 0.5, %v3670_v19  ;;  %v3506_v9 = vpop.xlane.xlu1 %3505  ;;  %v3512_v49 = vpop.xlane.xlu0 %3511  ;;  %3544 = vadd.xlane.f32.xlu2 %v3543_v11 }
0x15aa   : > { %v3548_v16 = vmul.f32 %v3506_v9, %v5702_v21  ;;  %v3550_v34 = vmul.f32 %v3512_v49, %v5702_v21 }
0x15ab   : > { %v3672_v41 = vsub.f32 1.5, %v3671_v50 }
0x15ac   : > { %v4491_v51 = vpop.eup %4490  ;;  %v3564_v40 = vadd.f32 1e-05, %v3548_v16  ;;  %v6289_v57 = vadd.f32 1e-05, %v3550_v34 }
0x15ad   : > { %v3673_v37 = vmul.f32 %v4489_v30, %v3672_v41  ;;  %v3589_v1 = vmul.f32 %v4491_v51, %v3563_v55  ;;  %vm3595_vm9 = vweird.f32 %v4491_v51 }
0x15ae   : > { %4492 = vrsqrt.f32 %v3564_v40  ;;  %vm3596_vm11 = vmor %vm3594_vm10, %vm3595_vm9  ;;  %vm3604_vm13 = vweird.f32 %v3564_v40  ;;  %vm3624_vm15 = vweird.f32 %v6289_v57 }
0x15af   : > { %v3677_v44 = vsel %vm3676_vm8, %v4489_v30, %v3673_v37  ;;  %v3590_v23 = vmul.f32 %v4491_v51, %v3589_v1  ;;  %4494 = vrsqrt.f32 %v6289_v57 }
0x15b0   : > { %v3747_v56 = vmul.f32 %v3677_v44, %v6147_v52 }
0x15b1   : > { %v3591_v6 = vmul.f32 0.5, %v3590_v23  ;;  %v3515_v36 = vpop.xlane.xlu1 %3514  ;;  %v3536_v7 = vpop.xlane.xlu2 %3535 }
0x15b2   : > { %v3766_v42 = vmul.f32 %v6241_v45, %v3747_v56  ;;  %v3551_v54 = vmul.f32 %v3515_v36, %v5702_v21  ;;  %v3521_v22 = vpop.xlane.xlu0 %3520  ;;  %v3558_v5 = vmul.f32 %v3536_v7, %v5702_v21 }
0x15b3   : > { %v3592_v15 = vsub.f32 1.5, %v3591_v6  ;;  %v3553_v28 = vmul.f32 %v3521_v22, %v5702_v21 }
0x15b4   : > { %v4493_v58 = vpop.eup %4492  ;;  %v6298_v17 = vadd.f32 %v6248_v62, %v3766_v42  ;;  %v6300_v46 = vadd.f32 1e-05, %v3551_v54  ;;  %v6302_v52 = vadd.f32 1e-05, %v3558_v5 }
0x15b5   : > { %v4495_v10 = vpop.eup %4494  ;;  %v3593_v14 = vmul.f32 %v4491_v51, %v3592_v15  ;;  %v3599_v4 = vmul.f32 %v4493_v58, %v3564_v40  ;;  %v6304_v53 = vadd.f32 1e-05, %v3553_v28  ;;  %vm3605_vm4 = vweird.f32 %v4493_v58 }
0x15b6   : > { %3801 = vst.msk [vmem:[#allocation2 + $0x48] sm:$0xff] %vm922_vm1, %v6298_v17  ;;  %v3619_v32 = vmul.f32 %v4495_v10, %v6289_v57  ;;  %4496 = vrsqrt.f32 %v6300_v46  ;;  %vm3625_vm12 = vweird.f32 %v4495_v10  ;;  %vm3606_vm14 = vmor %vm3604_vm13, %vm3605_vm4  ;;  %vm3634_vm2 = vweird.f32 %v6300_v46 }
0x15b7   : > { %v3597_v26 = vsel %vm3596_vm11, %v4491_v51, %v3593_v14  ;;  %v3600_v29 = vmul.f32 %v4493_v58, %v3599_v4  ;;  %4498 = vrsqrt.f32 %v6304_v53  ;;  %vm3626_vm0 = vmor %vm3624_vm15, %vm3625_vm12  ;;  %vm3654_vm8 = vweird.f32 %v6304_v53 }
0x15b8   : > { %v3739_v0 = vmul.f32 %v3597_v26, %v6156_v3  ;;  %v3620_v24 = vmul.f32 %v4495_v10, %v3619_v32  ;;  %4500 = vrsqrt.f32 %v6302_v52  ;;  %vm3704_vm9 = vweird.f32 %v6302_v52 }
0x15b9   : > { %v3601_v33 = vmul.f32 0.5, %v3600_v29  ;;  %v3524_v61 = vpop.xlane.xlu1 %3523 }
0x15ba   : > { %v3758_v60 = vmul.f32 %v6241_v45, %v3739_v0  ;;  %v3621_v47 = vmul.f32 0.5, %v3620_v24  ;;  %v3554_v30 = vmul.f32 %v3524_v61, %v5702_v21  ;;  %v3530_v55 = vpop.xlane.xlu0 %3529 }
0x15bb   : > { %v3602_v12 = vsub.f32 1.5, %v3601_v33  ;;  %v3556_v25 = vmul.f32 %v3530_v55, %v5702_v21 }
0x15bc   : > { %v6316_v19 = vpop.eup %4496  ;;  %v6319_v11 = vadd.f32 %v6248_v62, %v3758_v60  ;;  %v3622_v3 = vsub.f32 1.5, %v3621_v47  ;;  %v6321_v50 = vadd.f32 1e-05, %v3554_v30 }
0x15bd   : > { %v4499_v9 = vpop.eup %4498  ;;  %v3603_v49 = vmul.f32 %v4493_v58, %v3602_v12  ;;  %v3629_v16 = vmul.f32 %v6316_v19, %v6300_v46  ;;  %v6325_v34 = vadd.f32 1e-05, %v3556_v25  ;;  %vm3635_vm3 = vweird.f32 %v6316_v19 }
0x15be   : > { %v4501_v41 = vpop.eup %4500  ;;  %3793 = vst.msk [vmem:[#allocation2 + $0x8] sm:$0xff] %vm922_vm1, %v6319_v11  ;;  %v3623_v51 = vmul.f32 %v4495_v10, %v3622_v3  ;;  %v3649_v37 = vmul.f32 %v4499_v9, %v6304_v53  ;;  %4502 = vrsqrt.f32 %v6321_v50  ;;  %vm3655_vm5 = vweird.f32 %v4499_v9  ;;  %vm3636_vm7 = vmor %vm3634_vm2, %vm3635_vm3 }
0x15bf   : > { %v3607_v1 = vsel %vm3606_vm14, %v4493_v58, %v3603_v49  ;;  %v3630_v40 = vmul.f32 %v6316_v19, %v3629_v16  ;;  %v3699_v44 = vmul.f32 %v4501_v41, %v6302_v52  ;;  %4504 = vrsqrt.f32 %v6325_v34  ;;  %vm3656_vm10 = vmor %vm3654_vm8, %vm3655_vm5 }
0x15c0   : > { %v3740_v23 = vmul.f32 %v3607_v1, %v6170_v39  ;;  %v3627_v56 = vsel %vm3626_vm0, %v4495_v10, %v3623_v51  ;;  %v3650_v6 = vmul.f32 %v4499_v9, %v3649_v37  ;;  %vm3705_vm6 = vweird.f32 %v4501_v41 }
0x15c1   : > { %v3742_v57 = vmul.f32 %v3627_v56, %v6173_v27  ;;  %v3631_v36 = vmul.f32 0.5, %v3630_v40  ;;  %v3700_v7 = vmul.f32 %v4501_v41, %v3699_v44  ;;  %v3533_v42 = vpop.xlane.xlu1 %3532  ;;  %vm3706_vm11 = vmor %vm3704_vm9, %vm3705_vm6  ;;  %vm3664_vm12 = vweird.f32 %v6321_v50 }
0x15c2   : > { %v3759_v54 = vmul.f32 %v6241_v45, %v3740_v23  ;;  %v3651_v22 = vmul.f32 0.5, %v3650_v6  ;;  %v3557_v5 = vmul.f32 %v3533_v42, %v5702_v21  ;;  %v3539_v15 = vpop.xlane.xlu0 %3538  ;;  %vm3684_vm15 = vweird.f32 %v6325_v34 }
0x15c3   : > { %v3761_v39 = vmul.f32 %v6241_v45, %v3742_v57  ;;  %v3632_v28 = vsub.f32 1.5, %v3631_v36  ;;  %v3701_v58 = vmul.f32 0.5, %v3700_v7  ;;  %v3559_v10 = vmul.f32 %v3539_v15, %v5702_v21 }
0x15c4   : > { %v4503_v14 = vpop.eup %4502  ;;  %v6345_v27 = vadd.f32 %v6248_v62, %v3759_v54  ;;  %v3652_v4 = vsub.f32 1.5, %v3651_v22  ;;  %v6347_v32 = vadd.f32 1e-05, %v3557_v5 }
0x15c5   : > { %v6350_v26 = vadd.f32 %v6248_v62, %v3761_v39  ;;  %v3633_v29 = vmul.f32 %v6316_v19, %v3632_v28  ;;  %v3702_v0 = vsub.f32 1.5, %v3701_v58  ;;  %v3659_v24 = vmul.f32 %v4503_v14, %v6321_v50  ;;  %v4505_v61 = vpop.eup %4504 }
0x15c6   : > { %3794 = vst.msk [vmem:[#allocation2 + $0x10] sm:$0xff] %vm922_vm1, %v6345_v27  ;;  %v3653_v33 = vmul.f32 %v4499_v9, %v3652_v4  ;;  %4506 = vrsqrt.f32 %v6347_v32  ;;  %v3575_v55 = vadd.f32 1e-05, %v3559_v10  ;;  %v3679_v52 = vmul.f32 %v4505_v61, %v6325_v34 }
0x15c7   : > { %3796 = vst.msk [vmem:[#allocation2 + $0x20] sm:$0xff] %vm922_vm1, %v6350_v26  ;;  %v3637_v60 = vsel %vm3636_vm7, %v6316_v19, %v3633_v29  ;;  %v3703_v47 = vmul.f32 %v4501_v41, %v3702_v0  ;;  %v3660_v30 = vmul.f32 %v4503_v14, %v3659_v24  ;;  %vm3665_vm4 = vweird.f32 %v4503_v14 }
0x15c8   : > { %v3743_v46 = vmul.f32 %v3637_v60, %v6185_v38  ;;  %v3657_v12 = vsel %vm3656_vm10, %v4499_v9, %v3653_v33  ;;  %4508 = vrsqrt.f32 %v3575_v55  ;;  %v3680_v16 = vmul.f32 %v4505_v61, %v3679_v52  ;;  %vm3666_vm13 = vmor %vm3664_vm12, %vm3665_vm4 }
0x15c9   : > { %v3745_v53 = vmul.f32 %v3657_v12, %v6190_v20  ;;  %v3707_v25 = vsel %vm3706_vm11, %v4501_v41, %v3703_v47  ;;  %v3661_v3 = vmul.f32 0.5, %v3660_v30  ;;  %vm3685_vm14 = vweird.f32 %v4505_v61 }
0x15ca   : > { %v3762_v49 = vmul.f32 %v6241_v45, %v3743_v46  ;;  %v3750_v19 = vmul.f32 %v3707_v25, %v6195_v2  ;;  %v3681_v40 = vmul.f32 0.5, %v3680_v16  ;;  %vm3686_vm0 = vmor %vm3684_vm15, %vm3685_vm14  ;;  %vm3694_vm3 = vweird.f32 %v6347_v32 }
0x15cb   : > { %v3764_v51 = vmul.f32 %v6241_v45, %v3745_v53  ;;  %v3662_v37 = vsub.f32 1.5, %v3661_v3  ;;  %vm3714_vm7 = vweird.f32 %v3575_v55 }
0x15cc   : > { %v4507_v38 = vpop.eup %4506  ;;  %v6375_v9 = vadd.f32 %v6248_v62, %v3762_v49  ;;  %v3769_v1 = vmul.f32 %v6241_v45, %v3750_v19  ;;  %v3682_v23 = vsub.f32 1.5, %v3681_v40 }
0x15cd   : > { %v6379_v20 = vadd.f32 %v6248_v62, %v3764_v51  ;;  %v3663_v41 = vmul.f32 %v4503_v14, %v3662_v37  ;;  %v3689_v2 = vmul.f32 %v4507_v38, %v6347_v32  ;;  %vm3695_vm2 = vweird.f32 %v4507_v38 }
0x15ce   : > { %3797 = vst.msk [vmem:[#allocation2 + $0x28] sm:$0xff] %vm922_vm1, %v6375_v9  ;;  %v6386_v44 = vadd.f32 %v6248_v62, %v3769_v1  ;;  %v4509_v56 = vpop.eup %4508  ;;  %v3683_v36 = vmul.f32 %v4505_v61, %v3682_v23  ;;  %vm3696_vm5 = vmor %vm3694_vm3, %vm3695_vm2 }
0x15cf   : > { %3799 = vst.msk [vmem:[#allocation2 + $0x38] sm:$0xff] %vm922_vm1, %v6379_v20  ;;  %v3667_v6 = vsel %vm3666_vm13, %v4503_v14, %v3663_v41  ;;  %v3690_v57 = vmul.f32 %v4507_v38, %v3689_v2  ;;  %v3709_v7 = vmul.f32 %v4509_v56, %v3575_v55  ;;  %vm3715_vm6 = vweird.f32 %v4509_v56 }
0x15d0   : > { %3804 = vst.msk [vmem:[#allocation2 + $0x60] sm:$0xff] %vm922_vm1, %v6386_v44  ;;  %v3746_v50 = vmul.f32 %v3667_v6, %v6205_v18  ;;  %v3687_v22 = vsel %vm3686_vm0, %v4505_v61, %v3683_v36  ;;  %vm3716_vm8 = vmor %vm3714_vm7, %vm3715_vm6 }
0x15d1   : > { %v3691_v42 = vmul.f32 0.5, %v3690_v57  ;;  %v3710_v5 = vmul.f32 %v4509_v56, %v3709_v7  ;;  %v3748_v15 = vmul.f32 %v3687_v22, %v6210_v43 }
0x15d2   : > { %v3765_v54 = vmul.f32 %v6241_v45, %v3746_v50 }
0x15d3   : > { %v3692_v39 = vsub.f32 1.5, %v3691_v42  ;;  %v3711_v58 = vmul.f32 0.5, %v3710_v5  ;;  %v3767_v18 = vmul.f32 %v6241_v45, %v3748_v15 }
0x15d4   : > { %v6397_v28 = vadd.f32 %v6248_v62, %v3765_v54 }
0x15d5   : > { %v3693_v10 = vmul.f32 %v4507_v38, %v3692_v39  ;;  %v3712_v34 = vsub.f32 1.5, %v3711_v58  ;;  %v6404_v14 = vadd.f32 %v6248_v62, %v3767_v18 }
0x15d6   : > { %3800 = vst.msk [vmem:[#allocation2 + $0x40] sm:$0xff] %vm922_vm1, %v6397_v28 }
0x15d7   : > { %v3697_v43 = vsel %vm3696_vm5, %v4507_v38, %v3693_v10  ;;  %v3713_v29 = vmul.f32 %v4509_v56, %v3712_v34  ;;  %3802 = vst.msk [vmem:[#allocation2 + $0x50] sm:$0xff] %vm922_vm1, %v6404_v14 }
0x15d8   : > { %v3749_v4 = vmul.f32 %v3697_v43, %v6220_v63 }
0x15d9   : > { %v3717_v0 = vsel %vm3716_vm8, %v4509_v56, %v3713_v29 }
0x15da   : > { %v3768_v32 = vmul.f32 %v6241_v45, %v3749_v4  ;;  %v3751_v24 = vmul.f32 %v3717_v0, %v6224_v13 }
0x15dc   : > { %v3787_v33 = vadd.f32 %v6248_v62, %v3768_v32  ;;  %v3770_v61 = vmul.f32 %v6241_v45, %v3751_v24 }
0x15de   : > { %3803 = vst.msk [vmem:[#allocation2 + $0x58] sm:$0xff] %vm922_vm1, %v3787_v33  ;;  %v3789_v60 = vadd.f32 %v6248_v62, %v3770_v61 }
0x15e0   : > { %3805 = vst.msk [vmem:[#allocation2 + $0x68] sm:$0xff] %vm922_vm1, %v3789_v60 }
0x1614   : > { %v3542_v63 = vpop.xlane.xlu1 %3541 }
0x1615   : > { %v3560_v47 = vmul.f32 %v3542_v63, %v5702_v21 }
0x1617   : > { %v3576_v30 = vadd.f32 1e-05, %v3560_v47 }
0x1619   : > { %4510 = vrsqrt.f32 %v3576_v30  ;;  %vm3724_vm10 = vweird.f32 %v3576_v30 }
0x161c   : > { %v3545_v55 = vpop.xlane.xlu2 %3544 }
0x161d   : > { %v3561_v46 = vmul.f32 %v3545_v55, %v5702_v21 }
0x161f   : > { %v4511_v12 = vpop.eup %4510  ;;  %v3577_v13 = vadd.f32 1e-05, %v3561_v46 }
0x1620   : > { %v3719_v52 = vmul.f32 %v4511_v12, %v3576_v30  ;;  %vm3725_vm9 = vweird.f32 %v4511_v12 }
0x1621   : > { %4512 = vrsqrt.f32 %v3577_v13  ;;  %vm3726_vm11 = vmor %vm3724_vm10, %vm3725_vm9  ;;  %vm3734_vm12 = vweird.f32 %v3577_v13 }
0x1622   : > { %v3720_v53 = vmul.f32 %v4511_v12, %v3719_v52 }
0x1624   : > { %v3721_v25 = vmul.f32 0.5, %v3720_v53 }
0x1626   : > { %v3722_v3 = vsub.f32 1.5, %v3721_v25 }
0x1627   : > { %v4513_v49 = vpop.eup %4512 }
0x1628   : > { %v3723_v19 = vmul.f32 %v4511_v12, %v3722_v3  ;;  %v3729_v16 = vmul.f32 %v4513_v49, %v3577_v13  ;;  %vm3735_vm4 = vweird.f32 %v4513_v49 }
0x1629   : > { %vm3736_vm13 = vmor %vm3734_vm12, %vm3735_vm4 }
0x162a   : > { %v3727_v51 = vsel %vm3726_vm11, %v4511_v12, %v3723_v19  ;;  %v3730_v37 = vmul.f32 %v4513_v49, %v3729_v16 }
0x162b   : > { %v3752_v38 = vmul.f32 %v3727_v51, %v6274_v59 }
0x162c   : > { %v3731_v1 = vmul.f32 0.5, %v3730_v37 }
0x162d   : > { %v3771_v21 = vmul.f32 %v6241_v45, %v3752_v38 }
0x162e   : > { %v3732_v40 = vsub.f32 1.5, %v3731_v1 }
0x162f   : > { %v3790_v41 = vadd.f32 %v6248_v62, %v3771_v21 }
0x1630   : > { %v3733_v2 = vmul.f32 %v4513_v49, %v3732_v40 }
0x1631   : > { %3806 = vst.msk [vmem:[#allocation2 + $0x70] sm:$0xff] %vm922_vm1, %v3790_v41 }
0x1632   : > { %v3737_v23 = vsel %vm3736_vm13, %v4513_v49, %v3733_v2 }
0x1633   : > { %v3753_v56 = vmul.f32 %v3737_v23, %v6282_v31 }
0x1635   : > { %v3772_v6 = vmul.f32 %v6241_v45, %v3753_v56  ;;  %3811 = sbr.rel (%p4136_p5) target bundleno = 5706 (0x164a), region = 96 }
0x1637   : > { %v3791_v57 = vadd.f32 %v6248_v62, %v3772_v6 }
0x1639   : > { %3807 = vst.msk [vmem:[#allocation2 + $0x78] sm:$0xff] %vm922_vm1, %v3791_v57 }
0x163a   : > { %3812 = vst.msk [vmem:[%s6559_s9] sm:$0xff] %vm922_vm1, %v6253_v48 }
0x163b   : > { %3813 = vst.msk [vmem:[%s6559_s9 + $0x8] sm:$0xff] %vm922_vm1, %v6319_v11 }
0x163c   : > { %3814 = vst.msk [vmem:[%s6559_s9 + $0x10] sm:$0xff] %vm922_vm1, %v6345_v27 }
0x163d   : > { %3815 = vst.msk [vmem:[%s6559_s9 + $0x18] sm:$0xff] %vm922_vm1, %v6260_v35 }
0x163e   : > { %3816 = vst.msk [vmem:[%s6559_s9 + $0x20] sm:$0xff] %vm922_vm1, %v6350_v26 }
0x163f   : > { %3817 = vst.msk [vmem:[%s6559_s9 + $0x28] sm:$0xff] %vm922_vm1, %v6375_v9 }
0x1640   : > { %3818 = vst.msk [vmem:[%s6559_s9 + $0x30] sm:$0xff] %vm922_vm1, %v6267_v8 }
0x1641   : > { %3819 = vst.msk [vmem:[%s6559_s9 + $0x38] sm:$0xff] %vm922_vm1, %v6379_v20 }
0x1642   : > { %3820 = vst.msk [vmem:[%s6559_s9 + $0x40] sm:$0xff] %vm922_vm1, %v6397_v28 }
0x1643   : > { %3821 = vst.msk [vmem:[%s6559_s9 + $0x48] sm:$0xff] %vm922_vm1, %v6298_v17 }
0x1644   : > { %3822 = vst.msk [vmem:[%s6559_s9 + $0x50] sm:$0xff] %vm922_vm1, %v6404_v14 }
0x1645   : > { %3823 = vst.msk [vmem:[%s6559_s9 + $0x58] sm:$0xff] %vm922_vm1, %v3787_v33 }
0x1646   : > { %3824 = vst.msk [vmem:[%s6559_s9 + $0x60] sm:$0xff] %vm922_vm1, %v6386_v44 }
0x1647   : > { %3825 = vst.msk [vmem:[%s6559_s9 + $0x68] sm:$0xff] %vm922_vm1, %v3789_v60 }
0x1648   : > { %3826 = vst.msk [vmem:[%s6559_s9 + $0x70] sm:$0xff] %vm922_vm1, %v3790_v41 }
0x1649   : > { %3827 = vst.msk [vmem:[%s6559_s9 + $0x78] sm:$0xff] %vm922_vm1, %v3791_v57 }
0x164a PF: > { %s6560_s18 = sld [smem:[#allocation3_spill]] }
0x1650   : > { %s27_s24 = sadd.s32 1, %s6560_s18  }
0x1651   : > { %p24_p6 = scmp.ge.s32.totalorder %s27_s24, 4  }
0x1653   :  { %26 = sbr.rel (!%p24_p6) target bundleno = 11 (0xb), region = 161 }

</bundles_post_ra>
